<compile_context>
chip_gen: v6e
topology: v6e:2x2x1
jax: 0.10.0
libtpu: 0.0.40
codegen_flags: <defaults>
</compile_context>

<pallas_src>
import functools

import numpy as np
import jax
import jax.numpy as jnp
from jax.experimental import pallas as pl
from jax.experimental.pallas import tpu as pltpu


# ---------------------------------------------------------------------------
# Static network geometry (DQ_nashN on 9-channel 9x9 boards).
# ---------------------------------------------------------------------------
H0 = W0 = 9            # input spatial size
CIN0 = 9               # input channels
COUT = 16              # channels of all three conv layers
PAD = 2
EPS = 1e-5             # nn.BatchNorm2d default

H1, W1 = H0 + 2, W0 + 2     # 11x11 after conv1 (k=3, stride=1, pad=2)
H2, W2 = H1 + 2, W1 + 2     # 13x13 after conv2
H3, W3 = H2 + 2, W2 + 2     # 15x15 after conv3
HEAD_IN = COUT * H3 * W3    # 3600

# Lane-folded sizes: activations are [batch, h, w*channels].
K1, K2, K3 = W0 * CIN0, W1 * COUT, W2 * COUT     # conv contraction dims 81/176/208
N1, N2, N3 = W1 * COUT, W2 * COUT, W3 * COUT     # conv output dims      176/208/240
HP1, HP2, HP3 = H0 + 2 * PAD, H1 + 2 * PAD, H2 + 2 * PAD   # h-padded canvases 13/15/17


# ---------------------------------------------------------------------------
# Fused kernel
# ---------------------------------------------------------------------------
def _conv_bn_relu(canvas_ref, wb_ref, gamma, beta, *, tile, hin, wo, kdim, nout):
    """3x3 conv (kw taps + w-padding folded into banded weights, h-padding as
    zero border rows in the canvas) + BatchNorm(batch stats) + ReLU.

    canvas_ref : [tile, hin+4, kdim]  f32 (rows 0,1 and hin+2,hin+3 are zero)
    wb_ref     : [3, kdim, nout]      bf16 banded per-kh weight matrices
    gamma,beta : [1, COUT]            f32
    Returns a [tile*(hin+2), nout] f32 value; every position is a valid output
    (no padding columns), so BN statistics are plain sums.
    """
    ho = hin + 2
    rows = tile * ho

    def slab(di):
        s = canvas_ref[:, di:di + ho, :].reshape(rows, kdim)
        return s.astype(jnp.bfloat16)           # bf16 MXU operands, f32 acc

    acc = jnp.dot(slab(0), wb_ref[0], preferred_element_type=jnp.float32)
    for di in (1, 2):
        acc = acc + jnp.dot(slab(di), wb_ref[di],
                            preferred_element_type=jnp.float32)

    # Per-channel training-mode (biased) batch statistics.  Channel o occupies
    # columns {j*COUT + o}; reduce rows first (XLU), then fold the wo groups.
    colsum = jnp.sum(acc, axis=0, keepdims=True)          # [1, nout]
    colsq = jnp.sum(acc * acc, axis=0, keepdims=True)     # [1, nout]
    csum = colsum[:, 0:COUT]
    csq = colsq[:, 0:COUT]
    for j in range(1, wo):
        csum = csum + colsum[:, j * COUT:(j + 1) * COUT]
        csq = csq + colsq[:, j * COUT:(j + 1) * COUT]
    n = float(rows * wo)
    mean = csum / n
    var = csq / n - mean * mean                 # biased var (PyTorch training BN)
    inv = jax.lax.rsqrt(var + EPS)
    scale = gamma * inv                                    # [1, COUT]
    shift = beta - mean * scale                            # [1, COUT]
    scale_cols = jnp.concatenate([scale] * wo, axis=1)     # [1, nout]
    shift_cols = jnp.concatenate([shift] * wo, axis=1)     # [1, nout]
    return jnp.maximum(acc * scale_cols + shift_cols, 0.0)


def dq_nashn_kernel(x_ref, w1_ref, w2_ref, w3_ref, bn_ref, hw_ref, bh_ref,
                    o_ref, c1_ref, c2_ref, c3_ref, *, tile):
    # Refresh only the 2-row zero borders of each canvas (interior rows are
    # fully overwritten every step).  Done every step so the kernel is correct
    # under megacore grid sharding and uninitialized scratch.
    for cref in (c1_ref, c2_ref, c3_ref):
        hp, k = cref.shape[1], cref.shape[2]
        z2 = jnp.zeros((tile, 2, k), cref.dtype)
        cref[:, 0:2, :] = z2
        cref[:, hp - 2:hp, :] = z2

    # ---- layer 1: conv1 + bn1 + relu --------------------------------------
    c1_ref[:, PAD:PAD + H0, :] = x_ref[...]
    y1 = _conv_bn_relu(c1_ref, w1_ref, bn_ref[0:1, :], bn_ref[1:2, :],
                       tile=tile, hin=H0, wo=W1, kdim=K1, nout=N1)
    c2_ref[:, PAD:PAD + H1, :] = y1.reshape(tile, H1, N1)

    # ---- layer 2 ------------------------------------------------------------
    y2 = _conv_bn_relu(c2_ref, w2_ref, bn_ref[2:3, :], bn_ref[3:4, :],
                       tile=tile, hin=H1, wo=W2, kdim=K2, nout=N2)
    c3_ref[:, PAD:PAD + H2, :] = y2.reshape(tile, H2, N2)

    # ---- layer 3 ------------------------------------------------------------
    y3 = _conv_bn_relu(c3_ref, w3_ref, bn_ref[4:5, :], bn_ref[5:6, :],
                       tile=tile, hin=H2, wo=W3, kdim=K3, nout=N3)

    # ---- head: Linear(3600, 1) as broadcast multiply + reductions -----------
    z = y3.reshape(tile, H3, N3) * hw_ref[...]        # [tile, 15, 240]
    zs = jnp.sum(z, axis=2, keepdims=True)            # lane reduce  -> [tile,15,1]
    o_ref[...] = jnp.sum(zs, axis=1) + bh_ref[...]    # sublane reduce -> [tile,1]


# ---------------------------------------------------------------------------
# Wrapper: weight re-layouts + pallas_call
# ---------------------------------------------------------------------------
def _banded_conv_weight(w_oihw, win):
    """OIHW conv weight -> [3, win*cin, (win+2)*cout] banded matrices.

    For kh index di:  Wb[di][jin*cin + c, jout*cout + o] = w[o, c, di, dj] with
    dj = jin - jout + 2 when 0 <= dj < 3, else 0.  This folds the kw taps AND
    the conv's w-direction zero padding into the matmul contraction.
    """
    cout, cin, kh, kw = w_oihw.shape
    wo = win + 2
    sel = np.zeros((kw, win, wo), np.float32)
    for dj in range(kw):
        for jout in range(wo):
            jin = jout + dj - PAD
            if 0 <= jin < win:
                sel[dj, jin, jout] = 1.0
    wb = jnp.einsum('ocde,ejw->djcwo', w_oihw.astype(jnp.float32),
                    jnp.asarray(sel))
    return wb.reshape(kh, win * cin, wo * cout).astype(jnp.bfloat16)


def _head_weight(hw):
    """[1, 3600] head weight (PyTorch NCHW .view flatten: c*225 + i*15 + j)
    -> [H3, W3*COUT] matching the kernel's [row, w*channel] layout."""
    w = hw.reshape(COUT, H3, W3)            # [o, i, j]
    w = jnp.transpose(w, (1, 2, 0))         # [i, j, o]
    return w.reshape(H3, W3 * COUT).astype(jnp.float32)


def _pick_batch_tile(batch, max_tile=256):
    # Tile sized so the per-step working set fits comfortably in v7x's 64 MiB
    # physical VMEM (and easily in v5e/v6e's 128 MiB).
    if batch <= max_tile:
        return batch
    for t in range(max_tile, 7, -1):
        if batch % t == 0 and t % 8 == 0:
            return t
    return batch   # fall back to a single (large) step rather than be wrong


@jax.jit
def dq_nashn_forward(x_nchw, p):
    batch = x_nchw.shape[0]
    assert x_nchw.shape[1:] == (CIN0, H0, W0), x_nchw.shape
    tile = _pick_batch_tile(batch)
    # TODO(synk): when batch > tile, BatchNorm batch statistics are computed
    # per batch tile (grid step) instead of over the full batch; exact
    # full-batch statistics would need a two-pass sum/sumsq grid structure.
    assert batch % tile == 0
    nsteps = batch // tile

    # NHWC, then fold (w, c) onto the lane axis: [B, H, W*C].
    x = jnp.transpose(x_nchw, (0, 2, 3, 1)).reshape(batch, H0, K1)
    x = x.astype(jnp.float32)
    w1b = _banded_conv_weight(p["w1"], W0)                  # [3,  81, 176] bf16
    w2b = _banded_conv_weight(p["w2"], W1)                  # [3, 176, 208] bf16
    w3b = _banded_conv_weight(p["w3"], W2)                  # [3, 208, 240] bf16
    bn = jnp.stack([p["g1"], p["be1"], p["g2"], p["be2"], p["g3"], p["be3"]],
                   axis=0).astype(jnp.float32)              # [6, COUT]
    hw = _head_weight(p["hw"])                              # [15, 240]
    bh = p["hb"].reshape(1, 1).astype(jnp.float32)
    # NOTE: conv biases p["b1"], p["b2"], p["b3"] are intentionally unused:
    # with batch-statistics BatchNorm, (y + b) - mean(y + b) == y - mean(y).

    def const_spec(shape):
        return pl.BlockSpec(shape, lambda i: (0,) * len(shape))

    # Explicit VMEM budget (per-step canvases + live f32 intermediates +
    # resident weights + double-buffered input), capped for v7x.
    canv_bytes = tile * (HP1 * K1 + HP2 * K2 + HP3 * K3) * 4
    act_bytes = tile * (H1 * N1 + H2 * N2 + H3 * N3) * 4 * 3
    w_bytes = 3 * (K1 * N1 + K2 * N2 + K3 * N3) * 2 + (6 * COUT + H3 * N3 + 4) * 4
    in_bytes = tile * H0 * K1 * 4 * 2
    est = canv_bytes + act_bytes + w_bytes + in_bytes
    vmem_limit = int(min(56 * 2 ** 20, max(32 * 2 ** 20, 2 * est)))

    return pl.pallas_call(
        functools.partial(dq_nashn_kernel, tile=tile),
        out_shape=jax.ShapeDtypeStruct((batch, 1), jnp.float32),
        grid=(nsteps,),
        in_specs=[
            pl.BlockSpec((tile, H0, K1), lambda i: (i, 0, 0)),
            const_spec(w1b.shape), const_spec(w2b.shape), const_spec(w3b.shape),
            const_spec(bn.shape), const_spec(hw.shape), const_spec(bh.shape),
        ],
        out_specs=pl.BlockSpec((tile, 1), lambda i: (i, 0)),
        scratch_shapes=[
            pltpu.VMEM((tile, HP1, K1), jnp.float32),   # padded layer-1 canvas
            pltpu.VMEM((tile, HP2, K2), jnp.float32),   # padded layer-2 canvas
            pltpu.VMEM((tile, HP3, K3), jnp.float32),   # padded layer-3 canvas
        ],
        compiler_params=pltpu.CompilerParams(
            dimension_semantics=("parallel",),
            vmem_limit_bytes=vmem_limit),
    )(x, w1b, w2b, w3b, bn, hw, bh)


# ---------------------------------------------------------------------------
# Pure-JAX reference with the same precision policy (bf16 conv operands,
# f32 accumulation / BN / head) for a correctness check.
# ---------------------------------------------------------------------------
def dq_nashn_reference(x_nchw, p):
    def q(a):
        return a.astype(jnp.bfloat16).astype(jnp.float32)

    def conv(x, w):                             # x: [B,C,H,W] f32, w: OIHW
        xq, wq = q(x), q(w)
        b, c, h, wd = x.shape
        ho, wo = h + 2, wd + 2
        xp = jnp.pad(xq, ((0, 0), (0, 0), (PAD, PAD), (PAD, PAD)))
        out = jnp.zeros((b, w.shape[0], ho, wo), jnp.float32)
        for di in range(3):
            for dj in range(3):
                patch = xp[:, :, di:di + ho, dj:dj + wo]
                out = out + jnp.einsum('bchw,oc->bohw', patch, wq[:, :, di, dj])
        return out                              # conv bias dropped (BN no-op)

    def bn_relu(y, g, be):
        mean = jnp.mean(y, axis=(0, 2, 3), keepdims=True)
        var = jnp.mean((y - mean) ** 2, axis=(0, 2, 3), keepdims=True)
        yn = (y - mean) * jax.lax.rsqrt(var + EPS)
        yn = yn * g.reshape(1, -1, 1, 1) + be.reshape(1, -1, 1, 1)
        return jnp.maximum(yn, 0.0)

    y = bn_relu(conv(x_nchw.astype(jnp.float32), p["w1"]), p["g1"], p["be1"])
    y = bn_relu(conv(y, p["w2"]), p["g2"], p["be2"])
    y = bn_relu(conv(y, p["w3"]), p["g3"], p["be3"])
    flat = y.reshape(y.shape[0], -1)            # NCHW flatten, like .view(B,-1)
    return flat @ p["hw"].T.astype(jnp.float32) + p["hb"]


def init_params(key):
    ks = jax.random.split(key, 14)
    p = {}
    p["w1"] = 0.1 * jax.random.normal(ks[0], (COUT, CIN0, 3, 3), jnp.float32)
    p["b1"] = 0.1 * jax.random.normal(ks[1], (COUT,), jnp.float32)  # no-op (BN)
    p["w2"] = 0.1 * jax.random.normal(ks[2], (COUT, COUT, 3, 3), jnp.float32)
    p["b2"] = 0.1 * jax.random.normal(ks[3], (COUT,), jnp.float32)  # no-op (BN)
    p["w3"] = 0.1 * jax.random.normal(ks[4], (COUT, COUT, 3, 3), jnp.float32)
    p["b3"] = 0.1 * jax.random.normal(ks[5], (COUT,), jnp.float32)  # no-op (BN)
    p["g1"] = 1.0 + 0.1 * jax.random.normal(ks[6], (COUT,), jnp.float32)
    p["be1"] = 0.1 * jax.random.normal(ks[7], (COUT,), jnp.float32)
    p["g2"] = 1.0 + 0.1 * jax.random.normal(ks[8], (COUT,), jnp.float32)
    p["be2"] = 0.1 * jax.random.normal(ks[9], (COUT,), jnp.float32)
    p["g3"] = 1.0 + 0.1 * jax.random.normal(ks[10], (COUT,), jnp.float32)
    p["be3"] = 0.1 * jax.random.normal(ks[11], (COUT,), jnp.float32)
    p["hw"] = 0.01 * jax.random.normal(ks[12], (1, HEAD_IN), jnp.float32)
    p["hb"] = 0.01 * jax.random.normal(ks[13], (1,), jnp.float32)
    return p


if __name__ == "__main__":
    key = jax.random.PRNGKey(0)
    pkey, xkey = jax.random.split(key)
    params = init_params(pkey)
    # 9x9 boards: three pad=2 convs -> 15x15 and 16*15*15 == 3600 matches the
    # Linear(3600, 1) head, exactly like the PyTorch module.
    x = jax.random.normal(xkey, (2, CIN0, H0, W0), jnp.float32)    # NCHW
    out = dq_nashn_forward(x, params)
    jax.block_until_ready(out)
    assert out.shape == (2, 1), out.shape

    ref = dq_nashn_reference(x, params)
    err = float(jnp.max(jnp.abs(out - ref)))
    scale = float(jnp.max(jnp.abs(ref)))
    assert err <= 2e-2 * max(scale, 1.0), (err, scale)
    print("KERNEL_OK")
</pallas_src>

<mosaic_0001>
module attributes {stable_mosaic.version = 11 : i64} {
  func.func @dq_nashn_kernel(%arg0: i32, %arg1: memref<2x9x81xf32, #tpu.memory_space<vmem>>, %arg2: memref<3x81x176xbf16, #tpu.memory_space<vmem>>, %arg3: memref<3x176x208xbf16, #tpu.memory_space<vmem>>, %arg4: memref<3x208x240xbf16, #tpu.memory_space<vmem>>, %arg5: memref<6x16xf32, #tpu.memory_space<vmem>>, %arg6: memref<15x240xf32, #tpu.memory_space<vmem>>, %arg7: memref<1x1xf32, #tpu.memory_space<vmem>>, %arg8: memref<2x1xf32, #tpu.memory_space<vmem>>, %arg9: memref<2x13x81xf32, #tpu.memory_space<vmem>>, %arg10: memref<2x15x176xf32, #tpu.memory_space<vmem>>, %arg11: memref<2x17x208xf32, #tpu.memory_space<vmem>>) attributes {dimension_semantics = [#tpu.dimension_semantics<parallel>], iteration_bounds = array<i64: 1>, scalar_prefetch = 0 : i64, scratch_operands = 3 : i64, tpu.core_type = #tpu.core_type<tc>, window_params = [{transform_indices = @transform_0, window_bounds = array<i64: 2, 9, 81>}, {pipeline_mode = #tpu.pipeline_mode<synchronous>, transform_indices = @transform_1, window_bounds = array<i64: 3, 81, 176>}, {pipeline_mode = #tpu.pipeline_mode<synchronous>, transform_indices = @transform_2, window_bounds = array<i64: 3, 176, 208>}, {pipeline_mode = #tpu.pipeline_mode<synchronous>, transform_indices = @transform_3, window_bounds = array<i64: 3, 208, 240>}, {pipeline_mode = #tpu.pipeline_mode<synchronous>, transform_indices = @transform_4, window_bounds = array<i64: 6, 16>}, {pipeline_mode = #tpu.pipeline_mode<synchronous>, transform_indices = @transform_5, window_bounds = array<i64: 15, 240>}, {pipeline_mode = #tpu.pipeline_mode<synchronous>, transform_indices = @transform_6, window_bounds = array<i64: 1, 1>}, {transform_indices = @transform_7, window_bounds = array<i64: 2, 1>}]} {
    %cst = arith.constant 0.000000e+00 : f32
    %0 = vector.broadcast %cst : f32 to vector<2x2x81xf32>
    %c0 = arith.constant 0 : index
    %c0_0 = arith.constant 0 : index
    %c0_1 = arith.constant 0 : index
    %1 = vector.load %arg9[%c0, %c0_0, %c0_1] : memref<2x13x81xf32, #tpu.memory_space<vmem>>, vector<2x2x81xf32>
    tpu.vector_store %arg9[%c0, %c0_0, %c0_1], %0 {strides = array<i32>} : memref<2x13x81xf32, #tpu.memory_space<vmem>>, vector<2x2x81xf32>,
    %c0_2 = arith.constant 0 : index
    %c11 = arith.constant 11 : index
    %c0_3 = arith.constant 0 : index
    %2 = vector.load %arg9[%c0_2, %c11, %c0_3] : memref<2x13x81xf32, #tpu.memory_space<vmem>>, vector<2x2x81xf32>
    tpu.vector_store %arg9[%c0_2, %c11, %c0_3], %0 {strides = array<i32>} : memref<2x13x81xf32, #tpu.memory_space<vmem>>, vector<2x2x81xf32>,
    %cst_4 = arith.constant 0.000000e+00 : f32
    %3 = vector.broadcast %cst_4 : f32 to vector<2x2x176xf32>
    %c0_5 = arith.constant 0 : index
    %c0_6 = arith.constant 0 : index
    %c0_7 = arith.constant 0 : index
    %4 = vector.load %arg10[%c0_5, %c0_6, %c0_7] : memref<2x15x176xf32, #tpu.memory_space<vmem>>, vector<2x2x176xf32>
    tpu.vector_store %arg10[%c0_5, %c0_6, %c0_7], %3 {strides = array<i32>} : memref<2x15x176xf32, #tpu.memory_space<vmem>>, vector<2x2x176xf32>,
    %c0_8 = arith.constant 0 : index
    %c13 = arith.constant 13 : index
    %c0_9 = arith.constant 0 : index
    %5 = vector.load %arg10[%c0_8, %c13, %c0_9] : memref<2x15x176xf32, #tpu.memory_space<vmem>>, vector<2x2x176xf32>
    tpu.vector_store %arg10[%c0_8, %c13, %c0_9], %3 {strides = array<i32>} : memref<2x15x176xf32, #tpu.memory_space<vmem>>, vector<2x2x176xf32>,
    %cst_10 = arith.constant 0.000000e+00 : f32
    %6 = vector.broadcast %cst_10 : f32 to vector<2x2x208xf32>
    %c0_11 = arith.constant 0 : index
    %c0_12 = arith.constant 0 : index
    %c0_13 = arith.constant 0 : index
    %7 = vector.load %arg11[%c0_11, %c0_12, %c0_13] : memref<2x17x208xf32, #tpu.memory_space<vmem>>, vector<2x2x208xf32>
    tpu.vector_store %arg11[%c0_11, %c0_12, %c0_13], %6 {strides = array<i32>} : memref<2x17x208xf32, #tpu.memory_space<vmem>>, vector<2x2x208xf32>,
    %c0_14 = arith.constant 0 : index
    %c15 = arith.constant 15 : index
    %c0_15 = arith.constant 0 : index
    %8 = vector.load %arg11[%c0_14, %c15, %c0_15] : memref<2x17x208xf32, #tpu.memory_space<vmem>>, vector<2x2x208xf32>
    tpu.vector_store %arg11[%c0_14, %c15, %c0_15], %6 {strides = array<i32>} : memref<2x17x208xf32, #tpu.memory_space<vmem>>, vector<2x2x208xf32>,
    %c0_16 = arith.constant 0 : index
    %c0_17 = arith.constant 0 : index
    %c0_18 = arith.constant 0 : index
    %9 = vector.load %arg1[%c0_16, %c0_17, %c0_18] : memref<2x9x81xf32, #tpu.memory_space<vmem>>, vector<2x9x81xf32>
    %c0_19 = arith.constant 0 : index
    %c2 = arith.constant 2 : index
    %c0_20 = arith.constant 0 : index
    %10 = vector.load %arg9[%c0_19, %c2, %c0_20] : memref<2x13x81xf32, #tpu.memory_space<vmem>>, vector<2x9x81xf32>
    tpu.vector_store %arg9[%c0_19, %c2, %c0_20], %9 {strides = array<i32>} : memref<2x13x81xf32, #tpu.memory_space<vmem>>, vector<2x9x81xf32>,
    %c0_21 = arith.constant 0 : index
    %c0_22 = arith.constant 0 : index
    %11 = vector.load %arg5[%c0_21, %c0_22] : memref<6x16xf32, #tpu.memory_space<vmem>>, vector<1x16xf32>
    %c1 = arith.constant 1 : index
    %c0_23 = arith.constant 0 : index
    %12 = vector.load %arg5[%c1, %c0_23] : memref<6x16xf32, #tpu.memory_space<vmem>>, vector<1x16xf32>
    %c0_24 = arith.constant 0 : index
    %c0_25 = arith.constant 0 : index
    %c0_26 = arith.constant 0 : index
    %13 = vector.load %arg9[%c0_24, %c0_25, %c0_26] : memref<2x13x81xf32, #tpu.memory_space<vmem>>, vector<2x11x81xf32>
    %14 = vector.shape_cast %13 : vector<2x11x81xf32> to vector<22x81xf32>
    %15 = arith.truncf %14 : vector<22x81xf32> to vector<22x81xbf16>
    %c0_27 = arith.constant 0 : index
    %c0_28 = arith.constant 0 : index
    %c0_29 = arith.constant 0 : index
    %16 = vector.load %arg2[%c0_27, %c0_28, %c0_29] : memref<3x81x176xbf16, #tpu.memory_space<vmem>>, vector<1x81x176xbf16>
    %17 = vector.shape_cast %16 : vector<1x81x176xbf16> to vector<81x176xbf16>
    %cst_30 = arith.constant dense<0.000000e+00> : vector<22x176xf32>
    %18 = tpu.matmul %15, %17, %cst_30 {dimension_numbers = #tpu.dot_dimension_numbers<[1], [0], [0], [1], [0, 0, 1, 1], [], []>} : vector<22x81xbf16>, vector<81x176xbf16>, vector<22x176xf32> -> vector<22x176xf32>
    %c0_31 = arith.constant 0 : index
    %c1_32 = arith.constant 1 : index
    %c0_33 = arith.constant 0 : index
    %19 = vector.load %arg9[%c0_31, %c1_32, %c0_33] : memref<2x13x81xf32, #tpu.memory_space<vmem>>, vector<2x11x81xf32>
    %20 = vector.shape_cast %19 : vector<2x11x81xf32> to vector<22x81xf32>
    %21 = arith.truncf %20 : vector<22x81xf32> to vector<22x81xbf16>
    %c1_34 = arith.constant 1 : index
    %c0_35 = arith.constant 0 : index
    %c0_36 = arith.constant 0 : index
    %22 = vector.load %arg2[%c1_34, %c0_35, %c0_36] : memref<3x81x176xbf16, #tpu.memory_space<vmem>>, vector<1x81x176xbf16>
    %23 = vector.shape_cast %22 : vector<1x81x176xbf16> to vector<81x176xbf16>
    %cst_37 = arith.constant dense<0.000000e+00> : vector<22x176xf32>
    %24 = tpu.matmul %21, %23, %cst_37 {dimension_numbers = #tpu.dot_dimension_numbers<[1], [0], [0], [1], [0, 0, 1, 1], [], []>} : vector<22x81xbf16>, vector<81x176xbf16>, vector<22x176xf32> -> vector<22x176xf32>
    %25 = arith.addf %18, %24 : vector<22x176xf32>
    %c0_38 = arith.constant 0 : index
    %c2_39 = arith.constant 2 : index
    %c0_40 = arith.constant 0 : index
    %26 = vector.load %arg9[%c0_38, %c2_39, %c0_40] : memref<2x13x81xf32, #tpu.memory_space<vmem>>, vector<2x11x81xf32>
    %27 = vector.shape_cast %26 : vector<2x11x81xf32> to vector<22x81xf32>
    %28 = arith.truncf %27 : vector<22x81xf32> to vector<22x81xbf16>
    %c2_41 = arith.constant 2 : index
    %c0_42 = arith.constant 0 : index
    %c0_43 = arith.constant 0 : index
    %29 = vector.load %arg2[%c2_41, %c0_42, %c0_43] : memref<3x81x176xbf16, #tpu.memory_space<vmem>>, vector<1x81x176xbf16>
    %30 = vector.shape_cast %29 : vector<1x81x176xbf16> to vector<81x176xbf16>
    %cst_44 = arith.constant dense<0.000000e+00> : vector<22x176xf32>
    %31 = tpu.matmul %28, %30, %cst_44 {dimension_numbers = #tpu.dot_dimension_numbers<[1], [0], [0], [1], [0, 0, 1, 1], [], []>} : vector<22x81xbf16>, vector<81x176xbf16>, vector<22x176xf32> -> vector<22x176xf32>
    %32 = arith.addf %25, %31 : vector<22x176xf32>
    %cst_45 = arith.constant dense<0.000000e+00> : vector<176xf32>
    %33 = vector.multi_reduction <add>, %32, %cst_45 [0] : vector<22x176xf32> to vector<176xf32>
    %34 = vector.shape_cast %33 : vector<176xf32> to vector<1x176xf32>
    %35 = arith.mulf %32, %32 : vector<22x176xf32>
    %cst_46 = arith.constant dense<0.000000e+00> : vector<176xf32>
    %36 = vector.multi_reduction <add>, %35, %cst_46 [0] : vector<22x176xf32> to vector<176xf32>
    %37 = vector.shape_cast %36 : vector<176xf32> to vector<1x176xf32>
    %38 = vector.extract_strided_slice %34 {offsets = [0, 0], sizes = [1, 16], strides = [1, 1]} : vector<1x176xf32> to vector<1x16xf32>
    %39 = vector.extract_strided_slice %37 {offsets = [0, 0], sizes = [1, 16], strides = [1, 1]} : vector<1x176xf32> to vector<1x16xf32>
    %40 = vector.extract_strided_slice %34 {offsets = [0, 16], sizes = [1, 16], strides = [1, 1]} : vector<1x176xf32> to vector<1x16xf32>
    %41 = arith.addf %38, %40 : vector<1x16xf32>
    %42 = vector.extract_strided_slice %37 {offsets = [0, 16], sizes = [1, 16], strides = [1, 1]} : vector<1x176xf32> to vector<1x16xf32>
    %43 = arith.addf %39, %42 : vector<1x16xf32>
    %44 = vector.extract_strided_slice %34 {offsets = [0, 32], sizes = [1, 16], strides = [1, 1]} : vector<1x176xf32> to vector<1x16xf32>
    %45 = arith.addf %41, %44 : vector<1x16xf32>
    %46 = vector.extract_strided_slice %37 {offsets = [0, 32], sizes = [1, 16], strides = [1, 1]} : vector<1x176xf32> to vector<1x16xf32>
    %47 = arith.addf %43, %46 : vector<1x16xf32>
    %48 = vector.extract_strided_slice %34 {offsets = [0, 48], sizes = [1, 16], strides = [1, 1]} : vector<1x176xf32> to vector<1x16xf32>
    %49 = arith.addf %45, %48 : vector<1x16xf32>
    %50 = vector.extract_strided_slice %37 {offsets = [0, 48], sizes = [1, 16], strides = [1, 1]} : vector<1x176xf32> to vector<1x16xf32>
    %51 = arith.addf %47, %50 : vector<1x16xf32>
    %52 = vector.extract_strided_slice %34 {offsets = [0, 64], sizes = [1, 16], strides = [1, 1]} : vector<1x176xf32> to vector<1x16xf32>
    %53 = arith.addf %49, %52 : vector<1x16xf32>
    %54 = vector.extract_strided_slice %37 {offsets = [0, 64], sizes = [1, 16], strides = [1, 1]} : vector<1x176xf32> to vector<1x16xf32>
    %55 = arith.addf %51, %54 : vector<1x16xf32>
    %56 = vector.extract_strided_slice %34 {offsets = [0, 80], sizes = [1, 16], strides = [1, 1]} : vector<1x176xf32> to vector<1x16xf32>
    %57 = arith.addf %53, %56 : vector<1x16xf32>
    %58 = vector.extract_strided_slice %37 {offsets = [0, 80], sizes = [1, 16], strides = [1, 1]} : vector<1x176xf32> to vector<1x16xf32>
    %59 = arith.addf %55, %58 : vector<1x16xf32>
    %60 = vector.extract_strided_slice %34 {offsets = [0, 96], sizes = [1, 16], strides = [1, 1]} : vector<1x176xf32> to vector<1x16xf32>
    %61 = arith.addf %57, %60 : vector<1x16xf32>
    %62 = vector.extract_strided_slice %37 {offsets = [0, 96], sizes = [1, 16], strides = [1, 1]} : vector<1x176xf32> to vector<1x16xf32>
    %63 = arith.addf %59, %62 : vector<1x16xf32>
    %64 = vector.extract_strided_slice %34 {offsets = [0, 112], sizes = [1, 16], strides = [1, 1]} : vector<1x176xf32> to vector<1x16xf32>
    %65 = arith.addf %61, %64 : vector<1x16xf32>
    %66 = vector.extract_strided_slice %37 {offsets = [0, 112], sizes = [1, 16], strides = [1, 1]} : vector<1x176xf32> to vector<1x16xf32>
    %67 = arith.addf %63, %66 : vector<1x16xf32>
    %68 = vector.extract_strided_slice %34 {offsets = [0, 128], sizes = [1, 16], strides = [1, 1]} : vector<1x176xf32> to vector<1x16xf32>
    %69 = arith.addf %65, %68 : vector<1x16xf32>
    %70 = vector.extract_strided_slice %37 {offsets = [0, 128], sizes = [1, 16], strides = [1, 1]} : vector<1x176xf32> to vector<1x16xf32>
    %71 = arith.addf %67, %70 : vector<1x16xf32>
    %72 = vector.extract_strided_slice %34 {offsets = [0, 144], sizes = [1, 16], strides = [1, 1]} : vector<1x176xf32> to vector<1x16xf32>
    %73 = arith.addf %69, %72 : vector<1x16xf32>
    %74 = vector.extract_strided_slice %37 {offsets = [0, 144], sizes = [1, 16], strides = [1, 1]} : vector<1x176xf32> to vector<1x16xf32>
    %75 = arith.addf %71, %74 : vector<1x16xf32>
    %76 = vector.extract_strided_slice %34 {offsets = [0, 160], sizes = [1, 16], strides = [1, 1]} : vector<1x176xf32> to vector<1x16xf32>
    %77 = arith.addf %73, %76 : vector<1x16xf32>
    %78 = vector.extract_strided_slice %37 {offsets = [0, 160], sizes = [1, 16], strides = [1, 1]} : vector<1x176xf32> to vector<1x16xf32>
    %79 = arith.addf %75, %78 : vector<1x16xf32>
    %cst_47 = arith.constant 2.420000e+02 : f32
    %80 = vector.broadcast %cst_47 : f32 to vector<1x16xf32>
    %81 = arith.divf %77, %80 : vector<1x16xf32>
    %cst_48 = arith.constant 2.420000e+02 : f32
    %82 = vector.broadcast %cst_48 : f32 to vector<1x16xf32>
    %83 = arith.divf %79, %82 : vector<1x16xf32>
    %84 = arith.mulf %81, %81 : vector<1x16xf32>
    %85 = arith.subf %83, %84 : vector<1x16xf32>
    %cst_49 = arith.constant 9.99999974E-6 : f32
    %86 = vector.broadcast %cst_49 : f32 to vector<1x16xf32>
    %87 = arith.addf %85, %86 : vector<1x16xf32>
    %88 = math.rsqrt %87 : vector<1x16xf32>
    %89 = arith.mulf %11, %88 : vector<1x16xf32>
    %90 = arith.mulf %81, %89 : vector<1x16xf32>
    %91 = arith.subf %12, %90 : vector<1x16xf32>
    %92 = tpu.concatenate %89, %89, %89, %89, %89, %89, %89, %89, %89, %89, %89 in 1 : vector<1x16xf32>, vector<1x16xf32>, vector<1x16xf32>, vector<1x16xf32>, vector<1x16xf32>, vector<1x16xf32>, vector<1x16xf32>, vector<1x16xf32>, vector<1x16xf32>, vector<1x16xf32>, vector<1x16xf32> -> vector<1x176xf32>
    %93 = tpu.concatenate %91, %91, %91, %91, %91, %91, %91, %91, %91, %91, %91 in 1 : vector<1x16xf32>, vector<1x16xf32>, vector<1x16xf32>, vector<1x16xf32>, vector<1x16xf32>, vector<1x16xf32>, vector<1x16xf32>, vector<1x16xf32>, vector<1x16xf32>, vector<1x16xf32>, vector<1x16xf32> -> vector<1x176xf32>
    %94 = vector.broadcast %92 : vector<1x176xf32> to vector<22x176xf32>
    %95 = arith.mulf %32, %94 : vector<22x176xf32>
    %96 = vector.broadcast %93 : vector<1x176xf32> to vector<22x176xf32>
    %97 = arith.addf %95, %96 : vector<22x176xf32>
    %cst_50 = arith.constant 0.000000e+00 : f32
    %98 = vector.broadcast %cst_50 : f32 to vector<22x176xf32>
    %99 = arith.maximumf %97, %98 : vector<22x176xf32>
    %100 = vector.shape_cast %99 : vector<22x176xf32> to vector<2x11x176xf32>
    %c0_51 = arith.constant 0 : index
    %c2_52 = arith.constant 2 : index
    %c0_53 = arith.constant 0 : index
    %101 = vector.load %arg10[%c0_51, %c2_52, %c0_53] : memref<2x15x176xf32, #tpu.memory_space<vmem>>, vector<2x11x176xf32>
    tpu.vector_store %arg10[%c0_51, %c2_52, %c0_53], %100 {strides = array<i32>} : memref<2x15x176xf32, #tpu.memory_space<vmem>>, vector<2x11x176xf32>,
    %c2_54 = arith.constant 2 : index
    %c0_55 = arith.constant 0 : index
    %102 = vector.load %arg5[%c2_54, %c0_55] : memref<6x16xf32, #tpu.memory_space<vmem>>, vector<1x16xf32>
    %c3 = arith.constant 3 : index
    %c0_56 = arith.constant 0 : index
    %103 = vector.load %arg5[%c3, %c0_56] : memref<6x16xf32, #tpu.memory_space<vmem>>, vector<1x16xf32>
    %c0_57 = arith.constant 0 : index
    %c0_58 = arith.constant 0 : index
    %c0_59 = arith.constant 0 : index
    %104 = vector.load %arg10[%c0_57, %c0_58, %c0_59] : memref<2x15x176xf32, #tpu.memory_space<vmem>>, vector<2x13x176xf32>
    %105 = vector.shape_cast %104 : vector<2x13x176xf32> to vector<26x176xf32>
    %106 = arith.truncf %105 : vector<26x176xf32> to vector<26x176xbf16>
    %c0_60 = arith.constant 0 : index
    %c0_61 = arith.constant 0 : index
    %c0_62 = arith.constant 0 : index
    %107 = vector.load %arg3[%c0_60, %c0_61, %c0_62] : memref<3x176x208xbf16, #tpu.memory_space<vmem>>, vector<1x176x208xbf16>
    %108 = vector.shape_cast %107 : vector<1x176x208xbf16> to vector<176x208xbf16>
    %cst_63 = arith.constant dense<0.000000e+00> : vector<26x208xf32>
    %109 = tpu.matmul %106, %108, %cst_63 {dimension_numbers = #tpu.dot_dimension_numbers<[1], [0], [0], [1], [0, 0, 1, 1], [], []>} : vector<26x176xbf16>, vector<176x208xbf16>, vector<26x208xf32> -> vector<26x208xf32>
    %c0_64 = arith.constant 0 : index
    %c1_65 = arith.constant 1 : index
    %c0_66 = arith.constant 0 : index
    %110 = vector.load %arg10[%c0_64, %c1_65, %c0_66] : memref<2x15x176xf32, #tpu.memory_space<vmem>>, vector<2x13x176xf32>
    %111 = vector.shape_cast %110 : vector<2x13x176xf32> to vector<26x176xf32>
    %112 = arith.truncf %111 : vector<26x176xf32> to vector<26x176xbf16>
    %c1_67 = arith.constant 1 : index
    %c0_68 = arith.constant 0 : index
    %c0_69 = arith.constant 0 : index
    %113 = vector.load %arg3[%c1_67, %c0_68, %c0_69] : memref<3x176x208xbf16, #tpu.memory_space<vmem>>, vector<1x176x208xbf16>
    %114 = vector.shape_cast %113 : vector<1x176x208xbf16> to vector<176x208xbf16>
    %cst_70 = arith.constant dense<0.000000e+00> : vector<26x208xf32>
    %115 = tpu.matmul %112, %114, %cst_70 {dimension_numbers = #tpu.dot_dimension_numbers<[1], [0], [0], [1], [0, 0, 1, 1], [], []>} : vector<26x176xbf16>, vector<176x208xbf16>, vector<26x208xf32> -> vector<26x208xf32>
    %116 = arith.addf %109, %115 : vector<26x208xf32>
    %c0_71 = arith.constant 0 : index
    %c2_72 = arith.constant 2 : index
    %c0_73 = arith.constant 0 : index
    %117 = vector.load %arg10[%c0_71, %c2_72, %c0_73] : memref<2x15x176xf32, #tpu.memory_space<vmem>>, vector<2x13x176xf32>
    %118 = vector.shape_cast %117 : vector<2x13x176xf32> to vector<26x176xf32>
    %119 = arith.truncf %118 : vector<26x176xf32> to vector<26x176xbf16>
    %c2_74 = arith.constant 2 : index
    %c0_75 = arith.constant 0 : index
    %c0_76 = arith.constant 0 : index
    %120 = vector.load %arg3[%c2_74, %c0_75, %c0_76] : memref<3x176x208xbf16, #tpu.memory_space<vmem>>, vector<1x176x208xbf16>
    %121 = vector.shape_cast %120 : vector<1x176x208xbf16> to vector<176x208xbf16>
    %cst_77 = arith.constant dense<0.000000e+00> : vector<26x208xf32>
    %122 = tpu.matmul %119, %121, %cst_77 {dimension_numbers = #tpu.dot_dimension_numbers<[1], [0], [0], [1], [0, 0, 1, 1], [], []>} : vector<26x176xbf16>, vector<176x208xbf16>, vector<26x208xf32> -> vector<26x208xf32>
    %123 = arith.addf %116, %122 : vector<26x208xf32>
    %cst_78 = arith.constant dense<0.000000e+00> : vector<208xf32>
    %124 = vector.multi_reduction <add>, %123, %cst_78 [0] : vector<26x208xf32> to vector<208xf32>
    %125 = vector.shape_cast %124 : vector<208xf32> to vector<1x208xf32>
    %126 = arith.mulf %123, %123 : vector<26x208xf32>
    %cst_79 = arith.constant dense<0.000000e+00> : vector<208xf32>
    %127 = vector.multi_reduction <add>, %126, %cst_79 [0] : vector<26x208xf32> to vector<208xf32>
    %128 = vector.shape_cast %127 : vector<208xf32> to vector<1x208xf32>
    %129 = vector.extract_strided_slice %125 {offsets = [0, 0], sizes = [1, 16], strides = [1, 1]} : vector<1x208xf32> to vector<1x16xf32>
    %130 = vector.extract_strided_slice %128 {offsets = [0, 0], sizes = [1, 16], strides = [1, 1]} : vector<1x208xf32> to vector<1x16xf32>
    %131 = vector.extract_strided_slice %125 {offsets = [0, 16], sizes = [1, 16], strides = [1, 1]} : vector<1x208xf32> to vector<1x16xf32>
    %132 = arith.addf %129, %131 : vector<1x16xf32>
    %133 = vector.extract_strided_slice %128 {offsets = [0, 16], sizes = [1, 16], strides = [1, 1]} : vector<1x208xf32> to vector<1x16xf32>
    %134 = arith.addf %130, %133 : vector<1x16xf32>
    %135 = vector.extract_strided_slice %125 {offsets = [0, 32], sizes = [1, 16], strides = [1, 1]} : vector<1x208xf32> to vector<1x16xf32>
    %136 = arith.addf %132, %135 : vector<1x16xf32>
    %137 = vector.extract_strided_slice %128 {offsets = [0, 32], sizes = [1, 16], strides = [1, 1]} : vector<1x208xf32> to vector<1x16xf32>
    %138 = arith.addf %134, %137 : vector<1x16xf32>
    %139 = vector.extract_strided_slice %125 {offsets = [0, 48], sizes = [1, 16], strides = [1, 1]} : vector<1x208xf32> to vector<1x16xf32>
    %140 = arith.addf %136, %139 : vector<1x16xf32>
    %141 = vector.extract_strided_slice %128 {offsets = [0, 48], sizes = [1, 16], strides = [1, 1]} : vector<1x208xf32> to vector<1x16xf32>
    %142 = arith.addf %138, %141 : vector<1x16xf32>
    %143 = vector.extract_strided_slice %125 {offsets = [0, 64], sizes = [1, 16], strides = [1, 1]} : vector<1x208xf32> to vector<1x16xf32>
    %144 = arith.addf %140, %143 : vector<1x16xf32>
    %145 = vector.extract_strided_slice %128 {offsets = [0, 64], sizes = [1, 16], strides = [1, 1]} : vector<1x208xf32> to vector<1x16xf32>
    %146 = arith.addf %142, %145 : vector<1x16xf32>
    %147 = vector.extract_strided_slice %125 {offsets = [0, 80], sizes = [1, 16], strides = [1, 1]} : vector<1x208xf32> to vector<1x16xf32>
    %148 = arith.addf %144, %147 : vector<1x16xf32>
    %149 = vector.extract_strided_slice %128 {offsets = [0, 80], sizes = [1, 16], strides = [1, 1]} : vector<1x208xf32> to vector<1x16xf32>
    %150 = arith.addf %146, %149 : vector<1x16xf32>
    %151 = vector.extract_strided_slice %125 {offsets = [0, 96], sizes = [1, 16], strides = [1, 1]} : vector<1x208xf32> to vector<1x16xf32>
    %152 = arith.addf %148, %151 : vector<1x16xf32>
    %153 = vector.extract_strided_slice %128 {offsets = [0, 96], sizes = [1, 16], strides = [1, 1]} : vector<1x208xf32> to vector<1x16xf32>
    %154 = arith.addf %150, %153 : vector<1x16xf32>
    %155 = vector.extract_strided_slice %125 {offsets = [0, 112], sizes = [1, 16], strides = [1, 1]} : vector<1x208xf32> to vector<1x16xf32>
    %156 = arith.addf %152, %155 : vector<1x16xf32>
    %157 = vector.extract_strided_slice %128 {offsets = [0, 112], sizes = [1, 16], strides = [1, 1]} : vector<1x208xf32> to vector<1x16xf32>
    %158 = arith.addf %154, %157 : vector<1x16xf32>
    %159 = vector.extract_strided_slice %125 {offsets = [0, 128], sizes = [1, 16], strides = [1, 1]} : vector<1x208xf32> to vector<1x16xf32>
    %160 = arith.addf %156, %159 : vector<1x16xf32>
    %161 = vector.extract_strided_slice %128 {offsets = [0, 128], sizes = [1, 16], strides = [1, 1]} : vector<1x208xf32> to vector<1x16xf32>
    %162 = arith.addf %158, %161 : vector<1x16xf32>
    %163 = vector.extract_strided_slice %125 {offsets = [0, 144], sizes = [1, 16], strides = [1, 1]} : vector<1x208xf32> to vector<1x16xf32>
    %164 = arith.addf %160, %163 : vector<1x16xf32>
    %165 = vector.extract_strided_slice %128 {offsets = [0, 144], sizes = [1, 16], strides = [1, 1]} : vector<1x208xf32> to vector<1x16xf32>
    %166 = arith.addf %162, %165 : vector<1x16xf32>
    %167 = vector.extract_strided_slice %125 {offsets = [0, 160], sizes = [1, 16], strides = [1, 1]} : vector<1x208xf32> to vector<1x16xf32>
    %168 = arith.addf %164, %167 : vector<1x16xf32>
    %169 = vector.extract_strided_slice %128 {offsets = [0, 160], sizes = [1, 16], strides = [1, 1]} : vector<1x208xf32> to vector<1x16xf32>
    %170 = arith.addf %166, %169 : vector<1x16xf32>
    %171 = vector.extract_strided_slice %125 {offsets = [0, 176], sizes = [1, 16], strides = [1, 1]} : vector<1x208xf32> to vector<1x16xf32>
    %172 = arith.addf %168, %171 : vector<1x16xf32>
    %173 = vector.extract_strided_slice %128 {offsets = [0, 176], sizes = [1, 16], strides = [1, 1]} : vector<1x208xf32> to vector<1x16xf32>
    %174 = arith.addf %170, %173 : vector<1x16xf32>
    %175 = vector.extract_strided_slice %125 {offsets = [0, 192], sizes = [1, 16], strides = [1, 1]} : vector<1x208xf32> to vector<1x16xf32>
    %176 = arith.addf %172, %175 : vector<1x16xf32>
    %177 = vector.extract_strided_slice %128 {offsets = [0, 192], sizes = [1, 16], strides = [1, 1]} : vector<1x208xf32> to vector<1x16xf32>
    %178 = arith.addf %174, %177 : vector<1x16xf32>
    %cst_80 = arith.constant 3.380000e+02 : f32
    %179 = vector.broadcast %cst_80 : f32 to vector<1x16xf32>
    %180 = arith.divf %176, %179 : vector<1x16xf32>
    %cst_81 = arith.constant 3.380000e+02 : f32
    %181 = vector.broadcast %cst_81 : f32 to vector<1x16xf32>
    %182 = arith.divf %178, %181 : vector<1x16xf32>
    %183 = arith.mulf %180, %180 : vector<1x16xf32>
    %184 = arith.subf %182, %183 : vector<1x16xf32>
    %cst_82 = arith.constant 9.99999974E-6 : f32
    %185 = vector.broadcast %cst_82 : f32 to vector<1x16xf32>
    %186 = arith.addf %184, %185 : vector<1x16xf32>
    %187 = math.rsqrt %186 : vector<1x16xf32>
    %188 = arith.mulf %102, %187 : vector<1x16xf32>
    %189 = arith.mulf %180, %188 : vector<1x16xf32>
    %190 = arith.subf %103, %189 : vector<1x16xf32>
    %191 = tpu.concatenate %188, %188, %188, %188, %188, %188, %188, %188, %188, %188, %188, %188, %188 in 1 : vector<1x16xf32>, vector<1x16xf32>, vector<1x16xf32>, vector<1x16xf32>, vector<1x16xf32>, vector<1x16xf32>, vector<1x16xf32>, vector<1x16xf32>, vector<1x16xf32>, vector<1x16xf32>, vector<1x16xf32>, vector<1x16xf32>, vector<1x16xf32> -> vector<1x208xf32>
    %192 = tpu.concatenate %190, %190, %190, %190, %190, %190, %190, %190, %190, %190, %190, %190, %190 in 1 : vector<1x16xf32>, vector<1x16xf32>, vector<1x16xf32>, vector<1x16xf32>, vector<1x16xf32>, vector<1x16xf32>, vector<1x16xf32>, vector<1x16xf32>, vector<1x16xf32>, vector<1x16xf32>, vector<1x16xf32>, vector<1x16xf32>, vector<1x16xf32> -> vector<1x208xf32>
    %193 = vector.broadcast %191 : vector<1x208xf32> to vector<26x208xf32>
    %194 = arith.mulf %123, %193 : vector<26x208xf32>
    %195 = vector.broadcast %192 : vector<1x208xf32> to vector<26x208xf32>
    %196 = arith.addf %194, %195 : vector<26x208xf32>
    %cst_83 = arith.constant 0.000000e+00 : f32
    %197 = vector.broadcast %cst_83 : f32 to vector<26x208xf32>
    %198 = arith.maximumf %196, %197 : vector<26x208xf32>
    %199 = vector.shape_cast %198 : vector<26x208xf32> to vector<2x13x208xf32>
    %c0_84 = arith.constant 0 : index
    %c2_85 = arith.constant 2 : index
    %c0_86 = arith.constant 0 : index
    %200 = vector.load %arg11[%c0_84, %c2_85, %c0_86] : memref<2x17x208xf32, #tpu.memory_space<vmem>>, vector<2x13x208xf32>
    tpu.vector_store %arg11[%c0_84, %c2_85, %c0_86], %199 {strides = array<i32>} : memref<2x17x208xf32, #tpu.memory_space<vmem>>, vector<2x13x208xf32>,
    %c4 = arith.constant 4 : index
    %c0_87 = arith.constant 0 : index
    %201 = vector.load %arg5[%c4, %c0_87] : memref<6x16xf32, #tpu.memory_space<vmem>>, vector<1x16xf32>
    %c5 = arith.constant 5 : index
    %c0_88 = arith.constant 0 : index
    %202 = vector.load %arg5[%c5, %c0_88] : memref<6x16xf32, #tpu.memory_space<vmem>>, vector<1x16xf32>
    %c0_89 = arith.constant 0 : index
    %c0_90 = arith.constant 0 : index
    %c0_91 = arith.constant 0 : index
    %203 = vector.load %arg11[%c0_89, %c0_90, %c0_91] : memref<2x17x208xf32, #tpu.memory_space<vmem>>, vector<2x15x208xf32>
    %204 = vector.shape_cast %203 : vector<2x15x208xf32> to vector<30x208xf32>
    %205 = arith.truncf %204 : vector<30x208xf32> to vector<30x208xbf16>
    %c0_92 = arith.constant 0 : index
    %c0_93 = arith.constant 0 : index
    %c0_94 = arith.constant 0 : index
    %206 = vector.load %arg4[%c0_92, %c0_93, %c0_94] : memref<3x208x240xbf16, #tpu.memory_space<vmem>>, vector<1x208x240xbf16>
    %207 = vector.shape_cast %206 : vector<1x208x240xbf16> to vector<208x240xbf16>
    %cst_95 = arith.constant dense<0.000000e+00> : vector<30x240xf32>
    %208 = tpu.matmul %205, %207, %cst_95 {dimension_numbers = #tpu.dot_dimension_numbers<[1], [0], [0], [1], [0, 0, 1, 1], [], []>} : vector<30x208xbf16>, vector<208x240xbf16>, vector<30x240xf32> -> vector<30x240xf32>
    %c0_96 = arith.constant 0 : index
    %c1_97 = arith.constant 1 : index
    %c0_98 = arith.constant 0 : index
    %209 = vector.load %arg11[%c0_96, %c1_97, %c0_98] : memref<2x17x208xf32, #tpu.memory_space<vmem>>, vector<2x15x208xf32>
    %210 = vector.shape_cast %209 : vector<2x15x208xf32> to vector<30x208xf32>
    %211 = arith.truncf %210 : vector<30x208xf32> to vector<30x208xbf16>
    %c1_99 = arith.constant 1 : index
    %c0_100 = arith.constant 0 : index
    %c0_101 = arith.constant 0 : index
    %212 = vector.load %arg4[%c1_99, %c0_100, %c0_101] : memref<3x208x240xbf16, #tpu.memory_space<vmem>>, vector<1x208x240xbf16>
    %213 = vector.shape_cast %212 : vector<1x208x240xbf16> to vector<208x240xbf16>
    %cst_102 = arith.constant dense<0.000000e+00> : vector<30x240xf32>
    %214 = tpu.matmul %211, %213, %cst_102 {dimension_numbers = #tpu.dot_dimension_numbers<[1], [0], [0], [1], [0, 0, 1, 1], [], []>} : vector<30x208xbf16>, vector<208x240xbf16>, vector<30x240xf32> -> vector<30x240xf32>
    %215 = arith.addf %208, %214 : vector<30x240xf32>
    %c0_103 = arith.constant 0 : index
    %c2_104 = arith.constant 2 : index
    %c0_105 = arith.constant 0 : index
    %216 = vector.load %arg11[%c0_103, %c2_104, %c0_105] : memref<2x17x208xf32, #tpu.memory_space<vmem>>, vector<2x15x208xf32>
    %217 = vector.shape_cast %216 : vector<2x15x208xf32> to vector<30x208xf32>
    %218 = arith.truncf %217 : vector<30x208xf32> to vector<30x208xbf16>
    %c2_106 = arith.constant 2 : index
    %c0_107 = arith.constant 0 : index
    %c0_108 = arith.constant 0 : index
    %219 = vector.load %arg4[%c2_106, %c0_107, %c0_108] : memref<3x208x240xbf16, #tpu.memory_space<vmem>>, vector<1x208x240xbf16>
    %220 = vector.shape_cast %219 : vector<1x208x240xbf16> to vector<208x240xbf16>
    %cst_109 = arith.constant dense<0.000000e+00> : vector<30x240xf32>
    %221 = tpu.matmul %218, %220, %cst_109 {dimension_numbers = #tpu.dot_dimension_numbers<[1], [0], [0], [1], [0, 0, 1, 1], [], []>} : vector<30x208xbf16>, vector<208x240xbf16>, vector<30x240xf32> -> vector<30x240xf32>
    %222 = arith.addf %215, %221 : vector<30x240xf32>
    %cst_110 = arith.constant dense<0.000000e+00> : vector<240xf32>
    %223 = vector.multi_reduction <add>, %222, %cst_110 [0] : vector<30x240xf32> to vector<240xf32>
    %224 = vector.shape_cast %223 : vector<240xf32> to vector<1x240xf32>
    %225 = arith.mulf %222, %222 : vector<30x240xf32>
    %cst_111 = arith.constant dense<0.000000e+00> : vector<240xf32>
    %226 = vector.multi_reduction <add>, %225, %cst_111 [0] : vector<30x240xf32> to vector<240xf32>
    %227 = vector.shape_cast %226 : vector<240xf32> to vector<1x240xf32>
    %228 = vector.extract_strided_slice %224 {offsets = [0, 0], sizes = [1, 16], strides = [1, 1]} : vector<1x240xf32> to vector<1x16xf32>
    %229 = vector.extract_strided_slice %227 {offsets = [0, 0], sizes = [1, 16], strides = [1, 1]} : vector<1x240xf32> to vector<1x16xf32>
    %230 = vector.extract_strided_slice %224 {offsets = [0, 16], sizes = [1, 16], strides = [1, 1]} : vector<1x240xf32> to vector<1x16xf32>
    %231 = arith.addf %228, %230 : vector<1x16xf32>
    %232 = vector.extract_strided_slice %227 {offsets = [0, 16], sizes = [1, 16], strides = [1, 1]} : vector<1x240xf32> to vector<1x16xf32>
    %233 = arith.addf %229, %232 : vector<1x16xf32>
    %234 = vector.extract_strided_slice %224 {offsets = [0, 32], sizes = [1, 16], strides = [1, 1]} : vector<1x240xf32> to vector<1x16xf32>
    %235 = arith.addf %231, %234 : vector<1x16xf32>
    %236 = vector.extract_strided_slice %227 {offsets = [0, 32], sizes = [1, 16], strides = [1, 1]} : vector<1x240xf32> to vector<1x16xf32>
    %237 = arith.addf %233, %236 : vector<1x16xf32>
    %238 = vector.extract_strided_slice %224 {offsets = [0, 48], sizes = [1, 16], strides = [1, 1]} : vector<1x240xf32> to vector<1x16xf32>
    %239 = arith.addf %235, %238 : vector<1x16xf32>
    %240 = vector.extract_strided_slice %227 {offsets = [0, 48], sizes = [1, 16], strides = [1, 1]} : vector<1x240xf32> to vector<1x16xf32>
    %241 = arith.addf %237, %240 : vector<1x16xf32>
    %242 = vector.extract_strided_slice %224 {offsets = [0, 64], sizes = [1, 16], strides = [1, 1]} : vector<1x240xf32> to vector<1x16xf32>
    %243 = arith.addf %239, %242 : vector<1x16xf32>
    %244 = vector.extract_strided_slice %227 {offsets = [0, 64], sizes = [1, 16], strides = [1, 1]} : vector<1x240xf32> to vector<1x16xf32>
    %245 = arith.addf %241, %244 : vector<1x16xf32>
    %246 = vector.extract_strided_slice %224 {offsets = [0, 80], sizes = [1, 16], strides = [1, 1]} : vector<1x240xf32> to vector<1x16xf32>
    %247 = arith.addf %243, %246 : vector<1x16xf32>
    %248 = vector.extract_strided_slice %227 {offsets = [0, 80], sizes = [1, 16], strides = [1, 1]} : vector<1x240xf32> to vector<1x16xf32>
    %249 = arith.addf %245, %248 : vector<1x16xf32>
    %250 = vector.extract_strided_slice %224 {offsets = [0, 96], sizes = [1, 16], strides = [1, 1]} : vector<1x240xf32> to vector<1x16xf32>
    %251 = arith.addf %247, %250 : vector<1x16xf32>
    %252 = vector.extract_strided_slice %227 {offsets = [0, 96], sizes = [1, 16], strides = [1, 1]} : vector<1x240xf32> to vector<1x16xf32>
    %253 = arith.addf %249, %252 : vector<1x16xf32>
    %254 = vector.extract_strided_slice %224 {offsets = [0, 112], sizes = [1, 16], strides = [1, 1]} : vector<1x240xf32> to vector<1x16xf32>
    %255 = arith.addf %251, %254 : vector<1x16xf32>
    %256 = vector.extract_strided_slice %227 {offsets = [0, 112], sizes = [1, 16], strides = [1, 1]} : vector<1x240xf32> to vector<1x16xf32>
    %257 = arith.addf %253, %256 : vector<1x16xf32>
    %258 = vector.extract_strided_slice %224 {offsets = [0, 128], sizes = [1, 16], strides = [1, 1]} : vector<1x240xf32> to vector<1x16xf32>
    %259 = arith.addf %255, %258 : vector<1x16xf32>
    %260 = vector.extract_strided_slice %227 {offsets = [0, 128], sizes = [1, 16], strides = [1, 1]} : vector<1x240xf32> to vector<1x16xf32>
    %261 = arith.addf %257, %260 : vector<1x16xf32>
    %262 = vector.extract_strided_slice %224 {offsets = [0, 144], sizes = [1, 16], strides = [1, 1]} : vector<1x240xf32> to vector<1x16xf32>
    %263 = arith.addf %259, %262 : vector<1x16xf32>
    %264 = vector.extract_strided_slice %227 {offsets = [0, 144], sizes = [1, 16], strides = [1, 1]} : vector<1x240xf32> to vector<1x16xf32>
    %265 = arith.addf %261, %264 : vector<1x16xf32>
    %266 = vector.extract_strided_slice %224 {offsets = [0, 160], sizes = [1, 16], strides = [1, 1]} : vector<1x240xf32> to vector<1x16xf32>
    %267 = arith.addf %263, %266 : vector<1x16xf32>
    %268 = vector.extract_strided_slice %227 {offsets = [0, 160], sizes = [1, 16], strides = [1, 1]} : vector<1x240xf32> to vector<1x16xf32>
    %269 = arith.addf %265, %268 : vector<1x16xf32>
    %270 = vector.extract_strided_slice %224 {offsets = [0, 176], sizes = [1, 16], strides = [1, 1]} : vector<1x240xf32> to vector<1x16xf32>
    %271 = arith.addf %267, %270 : vector<1x16xf32>
    %272 = vector.extract_strided_slice %227 {offsets = [0, 176], sizes = [1, 16], strides = [1, 1]} : vector<1x240xf32> to vector<1x16xf32>
    %273 = arith.addf %269, %272 : vector<1x16xf32>
    %274 = vector.extract_strided_slice %224 {offsets = [0, 192], sizes = [1, 16], strides = [1, 1]} : vector<1x240xf32> to vector<1x16xf32>
    %275 = arith.addf %271, %274 : vector<1x16xf32>
    %276 = vector.extract_strided_slice %227 {offsets = [0, 192], sizes = [1, 16], strides = [1, 1]} : vector<1x240xf32> to vector<1x16xf32>
    %277 = arith.addf %273, %276 : vector<1x16xf32>
    %278 = vector.extract_strided_slice %224 {offsets = [0, 208], sizes = [1, 16], strides = [1, 1]} : vector<1x240xf32> to vector<1x16xf32>
    %279 = arith.addf %275, %278 : vector<1x16xf32>
    %280 = vector.extract_strided_slice %227 {offsets = [0, 208], sizes = [1, 16], strides = [1, 1]} : vector<1x240xf32> to vector<1x16xf32>
    %281 = arith.addf %277, %280 : vector<1x16xf32>
    %282 = vector.extract_strided_slice %224 {offsets = [0, 224], sizes = [1, 16], strides = [1, 1]} : vector<1x240xf32> to vector<1x16xf32>
    %283 = arith.addf %279, %282 : vector<1x16xf32>
    %284 = vector.extract_strided_slice %227 {offsets = [0, 224], sizes = [1, 16], strides = [1, 1]} : vector<1x240xf32> to vector<1x16xf32>
    %285 = arith.addf %281, %284 : vector<1x16xf32>
    %cst_112 = arith.constant 4.500000e+02 : f32
    %286 = vector.broadcast %cst_112 : f32 to vector<1x16xf32>
    %287 = arith.divf %283, %286 : vector<1x16xf32>
    %cst_113 = arith.constant 4.500000e+02 : f32
    %288 = vector.broadcast %cst_113 : f32 to vector<1x16xf32>
    %289 = arith.divf %285, %288 : vector<1x16xf32>
    %290 = arith.mulf %287, %287 : vector<1x16xf32>
    %291 = arith.subf %289, %290 : vector<1x16xf32>
    %cst_114 = arith.constant 9.99999974E-6 : f32
    %292 = vector.broadcast %cst_114 : f32 to vector<1x16xf32>
    %293 = arith.addf %291, %292 : vector<1x16xf32>
    %294 = math.rsqrt %293 : vector<1x16xf32>
    %295 = arith.mulf %201, %294 : vector<1x16xf32>
    %296 = arith.mulf %287, %295 : vector<1x16xf32>
    %297 = arith.subf %202, %296 : vector<1x16xf32>
    %298 = tpu.concatenate %295, %295, %295, %295, %295, %295, %295, %295, %295, %295, %295, %295, %295, %295, %295 in 1 : vector<1x16xf32>, vector<1x16xf32>, vector<1x16xf32>, vector<1x16xf32>, vector<1x16xf32>, vector<1x16xf32>, vector<1x16xf32>, vector<1x16xf32>, vector<1x16xf32>, vector<1x16xf32>, vector<1x16xf32>, vector<1x16xf32>, vector<1x16xf32>, vector<1x16xf32>, vector<1x16xf32> -> vector<1x240xf32>
    %299 = tpu.concatenate %297, %297, %297, %297, %297, %297, %297, %297, %297, %297, %297, %297, %297, %297, %297 in 1 : vector<1x16xf32>, vector<1x16xf32>, vector<1x16xf32>, vector<1x16xf32>, vector<1x16xf32>, vector<1x16xf32>, vector<1x16xf32>, vector<1x16xf32>, vector<1x16xf32>, vector<1x16xf32>, vector<1x16xf32>, vector<1x16xf32>, vector<1x16xf32>, vector<1x16xf32>, vector<1x16xf32> -> vector<1x240xf32>
    %300 = vector.broadcast %298 : vector<1x240xf32> to vector<30x240xf32>
    %301 = arith.mulf %222, %300 : vector<30x240xf32>
    %302 = vector.broadcast %299 : vector<1x240xf32> to vector<30x240xf32>
    %303 = arith.addf %301, %302 : vector<30x240xf32>
    %cst_115 = arith.constant 0.000000e+00 : f32
    %304 = vector.broadcast %cst_115 : f32 to vector<30x240xf32>
    %305 = arith.maximumf %303, %304 : vector<30x240xf32>
    %306 = vector.shape_cast %305 : vector<30x240xf32> to vector<2x15x240xf32>
    %c0_116 = arith.constant 0 : index
    %c0_117 = arith.constant 0 : index
    %307 = vector.load %arg6[%c0_116, %c0_117] : memref<15x240xf32, #tpu.memory_space<vmem>>, vector<15x240xf32>
    %308 = vector.shape_cast %307 : vector<15x240xf32> to vector<1x15x240xf32>
    %309 = vector.broadcast %308 : vector<1x15x240xf32> to vector<2x15x240xf32>
    %310 = arith.mulf %306, %309 : vector<2x15x240xf32>
    %cst_118 = arith.constant dense<0.000000e+00> : vector<2x15xf32>
    %311 = vector.multi_reduction <add>, %310, %cst_118 [2] : vector<2x15x240xf32> to vector<2x15xf32>
    %312 = vector.shape_cast %311 : vector<2x15xf32> to vector<2x15x1xf32>
    %cst_119 = arith.constant dense<0.000000e+00> : vector<2x1xf32>
    %313 = vector.multi_reduction <add>, %312, %cst_119 [1] : vector<2x15x1xf32> to vector<2x1xf32>
    %c0_120 = arith.constant 0 : index
    %c0_121 = arith.constant 0 : index
    %314 = vector.load %arg7[%c0_120, %c0_121] : memref<1x1xf32, #tpu.memory_space<vmem>>, vector<1x1xf32>
    %315 = vector.broadcast %314 : vector<1x1xf32> to vector<2x1xf32>
    %316 = arith.addf %313, %315 : vector<2x1xf32>
    %c0_122 = arith.constant 0 : index
    %c0_123 = arith.constant 0 : index
    %317 = vector.load %arg8[%c0_122, %c0_123] : memref<2x1xf32, #tpu.memory_space<vmem>>, vector<2x1xf32>
    tpu.vector_store %arg8[%c0_122, %c0_123], %316 {strides = array<i32>} : memref<2x1xf32, #tpu.memory_space<vmem>>, vector<2x1xf32>,
    return
  }
  func.func @transform_0(%arg0: i32) -> (i32, i32, i32) {
    %c0_i32 = arith.constant 0 : i32
    %c0_i32_0 = arith.constant 0 : i32
    %c0_i32_1 = arith.constant 0 : i32
    return %arg0, %c0_i32, %c0_i32_0 : i32, i32, i32
  }
  func.func @transform_1(%arg0: i32) -> (i32, i32, i32) {
    %c0_i32 = arith.constant 0 : i32
    %c0_i32_0 = arith.constant 0 : i32
    %c0_i32_1 = arith.constant 0 : i32
    %c0_i32_2 = arith.constant 0 : i32
    return %c0_i32, %c0_i32_0, %c0_i32_1 : i32, i32, i32
  }
  func.func @transform_2(%arg0: i32) -> (i32, i32, i32) {
    %c0_i32 = arith.constant 0 : i32
    %c0_i32_0 = arith.constant 0 : i32
    %c0_i32_1 = arith.constant 0 : i32
    %c0_i32_2 = arith.constant 0 : i32
    return %c0_i32, %c0_i32_0, %c0_i32_1 : i32, i32, i32
  }
  func.func @transform_3(%arg0: i32) -> (i32, i32, i32) {
    %c0_i32 = arith.constant 0 : i32
    %c0_i32_0 = arith.constant 0 : i32
    %c0_i32_1 = arith.constant 0 : i32
    %c0_i32_2 = arith.constant 0 : i32
    return %c0_i32, %c0_i32_0, %c0_i32_1 : i32, i32, i32
  }
  func.func @transform_4(%arg0: i32) -> (i32, i32) {
    %c0_i32 = arith.constant 0 : i32
    %c0_i32_0 = arith.constant 0 : i32
    %c0_i32_1 = arith.constant 0 : i32
    return %c0_i32, %c0_i32_0 : i32, i32
  }
  func.func @transform_5(%arg0: i32) -> (i32, i32) {
    %c0_i32 = arith.constant 0 : i32
    %c0_i32_0 = arith.constant 0 : i32
    %c0_i32_1 = arith.constant 0 : i32
    return %c0_i32, %c0_i32_0 : i32, i32
  }
  func.func @transform_6(%arg0: i32) -> (i32, i32) {
    %c0_i32 = arith.constant 0 : i32
    %c0_i32_0 = arith.constant 0 : i32
    %c0_i32_1 = arith.constant 0 : i32
    return %c0_i32, %c0_i32_0 : i32, i32
  }
  func.func @transform_7(%arg0: i32) -> (i32, i32) {
    %c0_i32 = arith.constant 0 : i32
    %c0_i32_0 = arith.constant 0 : i32
    return %arg0, %c0_i32 : i32, i32
  }
}

</mosaic_0001>

<bundles_post_ra>
// kernel: dq_nashn_forward.1
= control target key start
LH: loop header
LB: loop body
LE: loop exit
PB: predicated region body
PF: predicated region fallthrough
CT: control target
= control target key end

     0   :  { %vm745_vm0 = vcmask 1040384   ;;  %vm29_vm1 = vcmask 656384   ;;  %v8467_v1 = vmov 0   ;;  %v8468_v3 = vmov 0.0   ;;  %s8471_s26 = smov 112   ;;  %s8472_s27 = smov 80   ;;  %s10412_s1 = inlined_call_operand.vmem [shape: bf16[3,81,176], index: 1, kind: input, shape index: {}]   ;;  %s10413_s0 = inlined_call_operand.vmem [shape: f32[2,9,81], index: 0, kind: input, shape index: {}]   ;;  %s10414_s4 = inlined_call_operand.vmem [shape: f32[6,16], index: 4, kind: input, shape index: {}]   ;;  %s10415_s2 = inlined_call_operand.vmem [shape: bf16[3,176,208], index: 2, kind: input, shape index: {}]   ;;  %s10416_s3 = inlined_call_operand.vmem [shape: bf16[3,208,240], index: 3, kind: input, shape index: {}]   ;;  %s10417_s5 = inlined_call_operand.vmem [shape: f32[15,240], index: 5, kind: input, shape index: {}]   ;;  %s10418_s6 = inlined_call_operand.<no memory space> [shape: f32[1,1], index: 6, kind: input, shape index: {}]   ;;  %s10419_s7 = inlined_call_operand.vmem [shape: f32[2,1], index: 7, kind: output, shape index: {}]  }
   0x1   :  { %v7771_v0 = vld [vmem:[%s10412_s1 + $0xa8] sm:$0x11]  ;;  %v8521_v2 = vsel %vm745_vm0, 65535, %v8467_v1  ;;  %786 = vmatprep.mubr.bf16.mxu1 %v8467_v1  ;;  %30 = vst.msk [vmem:[#allocation2] sm:$0x3] %vm29_vm1, %v8468_v3  ;;  %1329 = vmatprep.mubr.bf16.mxu0 %v8467_v1  ;;  %vm63_vm2 = vcmask 662528   ;;  %v83_v11 = vlaneseq }
   0x2   :  { %31 = vst.msk [vmem:[#allocation2 + $0x10] sm:$0x3] %vm29_vm1, %v8468_v3  ;;  %32 = vst.msk [vmem:[#allocation2 + $0xb] sm:$0x3] %vm29_vm1, %v8468_v3  ;;  %v7783_v4 = vcombine.high %v7771_v0, %v7771_v0  ;;  %v7782_v5 = vcombine.low %v7771_v0, %v7771_v0  ;;  %v8120_v8 = vld [vmem:[%s10412_s1 + $0x9c] ss:$8 sps:$4 sm:$0xff]  }
   0x3   :  { %33 = vst.msk [vmem:[#allocation2 + $0x1b] sm:$0x3] %vm29_vm1, %v8468_v3  ;;  %34 = vst [vmem:[#allocation3] sm:$0x3] %v8468_v3  ;;  %vm65_vm3 = vcmask 655360   ;;  %v59_v17 = vld [vmem:[%s10413_s0] sm:$0xff] }
   0x4   :  { %37 = vst [vmem:[#allocation3 + $0x20] sm:$0x3] %v8468_v3  ;;  %39 = vst [vmem:[#allocation3 + $0x10] sm:$0x60] %v8468_v3  ;;  %v752_v6 = vand.u32 %v7783_v4, %v8521_v2  ;;  %v749_v7 = vand.u32 %v7782_v5, %v8521_v2  ;;  %v8469_v9 = vmov 1966171168  }
   0x5   :  { %42 = vst [vmem:[#allocation3 + $0x30] sm:$0x60] %v8468_v3  ;;  %44 = vst [vmem:[#allocation4] sm:$0x3] %v8468_v3  ;;  %v81_v10 = vunpack.c.l.s4 %v8469_v9  ;;  %v8122_v12 = vld [vmem:[%s10412_s1 + $0x98] ss:$8 sps:$4 sm:$0xff]  }
   0x6   :  { %47 = vst [vmem:[#allocation4 + $0x30] sm:$0x3] %v8468_v3  ;;  %49 = vst [vmem:[#allocation4 + $0x10] sm:$0x80] %v8468_v3  ;;  %758 = vmatprep.subr.bf16.mxu1 %v752_v6  ;;  %v7814_v13 = vld [vmem:[%s10412_s1 + $0x100] sm:$0x11] }
   0x7   :  { %52 = vst [vmem:[#allocation4 + $0x20] sm:$0x1] %v8468_v3  ;;  %55 = vst [vmem:[#allocation4 + $0x40] sm:$0x80] %v8468_v3  ;;  %759 = vmatpush1.bf16.msra.mxu1 %v749_v7  ;;  %v8123_v14 = vld [vmem:[%s10412_s1 + $0x8c] ss:$8 sps:$4 sm:$0xff]   ;;  %v7826_v15 = vcombine.high %v7814_v13, %v7814_v13  ;;  %v7825_v16 = vcombine.low %v7814_v13, %v7814_v13  ;;  %v82_v24 = vunpack.c.0.s8 %v81_v10 }
   0x8   :  { %57 = vst [vmem:[#allocation4 + $0x50] sm:$0x1] %v8468_v3  ;;  %760 = vmatprep.subr.bf16.mxu1 %v8120_v8  ;;  %v60_v18 = vld [vmem:[%s10413_s0 + $0x8] sm:$0x1]  ;;  %v61_v20 = vld [vmem:[%s10413_s0 + $0x10] sm:$0xff]  ;;  %64 = vst.msk [vmem:[#allocation2 + $0x2] sm:$0xff] %vm63_vm2, %v59_v17 }
   0x9   :  { %v8125_v19 = vld [vmem:[%s10412_s1 + $0x88] ss:$8 sps:$4 sm:$0xff]   ;;  %v62_v21 = vld [vmem:[%s10413_s0 + $0x18] sm:$0x1]  ;;  %66 = vst.msk [vmem:[#allocation2 + $0xa] sm:$0x1] %vm65_vm3, %v60_v18  ;;  %v1295_v22 = vand.u32 %v7826_v15, %v8521_v2  ;;  %v1292_v23 = vand.u32 %v7825_v16, %v8521_v2 }
   0xa   :  { %67 = vst.msk [vmem:[#allocation2 + $0x12] sm:$0xff] %vm63_vm2, %v61_v20  ;;  %v8574_v25 = vshrl.u32 %v83_v11, 7  ;;  %v8141_v26 = vld [vmem:[%s10412_s1 + $0xf4] ss:$8 sps:$4 sm:$0xff]   ;;  %v8128_v29 = vld [vmem:[%s10412_s1 + $0x78] ss:$8 sps:$4 sm:$0xff]  }
   0xb   :  { %68 = vst.msk [vmem:[#allocation2 + $0x1a] sm:$0x1] %vm65_vm3, %v62_v21  ;;  %761 = vmatpush1.bf16.msra.mxu1 %v8122_v12  ;;  %v376_v27 = vld [vmem:[%s10412_s1 + $0x50] sm:$0x11]  ;;  %v8126_v28 = vld [vmem:[%s10412_s1 + $0x7c] ss:$8 sps:$4 sm:$0xff]   ;;  %1301 = vmatprep.subr.bf16.mxu0 %v1295_v22 }
   0xc   :  { %762 = vmatprep.subr.bf16.mxu1 %v8123_v14  ;;  %1302 = vmatpush1.bf16.msra.mxu0 %v1292_v23  ;;  %v8143_v30 = vld [vmem:[%s10412_s1 + $0xf0] ss:$8 sps:$4 sm:$0xff]   ;;  %v8592_v31 = vsub.s32 %v82_v24, %v8574_v25  ;;  %v7796_v32 = vcombine.low %v376_v27, %v376_v27  ;;  %v7797_v33 = vcombine.high %v376_v27, %v376_v27  ;;  %v8147_v34 = vld [vmem:[%s10412_s1 + $0xe4] ss:$8 sps:$4 sm:$0xff]   ;;  %v8149_v43 = vld [vmem:[%s10412_s1 + $0xe0] ss:$8 sps:$4 sm:$0xff]  }
   0xd   :  { %1303 = vmatprep.subr.bf16.mxu0 %v8141_v26  ;;  %v8129_v35 = vld [vmem:[%s10412_s1 + $0x6c] ss:$8 sps:$4 sm:$0xff]   ;;  %v8131_v49 = vld [vmem:[%s10412_s1 + $0x68] ss:$8 sps:$4 sm:$0xff]   ;;  %v8132_v54 = vld [vmem:[%s10412_s1 + $0x5c] ss:$8 sps:$4 sm:$0xff]  }
   0xe   :  { %v870_v46 = vand.u32 %v7797_v33, %v8521_v2  ;;  %v8608_v47 = vand.u32 %v7796_v32, %v8521_v2  ;;  %v8153_v48 = vld [vmem:[%s10412_s1 + $0xd4] ss:$8 sps:$4 sm:$0xff]   ;;  %v8155_v63 = vld [vmem:[%s10412_s1 + $0xd0] ss:$8 sps:$4 sm:$0xff]   ;;  %v8159_v6 = vld [vmem:[%s10412_s1 + $0xc4] ss:$8 sps:$4 sm:$0xff]  }
   0xf   :  { %763 = vmatpush1.bf16.msra.mxu1 %v8125_v19  ;;  %v377_v36 = vld [vmem:[#allocation2 + $0x1] sm:$0xff]  ;;  %v8165_v27 = vld [vmem:[%s10412_s1 + $0xb4] ss:$8 sps:$4 sm:$0xff]   ;;  %vm1355_vm4 = vcmask 1045504   ;;  %vm1364_vm5 = vcmask 392192   ;;  %vm1368_vm6 = vcmask 390144  }
  0x10   :  { %764 = vmatprep.subr.bf16.mxu1 %v8126_v28  ;;  %v7757_v37 = vld.sshfl [vmem:[#allocation2 + $0x9] sm:$0x13 pattern:$0x75316420]  ;;  %v385_v39 = vcombine.high %v377_v36, %v377_v36  ;;  %v392_v40 = vrot.slane %v377_v36, %v8592_v31  ;;  %1304 = vmatpush1.bf16.msra.mxu0 %v8143_v30  ;;  %v8135_v7 = vld [vmem:[%s10412_s1 + $0x58] ss:$8 sps:$4 sm:$0xff]  }
  0x11   :  { %v379_v38 = vld [vmem:[#allocation2 + $0x11] sm:$0xff]  ;;  %v441_v41 = vcombine.high %v7757_v37, %v7757_v37  ;;  %v448_v42 = vrot.slane %v7757_v37, %v8592_v31  ;;  %1305 = vmatprep.subr.bf16.mxu0 %v8147_v34  ;;  %v8161_v21 = vld [vmem:[%s10412_s1 + $0xc0] ss:$8 sps:$4 sm:$0xff]   ;;  %s8473_s28 = smov 64   ;;  %s8474_s29 = smov 48   ;;  %vm35_vm7 = vcmask 386048  }
  0x12   :  { %v457_v44 = vcombine.high %v379_v38, %v379_v38  ;;  %v464_v45 = vrot.slane %v379_v38, %v8592_v31  ;;  %v399_v50 = vrot.slane %v385_v39, %v8592_v31  ;;  %v400_v51 = vcombine.high %v392_v40, %v392_v40  ;;  %v7758_v20 = vld.sshfl [vmem:[#allocation2 + $0x19] sm:$0x13 pattern:$0x75316420]  ;;  %v923_v33 = vld [vmem:[#allocation2 + $0x2] sm:$0xff]  ;;  %s8475_s30 = smov 32  }
  0x13   :  { %765 = vmatpush1.bf16.msra.mxu1 %v8128_v29  ;;  %v408_v52 = vrot.slane %v392_v40, %v8592_v31  ;;  %v455_v53 = vrot.slane %v441_v41, %v8592_v31  ;;  %v456_v55 = vcombine.high %v448_v42, %v448_v42  ;;  %v513_v37 = vcombine.high %v7758_v20, %v7758_v20  ;;  %s8476_s8 = smov 16  }
  0x14   :  { %766 = vmatprep.subr.bf16.mxu1 %v8129_v35  ;;  %v471_v56 = vrot.slane %v457_v44, %v8592_v31  ;;  %v472_v57 = vcombine.high %v464_v45, %v464_v45  ;;  %v480_v58 = vrot.slane %v464_v45, %v8592_v31  ;;  %v401_v59 = vcombine.high %v399_v50, %v399_v50  ;;  %v7800_v45 = vld.sshfl [vmem:[#allocation2 + $0xa] sm:$0x13 pattern:$0x75316420] }
  0x15   :  { %v415_v60 = vrot.slane %v399_v50, %v8592_v31  ;;  %v422_v61 = vrot.slane %v400_v51, %v8592_v31  ;;  %v578_v62 = vcombine.low %v448_v42, %v455_v53  ;;  %1306 = vmatpush1.bf16.msra.mxu0 %v8149_v43  ;;  %v520_v40 = vrot.slane %v7758_v20, %v8592_v31  ;;  %v8167_v42 = vld [vmem:[%s10412_s1 + $0xb0] ss:$8 sps:$4 sm:$0xff]  }
  0x16   :  { %v487_v0 = vrot.slane %v471_v56, %v8592_v31  ;;  %v494_v2 = vrot.slane %v472_v57, %v8592_v31  ;;  %v502_v4 = vcombine.high %v480_v58, %v480_v58  ;;  %v579_v5 = vcombine.low %v456_v55, %v480_v58  ;;  %1307 = vmatprep.subr.bf16.mxu0 %v8153_v48 }
  0x17   :  { %767 = vmatpush1.bf16.msra.mxu1 %v8131_v49  ;;  %v429_v8 = vrot.slane %v401_v59, %v8592_v31  ;;  %v529_v9 = vcombine.low %v408_v52, %v422_v61  ;;  %v7759_v10 = vcombine.high %v408_v52, %v422_v61  ;;  %v588_v11 = vrot.slane %v578_v62, %v8592_v31 }
  0x18   :  { %768 = vmatprep.subr.bf16.mxu1 %v8132_v54  ;;  %v504_v12 = vcombine.high %v494_v2, %v494_v2  ;;  %v580_v13 = vcombine.low %v494_v2, %v502_v4  ;;  %v595_v14 = vrot.slane %v579_v5, %v8592_v31  ;;  %v473_v15 = vcombine.high %v471_v56, %v471_v56 }
  0x19   :  { %v531_v16 = vcombine.low %v415_v60, %v429_v8  ;;  %v7760_v17 = vcombine.high %v415_v60, %v429_v8  ;;  %v539_v18 = vrot.slane %v529_v9, %v8592_v31  ;;  %v546_v19 = vrot.slane %v7759_v10, %v8592_v31  ;;  %1308 = vmatpush1.bf16.msra.mxu0 %v8155_v63  ;;  %v925_v60 = vld [vmem:[#allocation2 + $0x12] sm:$0xff]  ;;  %v8146_v9 = vld [vmem:[%s10412_s1 + $0x44] ss:$8 sps:$4 sm:$0xff]  }
  0x1a   :  { %v581_v22 = vcombine.low %v504_v12, %v487_v0  ;;  %v602_v23 = vrot.slane %v580_v13, %v8592_v31  ;;  %v610_v24 = vcombine.low %v588_v11, %v595_v14  ;;  %v501_v26 = vrot.slane %v473_v15, %v8592_v31  ;;  %1309 = vmatprep.subr.bf16.mxu0 %v8159_v6 }
  0x1b   :  { %769 = vmatpush1.bf16.msra.mxu1 %v8135_v7  ;;  %v553_v28 = vrot.slane %v531_v16, %v8592_v31  ;;  %v560_v29 = vrot.slane %v7760_v17, %v8592_v31  ;;  %v561_v30 = vcombine.low %v539_v18, %v546_v19  ;;  %v503_v32 = vcombine.high %v487_v0, %v487_v0 }
  0x1c   :  { %v609_v34 = vrot.slane %v581_v22, %v8592_v31  ;;  %v618_v35 = vrot.slane %v610_v24, %v8592_v31  ;;  %876 = vmatprep.subr.bf16.mxu1 %v870_v46  ;;  %v505_v36 = vcombine.high %v501_v26, %v501_v26  ;;  %v527_v44 = vrot.slane %v513_v37, %v8592_v31 }
  0x1d   :  { %v562_v38 = vcombine.low %v553_v28, %v560_v29  ;;  %v569_v39 = vrot.slane %v561_v30, %v8592_v31  ;;  %v627_v41 = vcombine.low %v501_v26, %v503_v32  ;;  %1310 = vmatpush1.bf16.msra.mxu0 %v8161_v21  ;;  %v931_v48 = vcombine.high %v923_v33, %v923_v33  ;;  %v8144_v21 = vld [vmem:[%s10412_s1 + $0x40] ss:$8 sps:$4 sm:$0xff]   ;;  %v8152_v26 = vld [vmem:[%s10412_s1 + $0x34] ss:$8 sps:$4 sm:$0xff]  }
  0x1e   :  { %v611_v43 = vcombine.low %v602_v23, %v609_v34  ;;  %1311 = vmatprep.subr.bf16.mxu0 %v8165_v27  ;;  %v938_v46 = vrot.slane %v923_v33, %v8592_v31  ;;  %v528_v50 = vcombine.high %v520_v40, %v520_v40  ;;  %v628_v51 = vcombine.low %v505_v36, %v520_v40  ;;  %v71_v30 = vld [vmem:[#allocation2] sm:$0xff]  ;;  %v8150_v40 = vld [vmem:[%s10412_s1 + $0x30] ss:$8 sps:$4 sm:$0xff]  }
  0x1f   :  { %v576_v49 = vrot.slane %v562_v38, %v8592_v31  ;;  %v636_v52 = vrot.slane %v627_v41, %v8592_v31  ;;  %v945_v54 = vrot.slane %v931_v48, %v8592_v31  ;;  %v987_v61 = vcombine.high %v7800_v45, %v7800_v45  ;;  %v8158_v48 = vld [vmem:[%s10412_s1 + $0x24] ss:$8 sps:$4 sm:$0xff]   ;;  %36 = vst.msk [vmem:[#allocation3 + $0x8] sm:$0x3] %vm35_vm7, %v8468_v3 }
  0x20   :  { %v625_v53 = vrot.slane %v611_v43, %v8592_v31  ;;  %v946_v55 = vcombine.high %v938_v46, %v938_v46  ;;  %v954_v56 = vrot.slane %v938_v46, %v8592_v31  ;;  %v629_v58 = vcombine.low %v527_v44, %v528_v50  ;;  %v7753_v43 = vld.sshfl [vmem:[#allocation2 + $0x8] sm:$0x13 pattern:$0x75316420]  ;;  %38 = vst.msk [vmem:[#allocation3 + $0x28] sm:$0x3] %vm35_vm7, %v8468_v3 }
  0x21   :  { %v577_v57 = vcombine.low %v569_v39, %v576_v49  ;;  %v643_v59 = vrot.slane %v628_v51, %v8592_v31  ;;  %1312 = vmatpush1.bf16.msra.mxu0 %v8167_v42  ;;  %v947_v63 = vcombine.high %v945_v54, %v945_v54  ;;  %v961_v0 = vrot.slane %v945_v54, %v8592_v31 }
  0x22   :  { %v626_v62 = vcombine.low %v618_v35, %v625_v53  ;;  %v968_v2 = vrot.slane %v946_v55, %v8592_v31  ;;  %v650_v4 = vrot.slane %v629_v58, %v8592_v31  ;;  %v994_v6 = vrot.slane %v7800_v45, %v8592_v31  ;;  %v73_v58 = vld [vmem:[#allocation2 + $0x10] sm:$0xff] }
  0x23   :  { %v651_v5 = vcombine.low %v636_v52, %v643_v59  ;;  %v1001_v7 = vrot.slane %v987_v61, %v8592_v31  ;;  %v975_v10 = vrot.slane %v947_v63, %v8592_v31  ;;  %v1003_v11 = vcombine.high %v925_v60, %v925_v60  ;;  %v8156_v61 = vld [vmem:[%s10412_s1 + $0x20] ss:$8 sps:$4 sm:$0xff]  }
  0x24   :  { %v670_v8 = vpack.c.bf16 %v626_v62, %v577_v57  ;;  %v1010_v12 = vrot.slane %v925_v60, %v8592_v31  ;;  %v665_v14 = vrot.slane %v650_v4, %v8592_v31  ;;  %v1002_v15 = vcombine.high %v994_v6, %v994_v6 }
  0x25   :  { %v658_v13 = vrot.slane %v651_v5, %v8592_v31  ;;  %v1075_v16 = vcombine.low %v954_v56, %v968_v2  ;;  %v8681_v17 = vrot.slane %v1003_v11, %v8592_v31  ;;  %v7802_v20 = vcombine.high %v954_v56, %v968_v2  ;;  %v8164_v2 = vld [vmem:[%s10412_s1 + $0x14] ss:$8 sps:$4 sm:$0xff]  }
  0x26   :  { %7784 = vmatmul.mubr.msk.bf16.vlgmr.msra.gmra.mxu1 %vm63_vm2, %v670_v8  ;;  %v1018_v18 = vcombine.high %v1010_v12, %v1010_v12  ;;  %v1026_v19 = vrot.slane %v1010_v12, %v8592_v31  ;;  %v1077_v23 = vcombine.low %v961_v0, %v975_v10  ;;  %v7803_v24 = vcombine.high %v961_v0, %v975_v10 }
  0x27   :  { %877 = vmatpush1.bf16.msra.mxu1 %v8608_v47  ;;  %796 = vmatprep.mubr.bf16.mxu1 %v8467_v1  ;;  %v666_v22 = vcombine.low %v658_v13, %v665_v14  ;;  %v8694_v27 = vrot.slane %v8681_v17, %v8592_v31  ;;  %v1085_v29 = vrot.slane %v1075_v16, %v8592_v31  ;;  %v8162_v16 = vld [vmem:[%s10412_s1 + $0x10] ss:$8 sps:$4 sm:$0xff]   ;;  %vm40_vm8 = vcmask 391173  }
  0x28   :  { %878 = vmatprep.subr.bf16.mxu1 %v8146_v9  ;;  %v1040_v47 = vrot.slane %v1018_v18, %v8592_v31  ;;  %v1048_v28 = vcombine.high %v1026_v19, %v1026_v19  ;;  %v1092_v33 = vrot.slane %v7802_v20, %v8592_v31  ;;  %v1099_v34 = vrot.slane %v1077_v23, %v8592_v31 }
  0x29   :  { %v671_v32 = vpack.c.bf16 %v666_v22, %v666_v22  ;;  %v1106_v35 = vrot.slane %v7803_v24, %v8592_v31  ;;  %v1124_v37 = vcombine.low %v994_v6, %v1001_v7  ;;  %v1125_v38 = vcombine.low %v1002_v15, %v1026_v19  ;;  %v8170_v22 = vld [vmem:[%s10412_s1 + $0x4] ss:$8 sps:$4 sm:$0xff]   ;;  %41 = vst.msk [vmem:[#allocation3 + $0x18] sm:$0x60] %vm40_vm8, %v8468_v3 }
  0x2a   :  { %v1050_v36 = vcombine.high %v1040_v47, %v1040_v47  ;;  %v1126_v39 = vcombine.low %v1040_v47, %v1048_v28  ;;  %v1107_v41 = vcombine.low %v1085_v29, %v1092_v33  ;;  %v79_v44 = vcombine.high %v71_v30, %v71_v30  ;;  %43 = vst.msk [vmem:[#allocation3 + $0x38] sm:$0x60] %vm40_vm8, %v8468_v3 }
  0x2b   :  { %879 = vmatpush1.bf16.msra.mxu1 %v8144_v21  ;;  %v1108_v42 = vcombine.low %v1099_v34, %v1106_v35  ;;  %v86_v45 = vrot.slane %v71_v30, %v8592_v31  ;;  %v1134_v49 = vrot.slane %v1124_v37, %v8592_v31  ;;  %v1141_v50 = vrot.slane %v1125_v38, %v8592_v31  ;;  %v8168_v37 = vld [vmem:[%s10412_s1] ss:$8 sps:$4 sm:$0xff]   ;;  %s8470_s1 = smov 96  }
  0x2c   :  { %880 = vmatprep.subr.bf16.mxu1 %v8152_v26  ;;  %v1127_v46 = vcombine.low %v1050_v36, %v8694_v27  ;;  %v1148_v51 = vrot.slane %v1126_v39, %v8592_v31  ;;  %v1115_v52 = vrot.slane %v1107_v41, %v8592_v31  ;;  %v93_v54 = vrot.slane %v79_v44, %v8592_v31  ;;  %v7801_v41 = vld.sshfl [vmem:[#allocation2 + $0x1a] sm:$0x13 pattern:$0x75316420] }
  0x2d   :  { %v1122_v53 = vrot.slane %v1108_v42, %v8592_v31  ;;  %v94_v55 = vcombine.high %v86_v45, %v86_v45  ;;  %v1156_v57 = vcombine.low %v1134_v49, %v1141_v50  ;;  %v102_v59 = vrot.slane %v86_v45, %v8592_v31 }
  0x2e   :  { %7785 = vmatmul.mubr.msk.bf16.gmra.mxu1 %vm63_vm2, %v671_v32  ;;  %v1155_v56 = vrot.slane %v1127_v46, %v8592_v31  ;;  %v135_v60 = vcombine.high %v7753_v43, %v7753_v43  ;;  %v95_v63 = vcombine.high %v93_v54, %v93_v54  ;;  %v109_v0 = vrot.slane %v93_v54, %v8592_v31 }
  0x2f   :  { %881 = vmatpush1.bf16.msra.mxu1 %v8150_v40  ;;  %v1123_v62 = vcombine.low %v1115_v52, %v1122_v53  ;;  %904 = vmatprep.mubr.bf16.mxu1 %v8467_v1  ;;  %v1164_v5 = vrot.slane %v1156_v57, %v8592_v31  ;;  %v116_v6 = vrot.slane %v94_v55, %v8592_v31  ;;  %v7754_v57 = vld.sshfl [vmem:[#allocation2 + $0x18] sm:$0x13 pattern:$0x75316420]  ;;  %vm1513_vm9 = vcmask 130048  }
  0x30   :  { %882 = vmatprep.subr.bf16.mxu1 %v8158_v48  ;;  %v1157_v4 = vcombine.low %v1148_v51, %v1155_v56  ;;  %v142_v7 = vrot.slane %v7753_v43, %v8592_v31  ;;  %v123_v8 = vrot.slane %v95_v63, %v8592_v31  ;;  %v149_v9 = vrot.slane %v135_v60, %v8592_v31 }
  0x31   :  { %v151_v10 = vcombine.high %v73_v58, %v73_v58  ;;  %v158_v11 = vrot.slane %v73_v58, %v8592_v31  ;;  %v223_v14 = vcombine.low %v102_v59, %v116_v6  ;;  %v7755_v15 = vcombine.high %v102_v59, %v116_v6 }
  0x32   :  { %v1171_v12 = vrot.slane %v1157_v4, %v8592_v31  ;;  %v150_v13 = vcombine.high %v142_v7, %v142_v7  ;;  %v225_v21 = vcombine.low %v109_v0, %v123_v8  ;;  %v7756_v24 = vcombine.high %v109_v0, %v123_v8 }
  0x33   :  { %883 = vmatpush1.bf16.msra.mxu1 %v8156_v61  ;;  %v165_v18 = vrot.slane %v151_v10, %v8592_v31  ;;  %v166_v19 = vcombine.high %v158_v11, %v158_v11  ;;  %v174_v20 = vrot.slane %v158_v11, %v8592_v31  ;;  %v233_v26 = vrot.slane %v223_v14, %v8592_v31 }
  0x34   :  { %884 = vmatprep.subr.bf16.mxu1 %v8164_v2  ;;  %v1172_v23 = vcombine.low %v1164_v5, %v1171_v12  ;;  %v240_v47 = vrot.slane %v7755_v15, %v8592_v31  ;;  %v247_v32 = vrot.slane %v225_v21, %v8592_v31  ;;  %v254_v34 = vrot.slane %v7756_v24, %v8592_v31 }
  0x35   :  { %v181_v28 = vrot.slane %v165_v18, %v8592_v31  ;;  %v188_v29 = vrot.slane %v166_v19, %v8592_v31  ;;  %v196_v30 = vcombine.high %v174_v20, %v174_v20  ;;  %v272_v36 = vcombine.low %v142_v7, %v149_v9 }
  0x36   :  { %v1216_v33 = vpack.c.bf16 %v1172_v23, %v1123_v62  ;;  %v255_v35 = vcombine.low %v233_v26, %v240_v47  ;;  %v273_v39 = vcombine.low %v150_v13, %v174_v20  ;;  %v1019_v42 = vcombine.high %v8681_v17, %v8681_v17 }
  0x37   :  { %885 = vmatpush1.bf16.msra.mxu1 %v8162_v16  ;;  %v198_v38 = vcombine.high %v188_v29, %v188_v29  ;;  %v274_v40 = vcombine.low %v188_v29, %v196_v30  ;;  %v256_v43 = vcombine.low %v247_v32, %v254_v34  ;;  %v282_v45 = vrot.slane %v272_v36, %v8592_v31 }
  0x38   :  { %886 = vmatprep.subr.bf16.mxu1 %v8170_v22  ;;  %7827 = vmatmul.mubr.msk.bf16.vlgmr.msra.gmra.mxu0 %vm63_vm2, %v1216_v33  ;;  %v263_v44 = vrot.slane %v255_v35, %v8592_v31  ;;  %v289_v46 = vrot.slane %v273_v39, %v8592_v31  ;;  %v1047_v50 = vrot.slane %v1019_v42, %v8592_v31  ;;  %vm1515_vm10 = vcmask 261120  }
  0x39   :  { %v275_v48 = vcombine.low %v198_v38, %v181_v28  ;;  %v296_v49 = vrot.slane %v274_v40, %v8592_v31  ;;  %1339 = vmatprep.mubr.bf16.mxu0 %v8467_v1  ;;  %v270_v51 = vrot.slane %v256_v43, %v8592_v31  ;;  %v1049_v17 = vcombine.high %v8694_v27, %v8694_v27 }
  0x3a   :  { %v1059_v52 = vcombine.high %v7801_v41, %v7801_v41  ;;  %v1066_v53 = vrot.slane %v7801_v41, %v8592_v31  ;;  %v304_v55 = vcombine.low %v282_v45, %v289_v46  ;;  %v1051_v56 = vcombine.high %v1047_v50, %v1047_v50 }
  0x3b   :  { %887 = vmatpush1.bf16.msra.mxu1 %v8168_v37  ;;  %v303_v54 = vrot.slane %v275_v48, %v8592_v31  ;;  %v167_v58 = vcombine.high %v165_v18, %v165_v18  ;;  %v271_v59 = vcombine.low %v263_v44, %v270_v51  ;;  %v1173_v62 = vcombine.low %v1047_v50, %v1049_v17 }
  0x3c   :  { %v1073_v60 = vrot.slane %v1059_v52, %v8592_v31  ;;  %v1074_v61 = vcombine.high %v1066_v53, %v1066_v53  ;;  %v312_v0 = vrot.slane %v304_v55, %v8592_v31  ;;  %v1174_v2 = vcombine.low %v1051_v56, %v1066_v53 }
  0x3d   :  { %v305_v63 = vcombine.low %v296_v49, %v303_v54  ;;  %v195_v27 = vrot.slane %v167_v58, %v8592_v31  ;;  %v1182_v5 = vrot.slane %v1173_v62, %v8592_v31  ;;  %v197_v6 = vcombine.high %v181_v28, %v181_v28 }
  0x3e   :  { %v1175_v4 = vcombine.low %v1073_v60, %v1074_v61  ;;  %v207_v7 = vcombine.high %v7754_v57, %v7754_v57  ;;  %v1189_v9 = vrot.slane %v1174_v2, %v8592_v31  ;;  %v214_v11 = vrot.slane %v7754_v57, %v8592_v31 }
  0x3f   :  { %v319_v8 = vrot.slane %v305_v63, %v8592_v31  ;;  %v199_v10 = vcombine.high %v195_v27, %v195_v27  ;;  %v321_v14 = vcombine.low %v195_v27, %v197_v6  ;;  %vm1518_vm11 = vcmask 523264  }
  0x40   :  { %v1196_v12 = vrot.slane %v1175_v4, %v8592_v31  ;;  %v221_v13 = vrot.slane %v207_v7, %v8592_v31  ;;  %v1197_v16 = vcombine.low %v1182_v5, %v1189_v9  ;;  %v222_v18 = vcombine.high %v214_v11, %v214_v11 }
  0x41   :  { %v320_v15 = vcombine.low %v312_v0, %v319_v8  ;;  %v322_v19 = vcombine.low %v199_v10, %v214_v11  ;;  %v330_v21 = vrot.slane %v321_v14, %v8592_v31  ;;  %vm1520_vm12 = vcmask 654336  }
  0x42   :  { %v1211_v20 = vrot.slane %v1196_v12, %v8592_v31  ;;  %v1204_v23 = vrot.slane %v1197_v16, %v8592_v31  ;;  %v323_v24 = vcombine.low %v221_v13, %v222_v18  ;;  %vm1522_vm13 = vcmask 785408  }
  0x43   :  { %v364_v22 = vpack.c.bf16 %v320_v15, %v271_v59  ;;  %v337_v26 = vrot.slane %v322_v19, %v8592_v31  ;;  %vm1524_vm14 = vcmask 916480   ;;  %vm1978_vm15 = vcmask 392194  }
  0x44   :  { %v1212_v47 = vcombine.low %v1204_v23, %v1211_v20  ;;  %v344_v28 = vrot.slane %v323_v24, %v8592_v31  ;;  %vm1981_vm0 = vcmask 389120   ;;  %vm45_vm1 = vcmask 648192  }
  0x45   :  { %7798 = vmatmul.mubr.msk.bf16.vlgmr.msra.gmra.mxu1 %vm63_vm2, %v364_v22  ;;  %v345_v29 = vcombine.low %v330_v21, %v337_v26  ;;  %46 = vst.msk [vmem:[#allocation4 + $0x8] sm:$0x3] %vm45_vm1, %v8468_v3  ;;  %48 = vst.msk [vmem:[#allocation4 + $0x38] sm:$0x3] %vm45_vm1, %v8468_v3  ;;  %vm50_vm3 = vcmask 654343   ;;  %vm4584_vm7 = vcmask 654338  }
  0x46   :  { %914 = vmatprep.mubr.bf16.mxu1 %v8467_v1  ;;  %v1217_v30 = vpack.c.bf16 %v1212_v47, %v1212_v47  ;;  %v359_v33 = vrot.slane %v344_v28, %v8592_v31  ;;  %51 = vst.msk [vmem:[#allocation4 + $0x18] sm:$0x80] %vm50_vm3, %v8468_v3  ;;  %56 = vst.msk [vmem:[#allocation4 + $0x48] sm:$0x80] %vm50_vm3, %v8468_v3  ;;  %vm4587_vm8 = vcmask 653312  }
  0x47   :  { %v352_v32 = vrot.slane %v345_v29, %v8592_v31 }
  0x48   :  { %7828 = vmatmul.mubr.msk.bf16.gmra.mxu0 %vm63_vm2, %v1217_v30 }
  0x49   :  { %v360_v34 = vcombine.low %v352_v32, %v359_v33 }
  0x4b   :  { %v365_v35 = vpack.c.bf16 %v360_v34, %v360_v34 }
  0x4d   :  { %7799 = vmatmul.mubr.msk.bf16.gmra.mxu1 %vm63_vm2, %v365_v35  ;;  %vm3895_vm2 = vcmask 1041408  }
  0xe6   :  { %v788_v36 = vpop.f32.mrf.mxu1 }
  0xe8   :  { %v790_v37 = vpop.f32.mrf.mxu1 }
  0xea   :  { %v792_v38 = vpop.f32.mrf.mxu1 }
  0xec   :  { %v794_v39 = vpop.f32.mrf.mxu1 }
  0xee   :  { %v798_v40 = vpop.f32.mrf.mxu1 }
  0xf0   :  { %v800_v41 = vpop.f32.mrf.mxu1 }
  0xf2   :  { %v802_v42 = vpop.f32.mrf.mxu1 }
  0xf4   :  { %v803_v43 = vpop.f32.mrf.mxu1 }
  0xf8   :  { %v1331_v1 = vpop.f32.mrf.mxu0 }
  0xfa   :  { %v1333_v44 = vpop.f32.mrf.mxu0 }
  0xfc   :  { %v1335_v45 = vpop.f32.mrf.mxu0 }
  0xfe   :  { %v1337_v46 = vpop.f32.mrf.mxu0 }
 0x105   :  { %v906_v48 = vpop.f32.mrf.mxu1 }
 0x106   :  { %v907_v17 = vadd.f32 %v906_v48, %v788_v36 }
 0x107   :  { %v908_v49 = vpop.f32.mrf.mxu1 }
 0x108   :  { %v1341_v51 = vpop.f32.mrf.mxu0  ;;  %v8786_v58 = vadd.f32 %v1331_v1, %v907_v17  ;;  %v909_v10 = vadd.f32 %v908_v49, %v790_v37 }
 0x109   :  { %v910_v50 = vpop.f32.mrf.mxu1 }
 0x10a   :  { %v911_v52 = vadd.f32 %v910_v50, %v792_v38  ;;  %v1343_v54 = vpop.f32.mrf.mxu0  ;;  %v1377_v2 = vmul.f32 %v8786_v58, %v8786_v58  ;;  %v8803_v19 = vadd.f32 %v1333_v44, %v909_v10 }
 0x10b   :  { %v912_v53 = vpop.f32.mrf.mxu1 }
 0x10c   :  { %v8784_v55 = vadd.f32 %v1335_v45, %v911_v52  ;;  %v1345_v57 = vpop.f32.mrf.mxu0  ;;  %v913_v4 = vadd.f32 %v912_v53, %v794_v39  ;;  %v1378_v47 = vmul.f32 %v8803_v19, %v8803_v19  ;;  %v1365_v36 = vsel %vm1364_vm5, %v8803_v19, 0.0 }
 0x10d   :  { %v916_v56 = vpop.f32.mrf.mxu1 }
 0x10e   :  { %v917_v59 = vadd.f32 %v916_v56, %v798_v40  ;;  %v1346_v61 = vpop.f32.mrf.mxu0  ;;  %v1379_v62 = vmul.f32 %v8784_v55, %v8784_v55  ;;  %v1354_v27 = vadd.f32 %v8784_v55, %v8786_v58  ;;  %v8801_v15 = vadd.f32 %v1337_v46, %v913_v4 }
 0x10f   :  { %v918_v60 = vpop.f32.mrf.mxu1  ;;  %v1392_v37 = vsel %vm1364_vm5, %v1378_v47, 0.0 }
 0x110   :  { %v8790_v63 = vadd.f32 %v1341_v51, %v917_v59  ;;  %v1383_v8 = vadd.f32 %v1379_v62, %v1377_v2  ;;  %v919_v12 = vadd.f32 %v918_v60, %v800_v41  ;;  %v1380_v23 = vmul.f32 %v8801_v15, %v8801_v15 }
 0x111   :  { %v920_v0 = vpop.f32.mrf.mxu1  ;;  %v1366_v32 = vsel %vm1364_vm5, %v8801_v15, 0.0 }
 0x112   :  { %v1356_v5 = vsel %vm1355_vm4, %v8790_v63, 0.0  ;;  %v1381_v6 = vmul.f32 %v8790_v63, %v8790_v63  ;;  %v8805_v20 = vadd.f32 %v1343_v54, %v919_v12  ;;  %v1393_v33 = vsel %vm1364_vm5, %v1380_v23, 0.0 }
 0x113   :  { %v921_v7 = vpop.f32.mrf.mxu1  ;;  %v1357_v9 = vadd.f32 %v1356_v5, %v1354_v27  ;;  %v1367_v40 = vadd.f32 %v1366_v32, %v1365_v36  ;;  %v1394_v41 = vadd.f32 %v1393_v33, %v1392_v37 }
 0x114   :  { %v1384_v11 = vsel %vm1355_vm4, %v1381_v6, 0.0  ;;  %v1382_v28 = vmul.f32 %v8805_v20, %v8805_v20  ;;  %v1369_v38 = vsel %vm1368_vm6, %v8805_v20, 0.0 }
 0x115   :  { %v1358_v13 = vrot.slane %v1357_v9, 4  ;;  %v1385_v14 = vadd.f32 %v1384_v11, %v1383_v8  ;;  %v1370_v43 = vadd.f32 %v1369_v38, %v1367_v40 }
 0x116   :  { %v1395_v39 = vsel %vm1368_vm6, %v1382_v28, 0.0  ;;  %vm53_vm6 = vcmask 647168  }
 0x117   :  { %v1359_v16 = vadd.f32 %v1358_v13, %v1357_v9  ;;  %v1386_v18 = vrot.slane %v1385_v14, 4  ;;  %v1396_v1 = vadd.f32 %v1395_v39, %v1394_v41  ;;  %v1371_v45 = vrot.slane %v1370_v43, 4  ;;  %54 = vst.msk [vmem:[#allocation4 + $0x28] sm:$0x1] %vm53_vm6, %v8468_v3  ;;  %58 = vst.msk [vmem:[#allocation4 + $0x58] sm:$0x1] %vm53_vm6, %v8468_v3 }
 0x118   :  { %v8375_v3 = vld [vmem:[%s10416_s3 + $0x90] ss:$8 sps:$4 sm:$0xff]  }
 0x119   :  { %v1360_v21 = vrot.slane %v1359_v16, 2  ;;  %v1387_v22 = vadd.f32 %v1386_v18, %v1385_v14  ;;  %v1397_v44 = vrot.slane %v1396_v1, 4  ;;  %v1372_v46 = vadd.f32 %v1371_v45, %v1370_v43 }
 0x11b   :  { %v1361_v24 = vadd.f32 %v1360_v21, %v1359_v16  ;;  %v1388_v26 = vrot.slane %v1387_v22, 2  ;;  %v1398_v48 = vadd.f32 %v1397_v44, %v1396_v1  ;;  %v1373_v50 = vrot.slane %v1372_v46, 2  ;;  %v69_v44 = vld [vmem:[%s10414_s4] sm:$0x1] }
 0x11d   :  { %v1362_v29 = vrot.slane %v1361_v24, 1  ;;  %v1389_v30 = vadd.f32 %v1388_v26, %v1387_v22  ;;  %v1399_v49 = vrot.slane %v1398_v48, 2  ;;  %v1374_v17 = vadd.f32 %v1373_v50, %v1372_v46  ;;  %v70_v46 = vld [vmem:[%s10414_s4 + $0x1] sm:$0x1] }
 0x11f   :  { %v1363_v34 = vadd.f32 %v1362_v29, %v1361_v24  ;;  %v1390_v35 = vrot.slane %v1389_v30, 1  ;;  %v1400_v51 = vadd.f32 %v1399_v49, %v1398_v48  ;;  %v1375_v53 = vrot.slane %v1374_v17, 1 }
 0x121   :  { %1413 = vrot.lane.b32.xlu1 %v1363_v34, %s8470_s1  ;;  %1404 = vrot.lane.b32.xlu0 %v1363_v34, %s8471_s26  ;;  %v1391_v42 = vadd.f32 %v1390_v35, %v1389_v30  ;;  %v1401_v52 = vrot.slane %v1400_v51, 1  ;;  %v1376_v56 = vadd.f32 %v1375_v53, %v1374_v17  ;;  %v8175_v17 = vld [vmem:[%s10415_s2 + $0x120] ss:$8 sps:$4 sm:$0xff]   ;;  %v8180_v53 = vld [vmem:[%s10415_s2 + $0x74] ss:$8 sps:$4 sm:$0xff]  }
 0x122   :  { %3193 = vmatprep.subr.bf16.mxu0 %v8180_v53 }
 0x123   :  { %v1402_v54 = vadd.f32 %v1401_v52, %v1400_v51  ;;  %v8177_v51 = vld [vmem:[%s10415_s2 + $0x124] ss:$8 sps:$4 sm:$0xff]   ;;  %v8178_v52 = vld [vmem:[%s10415_s2 + $0x70] ss:$8 sps:$4 sm:$0xff]  }
 0x124   :  { %3024 = vmatprep.subr.bf16.mxu1 %v8177_v51  ;;  %3194 = vmatpush1.bf16.msra.mxu0 %v8178_v52  ;;  %v9020_v52 = vsub.s32 0, %v8574_v25 }
 0x125   :  { %1417 = vrot.lane.b32.xlu1 %v1391_v42, %s8470_s1  ;;  %1421 = vrot.lane.b32.xlu0 %v1363_v34, %s8472_s27 }
 0x126   :  { %3025 = vmatpush1.bf16.msra.mxu1 %v8175_v17 }
 0x129   :  { %1425 = vrot.lane.b32.xlu1 %v1391_v42, %s8472_s27  ;;  %1429 = vrot.lane.b32.xlu0 %v1363_v34, %s8473_s28 }
 0x12d   :  { %1433 = vrot.lane.b32.xlu1 %v1391_v42, %s8473_s28  ;;  %1437 = vrot.lane.b32.xlu0 %v1363_v34, %s8474_s29 }
 0x131   :  { %1441 = vrot.lane.b32.xlu1 %v1391_v42, %s8474_s29  ;;  %1409 = vrot.lane.b32.xlu0 %v1391_v42, %s8471_s26 }
 0x135   :  { %1449 = vrot.lane.b32.xlu1 %v1391_v42, %s8475_s30  ;;  %1445 = vrot.lane.b32.xlu0 %v1363_v34, %s8475_s30 }
 0x139   :  { %1457 = vrot.lane.b32.xlu1 %v1391_v42, %s8476_s8  ;;  %1453 = vrot.lane.b32.xlu0 %v1363_v34, %s8476_s8 }
 0x13d   :  { %1469 = vrot.lane.b32.xlu1 %v1402_v54, %s8471_s26  ;;  %1464 = vrot.lane.b32.xlu0 %v1376_v56, %s8471_s26 }
 0x141   :  { %1477 = vrot.lane.b32.xlu1 %v1402_v54, %s8470_s1  ;;  %1473 = vrot.lane.b32.xlu0 %v1376_v56, %s8470_s1 }
 0x193   :  { %v1414_v57 = vpop.permute.xlu1 %1413  ;;  %v1405_v59 = vpop.permute.xlu0 %1404 }
 0x194   :  { %v1407_v2 = vadd.f32 %v1405_v59, %v1363_v34  ;;  %v8184_v59 = vld [vmem:[%s10415_s2 + $0x60] ss:$8 sps:$4 sm:$0xff]  }
 0x196   :  { %v1416_v5 = vadd.f32 %v1414_v57, %v1407_v2  ;;  %v8186_v57 = vld [vmem:[%s10415_s2 + $0x64] ss:$8 sps:$4 sm:$0xff]   ;;  %v8195_v2 = vld [vmem:[%s10415_s2 + $0xf4] ss:$8 sps:$4 sm:$0xff]  }
 0x197   :  { %v1418_v60 = vpop.permute.xlu1 %1417  ;;  %v1422_v61 = vpop.permute.xlu0 %1421  ;;  %3195 = vmatprep.subr.bf16.mxu0 %v8186_v57 }
 0x198   :  { %v1424_v8 = vadd.f32 %v1422_v61, %v1416_v5  ;;  %3196 = vmatpush1.bf16.msra.mxu0 %v8184_v59  ;;  %v8187_v61 = vld [vmem:[%s10415_s2 + $0x100] ss:$8 sps:$4 sm:$0xff]  }
 0x199   :  { %v8196_v5 = vld [vmem:[%s10415_s2 + $0x40] ss:$8 sps:$4 sm:$0xff]  }
 0x19b   :  { %v1426_v62 = vpop.permute.xlu1 %1425  ;;  %v1430_v0 = vpop.permute.xlu0 %1429 }
 0x19c   :  { %v1432_v10 = vadd.f32 %v1430_v0, %v1424_v8  ;;  %v8190_v0 = vld [vmem:[%s10415_s2 + $0x50] ss:$8 sps:$4 sm:$0xff]  }
 0x19d   :  { %v8202_v8 = vld [vmem:[%s10415_s2 + $0x30] ss:$8 sps:$4 sm:$0xff]  }
 0x19f   :  { %v1434_v27 = vpop.permute.xlu1 %1433  ;;  %v1438_v4 = vpop.permute.xlu0 %1437 }
 0x1a0   :  { %v1440_v14 = vadd.f32 %v1438_v4, %v1432_v10  ;;  %v8198_v4 = vld [vmem:[%s10415_s2 + $0x44] ss:$8 sps:$4 sm:$0xff]   ;;  %v8207_v10 = vld [vmem:[%s10415_s2 + $0xd4] ss:$8 sps:$4 sm:$0xff]  }
 0x1a3   :  { %v1442_v6 = vpop.permute.xlu1 %1441  ;;  %v1410_v7 = vpop.permute.xlu0 %1409 }
 0x1a4   :  { %v1412_v9 = vadd.f32 %v1410_v7, %v1391_v42  ;;  %v8199_v7 = vld [vmem:[%s10415_s2 + $0xe0] ss:$8 sps:$4 sm:$0xff]  }
 0x1a6   :  { %v1420_v11 = vadd.f32 %v1418_v60, %v1412_v9  ;;  %v8189_v60 = vld [vmem:[%s10415_s2 + $0x104] ss:$8 sps:$4 sm:$0xff]   ;;  %v8204_v9 = vld [vmem:[%s10415_s2 + $0x34] ss:$8 sps:$4 sm:$0xff]  }
 0x1a7   :  { %v1450_v12 = vpop.permute.xlu1 %1449  ;;  %v1446_v13 = vpop.permute.xlu0 %1445 }
 0x1a8   :  { %v1428_v16 = vadd.f32 %v1426_v62, %v1420_v11  ;;  %v1448_v21 = vadd.f32 %v1446_v13, %v1440_v14  ;;  %v8192_v62 = vld [vmem:[%s10415_s2 + $0x54] ss:$8 sps:$4 sm:$0xff]   ;;  %v8205_v11 = vld [vmem:[%s10415_s2 + $0xd0] ss:$8 sps:$4 sm:$0xff]   ;;  %v8213_v13 = vld [vmem:[%s10415_s2 + $0xc4] ss:$8 sps:$4 sm:$0xff]  }
 0x1a9   :  { %3197 = vmatprep.subr.bf16.mxu0 %v8192_v62  ;;  %v8208_v14 = vld [vmem:[%s10415_s2 + $0x20] ss:$8 sps:$4 sm:$0xff]  }
 0x1aa   :  { %v1436_v18 = vadd.f32 %v1434_v27, %v1428_v16  ;;  %3198 = vmatpush1.bf16.msra.mxu0 %v8190_v0  ;;  %v8193_v27 = vld [vmem:[%s10415_s2 + $0xf0] ss:$8 sps:$4 sm:$0xff]   ;;  %v8216_v16 = vld [vmem:[%s10415_s2 + $0x14] ss:$8 sps:$4 sm:$0xff]  }
 0x1ab   :  { %v1458_v22 = vpop.permute.xlu1 %1457  ;;  %v1454_v23 = vpop.permute.xlu0 %1453  ;;  %3199 = vmatprep.subr.bf16.mxu0 %v8198_v4 }
 0x1ac   :  { %v1444_v24 = vadd.f32 %v1442_v6, %v1436_v18  ;;  %v1456_v26 = vadd.f32 %v1454_v23, %v1448_v21  ;;  %v8201_v6 = vld [vmem:[%s10415_s2 + $0xe4] ss:$8 sps:$4 sm:$0xff]   ;;  %v8211_v18 = vld [vmem:[%s10415_s2 + $0xc0] ss:$8 sps:$4 sm:$0xff]   ;;  %v8219_v21 = vld [vmem:[%s10415_s2 + $0xb4] ss:$8 sps:$4 sm:$0xff]  }
 0x1ad   :  { %v8222_v23 = vld [vmem:[%s10415_s2 + $0x4] ss:$8 sps:$4 sm:$0xff]  }
 0x1ae   :  { %v1452_v47 = vadd.f32 %v1450_v12, %v1444_v24  ;;  %v1461_v28 = vadd.f32 %v1456_v26, %v1376_v56  ;;  %v8181_v56 = vld [vmem:[%s10415_s2 + $0x110] ss:$8 sps:$4 sm:$0xff]   ;;  %3200 = vmatpush1.bf16.msra.mxu0 %v8196_v5  ;;  %v8210_v12 = vld [vmem:[%s10415_s2 + $0x24] ss:$8 sps:$4 sm:$0xff]   ;;  %v8220_v26 = vld [vmem:[%s10415_s2] ss:$8 sps:$4 sm:$0xff]  }
 0x1af   :  { %v1470_v29 = vpop.permute.xlu1 %1469  ;;  %v1465_v30 = vpop.permute.xlu0 %1464  ;;  %3201 = vmatprep.subr.bf16.mxu0 %v8204_v9  ;;  %v8217_v24 = vld [vmem:[%s10415_s2 + $0xb0] ss:$8 sps:$4 sm:$0xff]  }
 0x1b0   :  { %v1460_v32 = vadd.f32 %v1458_v22, %v1452_v47  ;;  %v1467_v34 = vadd.f32 %v1465_v30, %v1461_v28  ;;  %v8214_v22 = vld [vmem:[%s10415_s2 + $0x10] ss:$8 sps:$4 sm:$0xff]   ;;  %v8225_v47 = vld [vmem:[%s10415_s2 + $0x154] ss:$8 sps:$4 sm:$0xff]   ;;  %v8231_v30 = vld [vmem:[%s10415_s2 + $0x144] ss:$8 sps:$4 sm:$0xff]  }
 0x1b1   :  { %v8223_v28 = vld [vmem:[%s10415_s2 + $0x150] ss:$8 sps:$4 sm:$0xff]  }
 0x1b2   :  { %v1462_v33 = vadd.f32 %v1460_v32, %v1402_v54  ;;  %v8183_v54 = vld [vmem:[%s10415_s2 + $0x114] ss:$8 sps:$4 sm:$0xff]   ;;  %3202 = vmatpush1.bf16.msra.mxu0 %v8202_v8  ;;  %v8226_v32 = vld [vmem:[%s10415_s2 + $0xa0] ss:$8 sps:$4 sm:$0xff]  }
 0x1b3   :  { %v1474_v35 = vpop.permute.xlu0 %1473  ;;  %v1478_v38 = vpop.permute.xlu1 %1477  ;;  %3026 = vmatprep.subr.bf16.mxu1 %v8183_v54  ;;  %3203 = vmatprep.subr.bf16.mxu0 %v8210_v12 }
 0x1b4   :  { %v1472_v36 = vadd.f32 %v1470_v29, %v1462_v33  ;;  %v1476_v37 = vadd.f32 %v1474_v35, %v1467_v34  ;;  %3027 = vmatpush1.bf16.msra.mxu1 %v8181_v56  ;;  %v8228_v29 = vld [vmem:[%s10415_s2 + $0xa4] ss:$8 sps:$4 sm:$0xff]   ;;  %v8234_v33 = vld [vmem:[%s10415_s2 + $0x94] ss:$8 sps:$4 sm:$0xff]   ;;  %v8229_v34 = vld [vmem:[%s10415_s2 + $0x140] ss:$8 sps:$4 sm:$0xff]  }
 0x1b5   :  { %3028 = vmatprep.subr.bf16.mxu1 %v8189_v60  ;;  %v8237_v35 = vld [vmem:[%s10415_s2 + $0x134] ss:$8 sps:$4 sm:$0xff]  }
 0x1b6   :  { %v1480_v39 = vadd.f32 %v1478_v38, %v1472_v36  ;;  %v1482_v40 = vmul.f32 0.004132231, %v1476_v37  ;;  %3204 = vmatpush1.bf16.msra.mxu0 %v8208_v14  ;;  %v8232_v36 = vld [vmem:[%s10415_s2 + $0x90] ss:$8 sps:$4 sm:$0xff]   ;;  %v8240_v37 = vld [vmem:[%s10415_s2 + $0x84] ss:$8 sps:$4 sm:$0xff]  }
 0x1b7   :  { %3205 = vmatprep.subr.bf16.mxu0 %v8216_v16  ;;  %v8235_v38 = vld [vmem:[%s10415_s2 + $0x130] ss:$8 sps:$4 sm:$0xff]  }
 0x1b8   :  { %v1483_v41 = vmul.f32 0.004132231, %v1480_v39  ;;  %v1484_v42 = vmul.f32 %v1482_v40, %v1482_v40  ;;  %3029 = vmatpush1.bf16.msra.mxu1 %v8187_v61  ;;  %v8238_v39 = vld [vmem:[%s10415_s2 + $0x80] ss:$8 sps:$4 sm:$0xff]  }
 0x1b9   :  { %3030 = vmatprep.subr.bf16.mxu1 %v8195_v2 }
 0x1ba   :  { %v1485_v43 = vsub.f32 %v1483_v41, %v1484_v42  ;;  %3206 = vmatpush1.bf16.msra.mxu0 %v8214_v22 }
 0x1bb   :  { %3207 = vmatprep.subr.bf16.mxu0 %v8222_v23 }
 0x1bc   :  { %v1486_v1 = vadd.f32 1e-05, %v1485_v43  ;;  %3031 = vmatpush1.bf16.msra.mxu1 %v8193_v27 }
 0x1bd   :  { %3032 = vmatprep.subr.bf16.mxu1 %v8201_v6 }
 0x1be   :  { %8461 = vrsqrt.f32 %v1486_v1  ;;  %3208 = vmatpush1.bf16.msra.mxu0 %v8220_v26 }
 0x1bf   :  { %3219 = vmatprep.subr.bf16.mxu0 %v8228_v29 }
 0x1c0   :  { %3033 = vmatpush1.bf16.msra.mxu1 %v8199_v7 }
 0x1c1   :  { %3034 = vmatprep.subr.bf16.mxu1 %v8207_v10 }
 0x1c2   :  { %3220 = vmatpush2.bf16.msra.mxu0 %v8226_v32 }
 0x1c3   :  { %3221 = vmatprep.subr.bf16.mxu0 %v8234_v33 }
 0x1c4   :  { %3035 = vmatpush1.bf16.msra.mxu1 %v8205_v11 }
 0x1c5   :  { %3036 = vmatprep.subr.bf16.mxu1 %v8213_v13 }
 0x1c6   :  { %3222 = vmatpush2.bf16.msra.mxu0 %v8232_v36 }
 0x1c7   :  { %3223 = vmatprep.subr.bf16.mxu0 %v8240_v37 }
 0x1c8   :  { %3037 = vmatpush1.bf16.msra.mxu1 %v8211_v18 }
 0x1c9   :  { %3038 = vmatprep.subr.bf16.mxu1 %v8219_v21 }
 0x1ca   :  { %3224 = vmatpush2.bf16.msra.mxu0 %v8238_v39 }
 0x1cb   :  { %v8462_v45 = vpop.eup %8461 }
 0x1cc   :  { %v8841_v48 = vmul.f32 %v8462_v45, %v69_v44  ;;  %3039 = vmatpush1.bf16.msra.mxu1 %v8217_v24 }
 0x1cd   :  { %3050 = vmatprep.subr.bf16.mxu1 %v8225_v47 }
 0x1ce   :  { %v1489_v49 = vmul.f32 %v8841_v48, %v1482_v40  ;;  %1495 = vrot.lane.b32.xlu1 %v8841_v48, %s8475_s30  ;;  %1492 = vrot.lane.b32.xlu0 %v8841_v48, %s8476_s8  ;;  %v8259_v40 = vld [vmem:[%s10415_s2 + $0x1d4] ss:$8 sps:$4 sm:$0xff]  }
 0x1d0   :  { %v8851_v50 = vsub.f32 %v70_v46, %v1489_v49  ;;  %3051 = vmatpush2.bf16.msra.mxu1 %v8223_v28 }
 0x1d1   :  { %3052 = vmatprep.subr.bf16.mxu1 %v8231_v30 }
 0x1d2   :  { %1498 = vrot.lane.b32.xlu0 %v8841_v48, %s8474_s29  ;;  %1527 = vrot.lane.b32.xlu1 %v8851_v50, %s8476_s8 }
 0x1d4   :  { %3053 = vmatpush2.bf16.msra.mxu1 %v8229_v34 }
 0x1d5   :  { %3054 = vmatprep.subr.bf16.mxu1 %v8237_v35 }
 0x1d6   :  { %1501 = vrot.lane.b32.xlu0 %v8841_v48, %s8473_s28  ;;  %1530 = vrot.lane.b32.xlu1 %v8851_v50, %s8475_s30 }
 0x1d8   :  { %3055 = vmatpush2.bf16.msra.mxu1 %v8235_v38 }
 0x1d9   :  { %3832 = vmatprep.subr.bf16.mxu1 %v8259_v40 }
 0x1da   :  { %1504 = vrot.lane.b32.xlu0 %v8841_v48, %s8472_s27  ;;  %1533 = vrot.lane.b32.xlu1 %v8851_v50, %s8474_s29 }
 0x1de   :  { %1507 = vrot.lane.b32.xlu0 %v8841_v48, %s8470_s1  ;;  %1536 = vrot.lane.b32.xlu1 %v8851_v50, %s8473_s28 }
 0x1e2   :  { %1510 = vrot.lane.b32.xlu0 %v8841_v48, %s8471_s26  ;;  %1539 = vrot.lane.b32.xlu1 %v8851_v50, %s8472_s27 }
 0x1e6   :  { %1542 = vrot.lane.b32.xlu0 %v8851_v50, %s8470_s1  ;;  %1545 = vrot.lane.b32.xlu1 %v8851_v50, %s8471_s26 }
 0x240   :  { %v1496_v41 = vpop.permute.xlu1 %1495  ;;  %v1493_v42 = vpop.permute.xlu0 %1492 }
 0x241   :  { %v1514_v51 = vsel %vm1513_vm9, %v8841_v48, %v1493_v42 }
 0x242   :  { %v1516_v17 = vsel %vm1515_vm10, %v1514_v51, %v1496_v41 }
 0x243   :  { %v1562_v61 = vrot.slane %v1516_v17, %v9020_v52 }
 0x244   :  { %v1499_v43 = vpop.permute.xlu0 %1498  ;;  %v1528_v1 = vpop.permute.xlu1 %1527 }
 0x245   :  { %v1517_v56 = vsel %vm1364_vm5, %v1516_v17, %v1499_v43  ;;  %v1548_v57 = vsel %vm1513_vm9, %v8851_v50, %v1528_v1  ;;  %v1564_v6 = vmul.f32 %v1562_v61, %v8803_v19  ;;  %v1566_v7 = vmul.f32 %v1562_v61, %v8801_v15 }
 0x246   :  { %v1568_v12 = vmul.f32 %v1562_v61, %v8805_v20 }
 0x248   :  { %v1502_v44 = vpop.permute.xlu0 %1501  ;;  %v1531_v45 = vpop.permute.xlu1 %1530 }
 0x249   :  { %v1519_v59 = vsel %vm1518_vm11, %v1517_v56, %v1502_v44  ;;  %v1549_v48 = vsel %vm1515_vm10, %v1548_v57, %v1531_v45 }
 0x24a   :  { %v1576_v27 = vrot.slane %v1549_v48, %v9020_v52 }
 0x24c   :  { %v1505_v46 = vpop.permute.xlu0 %1504  ;;  %v1534_v49 = vpop.permute.xlu1 %1533  ;;  %v1578_v13 = vadd.f32 %v1576_v27, %v1564_v6  ;;  %v1580_v14 = vadd.f32 %v1576_v27, %v1566_v7  ;;  %v1582_v22 = vadd.f32 %v1576_v27, %v1568_v12 }
 0x24d   :  { %v1521_v60 = vsel %vm1520_vm12, %v1519_v59, %v1505_v46  ;;  %v1550_v4 = vsel %vm1364_vm5, %v1549_v48, %v1534_v49 }
 0x24e   :  { %v1584_v47 = vmax.f32 %v1578_v13, 0.0  ;;  %v1586_v28 = vmax.f32 %v1580_v14, 0.0  ;;  %v1588_v32 = vmax.f32 %v1582_v22, 0.0 }
 0x250   :  { %v1508_v53 = vpop.permute.xlu0 %1507  ;;  %v1537_v54 = vpop.permute.xlu1 %1536 }
 0x251   :  { %v1523_v25 = vsel %vm1522_vm13, %v1521_v60, %v1508_v53  ;;  %v1551_v50 = vsel %vm1518_vm11, %v1550_v4, %v1537_v54 }
 0x254   :  { %v1511_v62 = vpop.permute.xlu0 %1510  ;;  %v1540_v0 = vpop.permute.xlu1 %1539 }
 0x255   :  { %v1525_v2 = vsel %vm1524_vm14, %v1523_v25, %v1511_v62  ;;  %v1552_v8 = vsel %vm1520_vm12, %v1551_v50, %v1540_v0 }
 0x256   :  { %v1558_v5 = vrot.slane %v1525_v2, %v9020_v52 }
 0x258   :  { %v1543_v9 = vpop.permute.xlu0 %1542  ;;  %v1546_v10 = vpop.permute.xlu1 %1545  ;;  %v1563_v18 = vmul.f32 %v1558_v5, %v8786_v58  ;;  %v1565_v21 = vmul.f32 %v1558_v5, %v8784_v55  ;;  %v1567_v19 = vmul.f32 %v1558_v5, %v8790_v63 }
 0x259   :  { %v1553_v11 = vsel %vm1522_vm13, %v1552_v8, %v1543_v9 }
 0x25a   :  { %v1554_v16 = vsel %vm1524_vm14, %v1553_v11, %v1546_v10 }
 0x25b   :  { %v1572_v15 = vrot.slane %v1554_v16, %v9020_v52 }
 0x25d   :  { %v1577_v23 = vadd.f32 %v1572_v15, %v1563_v18  ;;  %v1579_v24 = vadd.f32 %v1572_v15, %v1565_v21  ;;  %v1581_v26 = vadd.f32 %v1572_v15, %v1567_v19 }
 0x25f   :  { %v1583_v29 = vmax.f32 %v1577_v23, 0.0  ;;  %v1585_v20 = vmax.f32 %v1579_v24, 0.0  ;;  %v1587_v30 = vmax.f32 %v1581_v26, 0.0 }
 0x261   :  { %v1595_v33 = vcombine.low %v1583_v29, %v1584_v47  ;;  %v1596_v34 = vcombine.high %v1583_v29, %v1584_v47  ;;  %v1645_v35 = vcombine.low %v1585_v20, %v1586_v28  ;;  %v1646_v58 = vcombine.high %v1585_v20, %v1586_v28 }
 0x262   :  { %v1695_v36 = vcombine.low %v1587_v30, %v1588_v32  ;;  %v1696_v55 = vcombine.high %v1587_v30, %v1588_v32 }
 0x263   :  { %v1603_v63 = vrot.slane %v1595_v33, %v8592_v31  ;;  %v1610_v37 = vrot.slane %v1596_v34, %v8592_v31  ;;  %v1653_v38 = vrot.slane %v1645_v35, %v8592_v31  ;;  %v1660_v39 = vrot.slane %v1646_v58, %v8592_v31 }
 0x264   :  { %v1703_v40 = vrot.slane %v1695_v36, %v8592_v31  ;;  %v9051_v41 = vrot.slane %v1696_v55, %v8592_v31 }
 0x265   :  { %v1611_v42 = vcombine.high %v1603_v63, %v1603_v63  ;;  %v1612_v43 = vcombine.high %v1610_v37, %v1610_v37  ;;  %v1619_v1 = vrot.slane %v1603_v63, %v8592_v31  ;;  %v1661_v44 = vcombine.high %v1653_v38, %v1653_v38 }
 0x266   :  { %v1662_v45 = vcombine.high %v1660_v39, %v1660_v39  ;;  %v1669_v46 = vrot.slane %v1653_v38, %v8592_v31  ;;  %v1676_v49 = vrot.slane %v1660_v39, %v8592_v31  ;;  %v1711_v53 = vcombine.high %v1703_v40, %v1703_v40 }
 0x267   :  { %v1633_v51 = vrot.slane %v1611_v42, %v8592_v31  ;;  %v1640_v17 = vrot.slane %v1612_v43, %v8592_v31  ;;  %v1712_v54 = vcombine.high %v9051_v41, %v9051_v41  ;;  %v1626_v56 = vrot.slane %v1610_v37, %v8592_v31 }
 0x268   :  { %v1683_v57 = vrot.slane %v1661_v44, %v8592_v31  ;;  %v1690_v59 = vrot.slane %v1662_v45, %v8592_v31  ;;  %v1691_v48 = vcombine.high %v1669_v46, %v1669_v46  ;;  %v1692_v60 = vcombine.high %v1676_v49, %v1676_v49 }
 0x269   :  { %v1719_v61 = vrot.slane %v1703_v40, %v8592_v31  ;;  %v1726_v25 = vrot.slane %v9051_v41, %v8592_v31  ;;  %v1733_v62 = vrot.slane %v1711_v53, %v8592_v31  ;;  %v1740_v2 = vrot.slane %v1712_v54, %v8592_v31 }
 0x26a   :  { %v1693_v0 = vcombine.high %v1683_v57, %v1683_v57  ;;  %v1743_v27 = vcombine.low %v1619_v1, %v1633_v51  ;;  %v7829_v4 = vcombine.high %v1619_v1, %v1633_v51  ;;  %v1694_v50 = vcombine.high %v1690_v59, %v1690_v59 }
 0x26b   :  { %v1741_v5 = vcombine.high %v1719_v61, %v1719_v61  ;;  %v1745_v6 = vcombine.low %v1626_v56, %v1640_v17  ;;  %v7830_v7 = vcombine.high %v1626_v56, %v1640_v17  ;;  %v1801_v10 = vcombine.low %v1669_v46, %v1683_v57 }
 0x26c   :  { %v1752_v8 = vrot.slane %v1743_v27, %v8592_v31  ;;  %v1759_v9 = vrot.slane %v7829_v4, %v8592_v31  ;;  %v1822_v11 = vrot.slane %v1691_v48, %v8592_v31  ;;  %v1742_v12 = vcombine.high %v1733_v62, %v1733_v62 }
 0x26d   :  { %v1766_v13 = vrot.slane %v1745_v6, %v8592_v31  ;;  %v1808_v14 = vrot.slane %v7830_v7, %v8592_v31  ;;  %v1856_v16 = vcombine.low %v1693_v0, %v1676_v49  ;;  %v1815_v21 = vrot.slane %v1801_v10, %v8592_v31 }
 0x26e   :  { %v1767_v18 = vcombine.low %v1752_v8, %v1752_v8  ;;  %v1825_v19 = vcombine.high %v1822_v11, %v1822_v11  ;;  %v1857_v15 = vcombine.low %v1690_v59, %v1692_v60  ;;  %v1783_v24 = vrot.slane %v1752_v8, %v8592_v31 }
 0x26f   :  { %v1768_v22 = vcombine.low %v1759_v9, %v1766_v13  ;;  %v1769_v23 = vcombine.high %v1759_v9, %v1766_v13  ;;  %v1858_v26 = vcombine.low %v1694_v50, %v1719_v61  ;;  %v1823_v28 = vcombine.low %v1808_v14, %v1815_v21 }
 0x270   :  { %v1776_v47 = vrot.slane %v1767_v18, %v8592_v31  ;;  %v1824_v29 = vcombine.high %v1808_v14, %v1815_v21  ;;  %v1846_v20 = vrot.slane %v1822_v11, %v8592_v31  ;;  %v1853_v33 = vrot.slane %v1825_v19, %v8592_v31 }
 0x271   :  { %v1790_v30 = vrot.slane %v1768_v22, %v8592_v31  ;;  %v1797_v32 = vrot.slane %v1769_v23, %v8592_v31  ;;  %v1865_v34 = vrot.slane %v1856_v16, %v8592_v31  ;;  %v1832_v35 = vrot.slane %v1823_v28, %v8592_v31 }
 0x272   :  { %v1839_v58 = vrot.slane %v1824_v29, %v8592_v31  ;;  %v1872_v36 = vrot.slane %v1857_v15, %v8592_v31  ;;  %v1879_v55 = vrot.slane %v1858_v26, %v8592_v31  ;;  %v1913_v39 = vcombine.low %v1733_v62, %v1741_v5 }
 0x273   :  { %v1798_v63 = vcombine.low %v1776_v47, %v1790_v30  ;;  %v1799_v37 = vcombine.low %v1783_v24, %v1797_v32  ;;  %v1880_v38 = vcombine.low %v1865_v34, %v1865_v34  ;;  %v1854_v40 = vcombine.low %v1832_v35, %v1846_v20 }
 0x274   :  { %v1855_v41 = vcombine.low %v1839_v58, %v1853_v33  ;;  %v1881_v42 = vcombine.low %v1872_v36, %v1879_v55  ;;  %v1882_v43 = vcombine.high %v1872_v36, %v1879_v55  ;;  %v1914_v44 = vcombine.low %v1742_v12, %v1726_v25 }
 0x275   :  { %v1889_v1 = vrot.slane %v1880_v38, %v8592_v31  ;;  %v1935_v45 = vrot.slane %v1740_v2, %v8592_v31  ;;  %1977 = vst [vmem:[#allocation3] sm:$0xfc] %v1798_v63  ;;  %1979 = vst.msk [vmem:[#allocation3 + $0x8] sm:$0xfc] %vm1978_vm15, %v1799_v37  ;;  %v1896_v46 = vrot.slane %v1865_v34, %v8592_v31 }
 0x276   :  { %v1903_v49 = vrot.slane %v1881_v42, %v8592_v31  ;;  %v1910_v51 = vrot.slane %v1882_v43, %v8592_v31  ;;  %1980 = vst [vmem:[#allocation3 + $0x10] sm:$0x1f] %v1854_v40  ;;  %1982 = vst.msk [vmem:[#allocation3 + $0x18] sm:$0x1f] %vm1981_vm0, %v1855_v41  ;;  %v1921_v17 = vrot.slane %v1913_v39, %v8592_v31 }
 0x277   :  { %v1928_v53 = vrot.slane %v1914_v44, %v8592_v31  ;;  %v1938_v54 = vcombine.high %v1935_v45, %v1935_v45  ;;  %v1959_v25 = vrot.slane %v1935_v45, %v8592_v31 }
 0x278   :  { %v1911_v56 = vcombine.low %v1889_v1, %v1903_v49  ;;  %v1912_v57 = vcombine.low %v1896_v46, %v1910_v51 }
 0x279   :  { %v1936_v59 = vcombine.low %v1921_v17, %v1928_v53  ;;  %v1937_v48 = vcombine.high %v1921_v17, %v1928_v53  ;;  %v1966_v62 = vrot.slane %v1938_v54, %v8592_v31 }
 0x27a   :  { %1983 = vst [vmem:[#allocation3 + $0x20] sm:$0xfc] %v1911_v56  ;;  %1984 = vst.msk [vmem:[#allocation3 + $0x28] sm:$0xfc] %vm1978_vm15, %v1912_v57 }
 0x27b   :  { %v1945_v60 = vrot.slane %v1936_v59, %v8592_v31  ;;  %v1952_v61 = vrot.slane %v1937_v48, %v8592_v31 }
 0x27c   :  { %v8243_v0 = vld [vmem:[#allocation3 + $0x4] ss:$8 sps:$4 sm:$0xff]   ;;  %v8241_v50 = vld [vmem:[#allocation3] ss:$8 sps:$4 sm:$0xee]  }
 0x27d   :  { %v1967_v2 = vcombine.low %v1945_v60, %v1959_v25  ;;  %v1968_v27 = vcombine.low %v1952_v61, %v1966_v62  ;;  %v8244_v4 = vld [vmem:[#allocation3 + $0x10] ss:$8 sps:$4 sm:$0xff]   ;;  %v2471_v5 = vrot.slane %v8243_v0, %v8592_v31  ;;  %v8246_v6 = vld [vmem:[#allocation3 + $0x14] ss:$8 sps:$4 sm:$0x33]   ;;  %v2464_v8 = vrot.slane %v8241_v50, %v8592_v31 }
 0x27e   :  { %v2514_v7 = vrot.slane %v8244_v4, %v8592_v31  ;;  %v2521_v11 = vrot.slane %v8246_v6, %v8592_v31  ;;  %v8249_v26 = vld [vmem:[#allocation3] ss:$8 sps:$4 sm:$0xff]   ;;  %v8251_v47 = vld [vmem:[#allocation3 + $0x4] ss:$8 sps:$4 sm:$0xff]   ;;  %v8252_v32 = vld [vmem:[#allocation3 + $0x10] ss:$8 sps:$4 sm:$0xff]  }
 0x27f   :  { %1985 = vst [vmem:[#allocation3 + $0x30] sm:$0x1f] %v1967_v2  ;;  %1986 = vst.msk [vmem:[#allocation3 + $0x38] sm:$0x1f] %vm1981_vm0, %v1968_v27  ;;  %v2473_v9 = vcombine.high %v2471_v5, %v2471_v5  ;;  %v2487_v10 = vrot.slane %v2471_v5, %v8592_v31  ;;  %v2472_v14 = vcombine.high %v2464_v8, %v2464_v8 }
 0x280   :  { %v2522_v12 = vcombine.high %v2514_v7, %v2514_v7  ;;  %v2530_v13 = vrot.slane %v2514_v7, %v8592_v31  ;;  %v2480_v16 = vrot.slane %v2464_v8, %v8592_v31  ;;  %v2523_v15 = vcombine.high %v2521_v11, %v2521_v11  ;;  %v8254_v61 = vld [vmem:[#allocation3 + $0x14] ss:$8 sps:$4 sm:$0x11]  }
 0x281   :  { %v2501_v18 = vrot.slane %v2473_v9, %v8592_v31  ;;  %v2503_v21 = vcombine.high %v2487_v10, %v2487_v10  ;;  %v8247_v19 = vld [vmem:[#allocation3 + $0x20] ss:$8 sps:$4 sm:$0xee]   ;;  %v2537_v22 = vrot.slane %v2521_v11, %v8592_v31  ;;  %v2494_v28 = vrot.slane %v2472_v14, %v8592_v31 }
 0x282   :  { %v2544_v23 = vrot.slane %v2522_v12, %v8592_v31  ;;  %v2552_v24 = vcombine.high %v2530_v13, %v2530_v13  ;;  %v2502_v29 = vcombine.high %v2480_v16, %v2480_v16  ;;  %v2562_v30 = vrot.slane %v8247_v19, %v8592_v31  ;;  %v8255_v27 = vld [vmem:[#allocation3 + $0x20] ss:$8 sps:$4 sm:$0xff]  }
 0x283   :  { %v2505_v20 = vcombine.high %v2501_v18, %v2501_v18  ;;  %v2551_v33 = vrot.slane %v2523_v15, %v8592_v31  ;;  %v2654_v35 = vcombine.low %v2501_v18, %v2503_v21  ;;  %v2504_v36 = vcombine.high %v2494_v28, %v2494_v28 }
 0x284   :  { %v2553_v34 = vcombine.high %v2544_v23, %v2544_v23  ;;  %v2718_v58 = vcombine.low %v2544_v23, %v2552_v24  ;;  %v2570_v55 = vcombine.high %v2562_v30, %v2562_v30  ;;  %v2578_v63 = vrot.slane %v2562_v30, %v8592_v31 }
 0x285   :  { %v2652_v37 = vcombine.low %v2494_v28, %v2502_v29  ;;  %v2655_v38 = vcombine.low %v2505_v20, %v2530_v13  ;;  %v9115_v39 = vrot.slane %v2654_v35, %v8592_v31  ;;  %v2653_v43 = vcombine.low %v2504_v36, %v2487_v10 }
 0x286   :  { %v2719_v40 = vcombine.low %v2553_v34, %v2537_v22  ;;  %v9118_v41 = vrot.slane %v2718_v58, %v8592_v31  ;;  %v2592_v42 = vrot.slane %v2570_v55, %v8592_v31  ;;  %v2013_v44 = vrot.slane %v8249_v26, %v8592_v31 }
 0x287   :  { %v2662_v1 = vrot.slane %v2652_v37, %v8592_v31  ;;  %v9124_v45 = vrot.slane %v2655_v38, %v8592_v31  ;;  %v2020_v49 = vrot.slane %v8251_v47, %v8592_v31  ;;  %v2063_v51 = vrot.slane %v8252_v32, %v8592_v31 }
 0x288   :  { %v9127_v46 = vrot.slane %v2719_v40, %v8592_v31  ;;  %v2669_v17 = vrot.slane %v2653_v43, %v8592_v31  ;;  %v2720_v53 = vcombine.low %v2551_v33, %v2592_v42  ;;  %v7834_v54 = vcombine.high %v2578_v63, %v2592_v42 }
 0x289   :  { %v2021_v56 = vcombine.high %v2013_v44, %v2013_v44  ;;  %v2686_v57 = vcombine.low %v9115_v39, %v9124_v45  ;;  %v2687_v59 = vcombine.high %v9115_v39, %v9124_v45  ;;  %v2022_v5 = vcombine.high %v2020_v49, %v2020_v49 }
 0x28a   :  { %v2750_v48 = vcombine.low %v9118_v41, %v9127_v46  ;;  %v2751_v60 = vcombine.high %v9118_v41, %v9127_v46  ;;  %v2684_v25 = vcombine.low %v2662_v1, %v2669_v17  ;;  %v2685_v62 = vcombine.high %v2662_v1, %v2669_v17  ;;  %v2444_v46 = vld [vmem:[#allocation3 + $0x20] sm:$0xfe] }
 0x28b   :  { %v2742_v0 = vrot.slane %v2720_v53, %v8592_v31  ;;  %v2749_v2 = vrot.slane %v7834_v54, %v8592_v31  ;;  %v2715_v4 = vrot.slane %v2687_v59, %v8592_v31  ;;  %v2029_v6 = vrot.slane %v2013_v44, %v8592_v31 }
 0x28c   :  { %v2767_v50 = vrot.slane %v2751_v60, %v8592_v31  ;;  %v2701_v7 = vrot.slane %v2685_v62, %v8592_v31  ;;  %v2036_v10 = vrot.slane %v2020_v49, %v8592_v31  ;;  %v2043_v11 = vrot.slane %v2021_v56, %v8592_v31  ;;  %v2445_v49 = vld [vmem:[#allocation3 + $0x28] sm:$0xfe]  ;;  %v8262_v62 = vld [vmem:[#allocation3 + $0x34] ss:$8 sps:$4 sm:$0x33]  }
 0x28d   :  { %v2752_v8 = vcombine.low %v2742_v0, %v2749_v2  ;;  %v2753_v9 = vcombine.high %v2742_v0, %v2749_v2  ;;  %v2050_v12 = vrot.slane %v2022_v5, %v8592_v31  ;;  %v2070_v13 = vrot.slane %v8254_v61, %v8592_v31 }
 0x28e   :  { %v2071_v14 = vcombine.high %v2063_v51, %v2063_v51  ;;  %v2717_v16 = vcombine.low %v2701_v7, %v2715_v4  ;;  %v2078_v21 = vrot.slane %v2063_v51, %v8592_v31  ;;  %v2103_v19 = vrot.slane %v8255_v27, %v8592_v31 }
 0x28f   :  { %v2781_v18 = vrot.slane %v2753_v9, %v8592_v31  ;;  %v2085_v15 = vrot.slane %v2070_v13, %v8592_v31  ;;  %v2185_v23 = vcombine.low %v2029_v6, %v2043_v11  ;;  %v7831_v24 = vcombine.high %v2029_v6, %v2043_v11 }
 0x290   :  { %v2092_v22 = vrot.slane %v2071_v14, %v8592_v31  ;;  %v2111_v47 = vcombine.high %v2103_v19, %v2103_v19  ;;  %v2119_v28 = vrot.slane %v2103_v19, %v8592_v31  ;;  %v2187_v29 = vcombine.low %v2036_v10, %v2050_v12 }
 0x291   :  { %v2783_v26 = vcombine.low %v2767_v50, %v2781_v18  ;;  %v7832_v20 = vcombine.high %v2036_v10, %v2050_v12  ;;  %v2195_v30 = vrot.slane %v2185_v23, %v8592_v31  ;;  %v2202_v32 = vrot.slane %v7831_v24, %v8592_v31  ;;  %v8263_v50 = vld [vmem:[#allocation3 + $0x24] ss:$8 sps:$4 sm:$0xff]   ;;  %v8264_v23 = vld [vmem:[#allocation3 + $0x30] ss:$8 sps:$4 sm:$0xff]  }
 0x292   :  { %v2251_v33 = vcombine.low %v2078_v21, %v2092_v22  ;;  %v9159_v35 = vrot.slane %v2111_v47, %v8592_v31  ;;  %v2141_v58 = vcombine.high %v2119_v28, %v2119_v28  ;;  %v2209_v36 = vrot.slane %v2187_v29, %v8592_v31  ;;  %v8269_v18 = vld [vmem:[%s10415_s2 + $0x1c4] ss:$8 sps:$4 sm:$0xff]   ;;  %v8266_v24 = vld [vmem:[#allocation3 + $0x34] ss:$8 sps:$4 sm:$0x11]  }
 0x293   :  { %v2882_v34 = vpack.c.bf16 %v2783_v26, %v2717_v16  ;;  %v2216_v55 = vrot.slane %v7832_v20, %v8592_v31  ;;  %v2217_v63 = vcombine.low %v2195_v30, %v2202_v32  ;;  %v2218_v37 = vcombine.high %v2195_v30, %v2202_v32 }
 0x294   :  { %v7833_v38 = vcombine.high %v2078_v21, %v2092_v22  ;;  %v2253_v39 = vcombine.low %v2085_v15, %v2119_v28  ;;  %v2254_v40 = vcombine.low %v9159_v35, %v2141_v58  ;;  %v2261_v41 = vrot.slane %v2251_v33, %v8592_v31 }
 0x295   :  { %7881 = vmatprep.mubr.msk.bf16.mxu1 %vm1364_vm5, %v2882_v34  ;;  %v2694_v42 = vrot.slane %v2684_v25, %v8592_v31  ;;  %v2219_v43 = vcombine.low %v2209_v36, %v2216_v55  ;;  %v2220_v1 = vcombine.high %v2209_v36, %v2216_v55  ;;  %v2234_v44 = vrot.slane %v2218_v37, %v8592_v31  ;;  %v8260_v25 = vld [vmem:[#allocation3 + $0x30] ss:$8 sps:$4 sm:$0xff]   ;;  %v8267_v34 = vld [vmem:[%s10415_s2 + $0x1c0] ss:$8 sps:$4 sm:$0xff]   ;;  %v8272_v37 = vld [vmem:[%s10415_s2 + $0x1b4] ss:$8 sps:$4 sm:$0xff]  }
 0x296   :  { %v2268_v45 = vrot.slane %v7833_v38, %v8592_v31  ;;  %v2275_v51 = vrot.slane %v2253_v39, %v8592_v31  ;;  %v2282_v17 = vrot.slane %v2254_v40, %v8592_v31  ;;  %v2708_v53 = vrot.slane %v2686_v57, %v8592_v31 }
 0x297   :  { %v2760_v54 = vrot.slane %v2750_v48, %v8592_v31  ;;  %v2248_v56 = vrot.slane %v2220_v1, %v8592_v31  ;;  %v2774_v61 = vrot.slane %v2752_v8, %v8592_v31  ;;  %v2227_v4 = vrot.slane %v2217_v63, %v8592_v31  ;;  %v8257_v8 = vld [vmem:[%s10415_s2 + $0x1d0] ss:$8 sps:$4 sm:$0xff]  }
 0x298   :  { %v2283_v59 = vcombine.low %v2261_v41, %v2268_v45  ;;  %v2284_v60 = vcombine.high %v2261_v41, %v2268_v45  ;;  %v2285_v0 = vcombine.low %v2275_v51, %v2282_v17  ;;  %v2286_v2 = vcombine.high %v2275_v51, %v2282_v17  ;;  %v8270_v17 = vld [vmem:[%s10415_s2 + $0x1b0] ss:$8 sps:$4 sm:$0xff]  }
 0x299   :  { %v2716_v27 = vcombine.low %v2694_v42, %v2708_v53  ;;  %v2250_v5 = vcombine.low %v2234_v44, %v2248_v56  ;;  %v2782_v57 = vcombine.low %v2760_v54, %v2774_v61  ;;  %v2241_v48 = vrot.slane %v2219_v43, %v8592_v31 }
 0x29a   :  { %v2300_v6 = vrot.slane %v2284_v60, %v8592_v31  ;;  %v2314_v7 = vrot.slane %v2286_v2, %v8592_v31  ;;  %v2293_v9 = vrot.slane %v2283_v59, %v8592_v31  ;;  %v2307_v10 = vrot.slane %v2285_v0, %v8592_v31  ;;  %v8284_v59 = vld [vmem:[%s10415_s2 + $0x1a4] ss:$8 sps:$4 sm:$0xff]  }
 0x29b   :  { %v2555_v11 = vcombine.high %v2444_v46, %v2445_v49  ;;  %v2881_v12 = vpack.c.bf16 %v2782_v57, %v2716_v27  ;;  %v2249_v13 = vcombine.low %v2227_v4, %v2241_v48  ;;  %v2612_v14 = vrot.slane %v8260_v25, %v8592_v31  ;;  %v8282_v57 = vld [vmem:[%s10415_s2 + $0x1a0] ss:$8 sps:$4 sm:$0xff]  }
 0x29c   :  { %v2619_v16 = vrot.slane %v8262_v62, %v8592_v31  ;;  %v2316_v21 = vcombine.low %v2300_v6, %v2314_v7  ;;  %v2315_v19 = vcombine.low %v2293_v9, %v2307_v10  ;;  %v2110_v22 = vrot.slane %v8263_v50, %v8592_v31  ;;  %v8273_v10 = vld [vmem:[#allocation3] ss:$8 sps:$4 sm:$0xcc]  }
 0x29d   :  { %v2569_v15 = vrot.slane %v2555_v11, %v8592_v31  ;;  %3057 = vmatmul.mubr.bf16.vlgmr.msra.gmra.mxu1 %v2881_v12  ;;  %v2620_v26 = vcombine.high %v2612_v14, %v2612_v14  ;;  %v2628_v28 = vrot.slane %v2612_v14, %v8592_v31  ;;  %v2143_v39 = vcombine.high %v9159_v35, %v9159_v35  ;;  %v8287_v11 = vld [vmem:[%s10415_s2 + $0x194] ss:$8 sps:$4 sm:$0xff]  }
 0x29e   :  { %v2621_v47 = vcombine.high %v2619_v16, %v2619_v16  ;;  %v2635_v29 = vrot.slane %v2619_v16, %v8592_v31  ;;  %v2415_v20 = vpack.c.bf16 %v2316_v21, %v2250_v5  ;;  %v2414_v30 = vpack.c.bf16 %v2315_v19, %v2249_v13  ;;  %3833 = vmatpush1.bf16.msra.mxu1 %v8257_v8 }
 0x29f   :  { %v2571_v32 = vcombine.high %v2569_v15, %v2569_v15  ;;  %v2585_v33 = vrot.slane %v2569_v15, %v8592_v31  ;;  %v2642_v58 = vrot.slane %v2620_v26, %v8592_v31  ;;  %v2112_v55 = vcombine.high %v2110_v22, %v2110_v22  ;;  %3834 = vmatprep.subr.bf16.mxu1 %v8269_v18 }
 0x2a0   :  { %v2649_v36 = vrot.slane %v2621_v47, %v8592_v31  ;;  %v2126_v63 = vrot.slane %v2110_v22, %v8592_v31  ;;  %7905 = vmatprep.mubr.msk.bf16.mxu0 %vm1364_vm5, %v2415_v20  ;;  %v2153_v40 = vrot.slane %v8264_v23, %v8592_v31  ;;  %v2160_v41 = vrot.slane %v8266_v24, %v8592_v31  ;;  %v8275_v47 = vld [vmem:[#allocation3 + $0x4] ss:$8 sps:$4 sm:$0xff]  }
 0x2a1   :  { %v2599_v38 = vrot.slane %v2571_v32, %v8592_v31  ;;  %3226 = vmatmul.mubr.bf16.vlgmr.msra.gmra.mxu0 %v2414_v30  ;;  %v2786_v42 = vcombine.low %v2628_v28, %v2642_v58  ;;  %v7836_v43 = vcombine.high %v2628_v28, %v2642_v58  ;;  %v2140_v44 = vrot.slane %v2112_v55, %v8592_v31  ;;  %v8276_v32 = vld [vmem:[#allocation3 + $0x10] ss:$8 sps:$4 sm:$0xff]  }
 0x2a2   :  { %v2850_v1 = vcombine.low %v2635_v29, %v2649_v36  ;;  %v2142_v49 = vcombine.high %v2126_v63, %v2126_v63  ;;  %v2161_v51 = vcombine.high %v2153_v40, %v2153_v40  ;;  %3835 = vmatpush1.bf16.msra.mxu1 %v8267_v34  ;;  %v2168_v25 = vrot.slane %v2153_v40, %v8592_v31 }
 0x2a3   :  { %v2784_v45 = vcombine.low %v2585_v33, %v2599_v38  ;;  %v7835_v46 = vcombine.high %v2585_v33, %v2599_v38  ;;  %v2808_v35 = vrot.slane %v2786_v42, %v8592_v31  ;;  %v2815_v53 = vrot.slane %v7836_v43, %v8592_v31  ;;  %3836 = vmatprep.subr.bf16.mxu1 %v8272_v37  ;;  %v8285_v33 = vld [vmem:[%s10415_s2 + $0x190] ss:$8 sps:$4 sm:$0xff]  }
 0x2a4   :  { %v9216_v54 = vrot.slane %v2850_v1, %v8592_v31  ;;  %v2144_v56 = vcombine.high %v2140_v44, %v2140_v44  ;;  %v2182_v2 = vrot.slane %v2161_v51, %v8592_v31  ;;  %v2317_v27 = vcombine.low %v2143_v39, %v2126_v63  ;;  %v8290_v63 = vld [vmem:[%s10415_s2 + $0x184] ss:$8 sps:$4 sm:$0xff]  }
 0x2a5   :  { %v2794_v60 = vrot.slane %v2784_v45, %v8592_v31  ;;  %v2801_v61 = vrot.slane %v7835_v46, %v8592_v31  ;;  %v2819_v62 = vcombine.high %v2808_v35, %v2815_v53  ;;  %v2183_v50 = vcombine.high %v2168_v25, %v2168_v25  ;;  %v8279_v45 = vld [vmem:[#allocation3 + $0x20] ss:$8 sps:$4 sm:$0xcc]  }
 0x2a6   :  { %v2858_v0 = vcombine.high %v9216_v54, %v9216_v54  ;;  %v2318_v5 = vcombine.low %v2140_v44, %v2142_v49  ;;  %v2319_v6 = vcombine.low %v2144_v56, %v2168_v25  ;;  %3837 = vmatpush1.bf16.msra.mxu1 %v8270_v17  ;;  %v2175_v7 = vrot.slane %v2160_v41, %v8592_v31  ;;  %v8278_v41 = vld [vmem:[#allocation3 + $0x14] ss:$8 sps:$4 sm:$0x77]  }
 0x2a7   :  { %v2817_v4 = vcombine.high %v2794_v60, %v2801_v61  ;;  %v2847_v48 = vrot.slane %v2819_v62, %v8592_v31  ;;  %v2184_v8 = vcombine.high %v2182_v2, %v2182_v2  ;;  %v2327_v9 = vrot.slane %v2317_v27, %v8592_v31  ;;  %3838 = vmatprep.subr.bf16.mxu1 %v8284_v59 }
 0x2a8   :  { %v2320_v13 = vcombine.low %v2182_v2, %v2183_v50  ;;  %v2334_v14 = vrot.slane %v2318_v5, %v8592_v31  ;;  %v2341_v16 = vrot.slane %v2319_v6, %v8592_v31  ;;  %v2872_v18 = vrot.slane %v2858_v0, %v8592_v31  ;;  %v8293_v5 = vld [vmem:[%s10415_s2 + $0x174] ss:$8 sps:$4 sm:$0xff]  }
 0x2a9   :  { %v2833_v12 = vrot.slane %v2817_v4, %v8592_v31  ;;  %v2383_v21 = vcombine.low %v2184_v8, %v2175_v7  ;;  %v2816_v19 = vcombine.low %v2794_v60, %v2801_v61  ;;  %v2818_v15 = vcombine.low %v2808_v35, %v2815_v53  ;;  %v8281_v35 = vld [vmem:[#allocation3 + $0x24] ss:$8 sps:$4 sm:$0xff]   ;;  %v8288_v53 = vld [vmem:[%s10415_s2 + $0x180] ss:$8 sps:$4 sm:$0xff]   ;;  %v8291_v8 = vld [vmem:[%s10415_s2 + $0x170] ss:$8 sps:$4 sm:$0xff]  }
 0x2aa   :  { %v2348_v23 = vrot.slane %v2320_v13, %v8592_v31  ;;  %v2350_v24 = vcombine.high %v2327_v9, %v2334_v14  ;;  %v2349_v26 = vcombine.low %v2327_v9, %v2334_v14  ;;  %3839 = vmatpush1.bf16.msra.mxu1 %v8282_v57  ;;  %v3270_v30 = vrot.slane %v8273_v10, %v8592_v31  ;;  %v8296_v13 = vld [vmem:[%s10415_s2 + $0x164] ss:$8 sps:$4 sm:$0xff]  }
 0x2ab   :  { %v2849_v22 = vcombine.low %v2833_v12, %v2847_v48  ;;  %v2390_v28 = vrot.slane %v2383_v21, %v8592_v31  ;;  %v2826_v29 = vrot.slane %v2816_v19, %v8592_v31  ;;  %v2840_v20 = vrot.slane %v2818_v15, %v8592_v31  ;;  %3840 = vmatprep.subr.bf16.mxu1 %v8287_v11 }
 0x2ac   :  { %v2352_v58 = vcombine.high %v2341_v16, %v2348_v23  ;;  %v2366_v36 = vrot.slane %v2350_v24, %v8592_v31  ;;  %v2351_v55 = vcombine.low %v2341_v16, %v2348_v23  ;;  %v2865_v39 = vrot.slane %v9216_v54, %v8592_v31 }
 0x2ad   :  { %v2884_v34 = vpack.c.bf16 %v2872_v18, %v2849_v22  ;;  %v2391_v37 = vcombine.high %v2390_v28, %v2390_v28  ;;  %v2848_v38 = vcombine.low %v2826_v29, %v2840_v20  ;;  %v2359_v40 = vrot.slane %v2349_v26, %v8592_v31  ;;  %v8294_v29 = vld [vmem:[%s10415_s2 + $0x160] ss:$8 sps:$4 sm:$0xff]  }
 0x2ae   :  { %v2380_v42 = vrot.slane %v2352_v58, %v8592_v31  ;;  %v2373_v43 = vrot.slane %v2351_v55, %v8592_v31  ;;  %v3277_v1 = vrot.slane %v8275_v47, %v8592_v31  ;;  %v3278_v44 = vcombine.high %v3270_v30, %v3270_v30  ;;  %3841 = vmatpush1.bf16.msra.mxu1 %v8285_v33  ;;  %v8306_v58 = vld [vmem:[#allocation3 + $0x30] ss:$8 sps:$4 sm:$0xff]  }
 0x2af   :  { %7882 = vmatprep.mubr.msk.bf16.mxu1 %vm1364_vm5, %v2884_v34  ;;  %v2405_v46 = vrot.slane %v2391_v37, %v8592_v31  ;;  %v2883_v49 = vpack.c.bf16 %v2865_v39, %v2848_v38  ;;  %v2398_v51 = vrot.slane %v2390_v28, %v8592_v31  ;;  %v3320_v17 = vrot.slane %v8276_v32, %v8592_v31  ;;  %v8299_v34 = vld [vmem:[%s10415_s2 + $0x204] ss:$8 sps:$4 sm:$0xff]  }
 0x2b0   :  { %v2382_v54 = vcombine.low %v2366_v36, %v2380_v42  ;;  %v2381_v56 = vcombine.low %v2359_v40, %v2373_v43  ;;  %v3279_v59 = vcombine.high %v3277_v1, %v3277_v1  ;;  %v3286_v60 = vrot.slane %v3270_v30, %v8592_v31  ;;  %3842 = vmatprep.subr.bf16.mxu1 %v8290_v63  ;;  %v8308_v40 = vld [vmem:[#allocation3 + $0x34] ss:$8 sps:$4 sm:$0x77]  }
 0x2b1   :  { %3067 = vmatmul.mubr.bf16.gmra.mxu1 %v2883_v49  ;;  %v3293_v61 = vrot.slane %v3277_v1, %v8592_v31  ;;  %v3300_v25 = vrot.slane %v3278_v44, %v8592_v31  ;;  %v3327_v62 = vrot.slane %v8278_v41, %v8592_v31  ;;  %v3328_v0 = vcombine.high %v3320_v17, %v3320_v17  ;;  %v8297_v1 = vld [vmem:[%s10415_s2 + $0x200] ss:$8 sps:$4 sm:$0xff]  }
 0x2b2   :  { %v2417_v2 = vpack.c.bf16 %v2405_v46, %v2382_v54  ;;  %v3307_v27 = vrot.slane %v3279_v59, %v8592_v31  ;;  %v3336_v4 = vrot.slane %v3320_v17, %v8592_v31  ;;  %v3369_v50 = vrot.slane %v8279_v45, %v8592_v31  ;;  %3843 = vmatpush1.bf16.msra.mxu1 %v8288_v53  ;;  %v8302_v45 = vld [vmem:[%s10415_s2 + $0x1f4] ss:$8 sps:$4 sm:$0xff]  }
 0x2b3   :  { %v2416_v6 = vpack.c.bf16 %v2398_v51, %v2381_v56  ;;  %v3329_v57 = vcombine.high %v3327_v62, %v3327_v62  ;;  %v3350_v48 = vrot.slane %v3328_v0, %v8592_v31  ;;  %v3376_v7 = vrot.slane %v8281_v35, %v8592_v31  ;;  %3844 = vmatprep.subr.bf16.mxu1 %v8293_v5 }
 0x2b4   :  { %7906 = vmatprep.mubr.msk.bf16.mxu0 %vm1364_vm5, %v2417_v2  ;;  %v3377_v9 = vcombine.high %v3369_v50, %v3369_v50  ;;  %v3385_v10 = vrot.slane %v3369_v50, %v8592_v31  ;;  %v7907_v11 = vcombine.high %v3286_v60, %v3300_v25  ;;  %v3461_v12 = vcombine.low %v3293_v61, %v3307_v27  ;;  %v8305_v50 = vld [vmem:[%s10415_s2 + $0x1e4] ss:$8 sps:$4 sm:$0xff]  }
 0x2b5   :  { %3236 = vmatmul.mubr.bf16.gmra.mxu0 %v2416_v6  ;;  %v3343_v14 = vrot.slane %v3327_v62, %v8592_v31  ;;  %v3357_v16 = vrot.slane %v3329_v57, %v8592_v31  ;;  %v7908_v18 = vcombine.high %v3293_v61, %v3307_v27  ;;  %v3463_v21 = vcombine.low %v3336_v4, %v3350_v48  ;;  %v8300_v62 = vld [vmem:[%s10415_s2 + $0x1f0] ss:$8 sps:$4 sm:$0xff]  }
 0x2b6   :  { %v3399_v19 = vrot.slane %v3377_v9, %v8592_v31  ;;  %v3470_v15 = vrot.slane %v7907_v11, %v8592_v31  ;;  %v3477_v22 = vrot.slane %v3461_v12, %v8592_v31  ;;  %v7909_v23 = vcombine.high %v3336_v4, %v3350_v48  ;;  %3845 = vmatpush1.bf16.msra.mxu1 %v8291_v8 }
 0x2b7   :  { %v3484_v24 = vrot.slane %v7908_v18, %v8592_v31  ;;  %v3491_v26 = vrot.slane %v3463_v21, %v8592_v31  ;;  %v3527_v47 = vcombine.low %v3343_v14, %v3357_v16  ;;  %v7910_v28 = vcombine.high %v3343_v14, %v3385_v10  ;;  %3846 = vmatprep.subr.bf16.mxu1 %v8296_v13  ;;  %v8303_v14 = vld [vmem:[%s10415_s2 + $0x1e0] ss:$8 sps:$4 sm:$0xff]  }
 0x2b8   :  { %v3392_v20 = vrot.slane %v3376_v7, %v8592_v31  ;;  %v3409_v30 = vcombine.high %v3399_v19, %v3399_v19  ;;  %v3493_v32 = vcombine.high %v3470_v15, %v3477_v22  ;;  %v3536_v33 = vrot.slane %v7909_v23, %v8592_v31 }
 0x2b9   :  { %v3492_v36 = vcombine.low %v3470_v15, %v3477_v22  ;;  %v3494_v55 = vcombine.low %v3484_v24, %v3491_v26  ;;  %v3495_v63 = vcombine.high %v3484_v24, %v3491_v26  ;;  %v3543_v37 = vrot.slane %v3527_v47, %v8592_v31 }
 0x2ba   :  { %v3529_v38 = vcombine.low %v3409_v30, %v3392_v20  ;;  %v3378_v39 = vcombine.high %v3376_v7, %v3376_v7  ;;  %v3509_v41 = vrot.slane %v3493_v32, %v8592_v31  ;;  %v3550_v42 = vrot.slane %v7910_v28, %v8592_v31  ;;  %3847 = vmatpush1.bf16.msra.mxu1 %v8294_v29 }
 0x2bb   :  { %v3559_v43 = vcombine.high %v3536_v33, %v3543_v37  ;;  %3858 = vmatprep.subr.bf16.mxu1 %v8299_v34  ;;  %v3408_v49 = vcombine.high %v3392_v20, %v3392_v20  ;;  %v3419_v51 = vrot.slane %v8306_v58, %v8592_v31  ;;  %v3523_v17 = vrot.slane %v3495_v63, %v8592_v31 }
 0x2bc   :  { %v3557_v44 = vrot.slane %v3529_v38, %v8592_v31  ;;  %v3406_v46 = vrot.slane %v3378_v39, %v8592_v31  ;;  %v3558_v35 = vcombine.low %v3536_v33, %v3543_v37  ;;  %v3502_v53 = vrot.slane %v3492_v36, %v8592_v31 }
 0x2bd   :  { %v3516_v54 = vrot.slane %v3494_v55, %v8592_v31  ;;  %v3426_v61 = vrot.slane %v8308_v40, %v8592_v31  ;;  %v3575_v25 = vrot.slane %v3559_v43, %v8592_v31  ;;  %v3427_v0 = vcombine.high %v3419_v51, %v3419_v51 }
 0x2be   :  { %v3560_v56 = vcombine.low %v3550_v42, %v3557_v44  ;;  %v3561_v59 = vcombine.high %v3550_v42, %v3557_v44  ;;  %v3410_v60 = vcombine.high %v3406_v46, %v3406_v46  ;;  %3859 = vmatpush2.bf16.msra.mxu1 %v8297_v1  ;;  %v3435_v2 = vrot.slane %v3419_v51, %v8592_v31 }
 0x2bf   :  { %v3592_v27 = vcombine.low %v3406_v46, %v3408_v49  ;;  %3860 = vmatprep.subr.bf16.mxu1 %v8302_v45  ;;  %v3428_v6 = vcombine.high %v3426_v61, %v3426_v61  ;;  %v3442_v57 = vrot.slane %v3426_v61, %v8592_v31  ;;  %v3525_v48 = vcombine.low %v3509_v41, %v3523_v17 }
 0x2c0   :  { %v3589_v4 = vrot.slane %v3561_v59, %v8592_v31  ;;  %v3582_v5 = vrot.slane %v3560_v56, %v8592_v31  ;;  %v3449_v7 = vrot.slane %v3427_v0, %v8592_v31  ;;  %v3457_v8 = vcombine.high %v3435_v2, %v3435_v2 }
 0x2c1   :  { %v3593_v9 = vcombine.low %v3410_v60, %v3435_v2  ;;  %v3568_v11 = vrot.slane %v3558_v35, %v8592_v31  ;;  %v3456_v12 = vrot.slane %v3428_v6, %v8592_v31  ;;  %v3458_v13 = vcombine.high %v3442_v57, %v3442_v57 }
 0x2c2   :  { %v3591_v10 = vcombine.low %v3575_v25, %v3589_v4  ;;  %3861 = vmatpush2.bf16.msra.mxu1 %v8300_v62  ;;  %v3459_v16 = vcombine.high %v3449_v7, %v3449_v7  ;;  %v3594_v18 = vcombine.low %v3449_v7, %v3457_v8  ;;  %v3602_v21 = vrot.slane %v3592_v27, %v8592_v31 }
 0x2c3   :  { %v3609_v19 = vrot.slane %v3593_v9, %v8592_v31  ;;  %3862 = vmatprep.subr.bf16.mxu1 %v8305_v50  ;;  %v3590_v22 = vcombine.low %v3568_v11, %v3582_v5  ;;  %v3658_v23 = vcombine.low %v3456_v12, %v3458_v13  ;;  %v3524_v28 = vcombine.low %v3502_v53, %v3516_v54 }
 0x2c4   :  { %v3690_v15 = vpack.c.bf16 %v3591_v10, %v3525_v48  ;;  %v3595_v24 = vcombine.low %v3459_v16, %v3442_v57  ;;  %v3616_v20 = vrot.slane %v3594_v18, %v8592_v31 }
 0x2c5   :  { %v3625_v26 = vcombine.high %v3602_v21, %v3609_v19  ;;  %v3624_v47 = vcombine.low %v3602_v21, %v3609_v19  ;;  %v3665_v29 = vrot.slane %v3658_v23, %v8592_v31  ;;  %v3689_v32 = vpack.c.bf16 %v3590_v22, %v3524_v28 }
 0x2c6   :  { %7955 = vmatprep.mubr.msk.bf16.mxu1 %vm1364_vm5, %v3690_v15  ;;  %3863 = vmatpush2.bf16.msra.mxu1 %v8303_v14  ;;  %v3623_v30 = vrot.slane %v3595_v24, %v8592_v31 }
 0x2c7   :  { %v3641_v33 = vrot.slane %v3625_v26, %v8592_v31  ;;  %v3666_v58 = vcombine.high %v3665_v29, %v3665_v29  ;;  %v3634_v55 = vrot.slane %v3624_v47, %v8592_v31  ;;  %v3673_v41 = vrot.slane %v3665_v29, %v8592_v31 }
 0x2c8   :  { %v3627_v34 = vcombine.high %v3616_v20, %v3623_v30  ;;  %v3626_v36 = vcombine.low %v3616_v20, %v3623_v30 }
 0x2c9   :  { %3865 = vmatmul.mubr.bf16.vlgmr.msra.gmra.mxu1 %v3689_v32  ;;  %v3680_v39 = vrot.slane %v3666_v58, %v8592_v31 }
 0x2ca   :  { %v3655_v63 = vrot.slane %v3627_v34, %v8592_v31  ;;  %v3648_v37 = vrot.slane %v3626_v36, %v8592_v31 }
 0x2cc   :  { %v3657_v38 = vcombine.low %v3641_v33, %v3655_v63  ;;  %v3656_v40 = vcombine.low %v3634_v55, %v3648_v37 }
 0x2ce   :  { %v3692_v42 = vpack.c.bf16 %v3680_v39, %v3657_v38  ;;  %v3691_v43 = vpack.c.bf16 %v3673_v41, %v3656_v40 }
 0x2d0   :  { %7956 = vmatprep.mubr.msk.bf16.mxu1 %vm1364_vm5, %v3692_v42 }
 0x2d1   :  { %3875 = vmatmul.mubr.bf16.gmra.mxu1 %v3691_v43 }
 0x35d   :  { %v3058_v1 = vpop.f32.mrf.mxu1 }
 0x35f   :  { %v3060_v44 = vpop.f32.mrf.mxu1 }
 0x361   :  { %v3062_v45 = vpop.f32.mrf.mxu1  ;;  %v3227_v49 = vpop.f32.mrf.mxu0 }
 0x362   :  { %v3228_v27 = vadd.f32 %v3227_v49, %v3058_v1 }
 0x363   :  { %v3064_v46 = vpop.f32.mrf.mxu1  ;;  %v3229_v17 = vpop.f32.mrf.mxu0 }
 0x364   :  { %v3230_v20 = vadd.f32 %v3229_v17, %v3060_v44 }
 0x365   :  { %v3231_v53 = vpop.f32.mrf.mxu0 }
 0x366   :  { %v3232_v62 = vadd.f32 %v3231_v53, %v3062_v45 }
 0x367   :  { %v3233_v56 = vpop.f32.mrf.mxu0 }
 0x368   :  { %v3234_v24 = vadd.f32 %v3233_v56, %v3064_v46 }
 0x371   :  { %v3068_v51 = vpop.f32.mrf.mxu1 }
 0x373   :  { %v3070_v35 = vpop.f32.mrf.mxu1 }
 0x375   :  { %v3072_v54 = vpop.f32.mrf.mxu1  ;;  %v3237_v60 = vpop.f32.mrf.mxu0 }
 0x376   :  { %v3238_v5 = vadd.f32 %v3237_v60, %v3068_v51 }
 0x377   :  { %v3074_v59 = vpop.f32.mrf.mxu1  ;;  %v3239_v0 = vpop.f32.mrf.mxu0 }
 0x378   :  { %v3240_v30 = vadd.f32 %v3239_v0, %v3070_v35 }
 0x379   :  { %v3241_v6 = vpop.f32.mrf.mxu0 }
 0x37a   :  { %v3242_v10 = vadd.f32 %v3241_v6, %v3072_v54 }
 0x37b   :  { %v3243_v47 = vpop.f32.mrf.mxu0 }
 0x37c   :  { %v3244_v36 = vadd.f32 %v3243_v47, %v3074_v59 }
 0x389   :  { %v3866_v61 = vpop.f32.mrf.mxu1 }
 0x38a   :  { %v9352_v57 = vadd.f32 %v3866_v61, %v3228_v27 }
 0x38b   :  { %v3868_v25 = vpop.f32.mrf.mxu1 }
 0x38c   :  { %v3917_v11 = vmul.f32 %v9352_v57, %v9352_v57  ;;  %v9372_v55 = vadd.f32 %v3868_v25, %v3230_v20 }
 0x38d   :  { %v3870_v2 = vpop.f32.mrf.mxu1 }
 0x38e   :  { %v9350_v4 = vadd.f32 %v3870_v2, %v3232_v62  ;;  %v3918_v43 = vmul.f32 %v9372_v55, %v9372_v55  ;;  %v3904_v49 = vsel %vm1520_vm12, %v9372_v55, 0.0 }
 0x38f   :  { %v3872_v50 = vpop.f32.mrf.mxu1 }
 0x390   :  { %v3919_v8 = vmul.f32 %v9350_v4, %v9350_v4  ;;  %v3893_v12 = vadd.f32 %v9350_v4, %v9352_v57  ;;  %v9370_v32 = vadd.f32 %v3872_v50, %v3234_v24  ;;  %v3935_v59 = vsel %vm1520_vm12, %v3918_v43, 0.0 }
 0x391   :  { %v3876_v48 = vpop.f32.mrf.mxu1 }
 0x392   :  { %v9354_v7 = vadd.f32 %v3876_v48, %v3238_v5  ;;  %v3925_v18 = vadd.f32 %v3919_v8, %v3917_v11  ;;  %v3920_v39 = vmul.f32 %v9370_v32, %v9370_v32  ;;  %v3905_v1 = vsel %vm1520_vm12, %v9370_v32, 0.0 }
 0x393   :  { %v3878_v9 = vpop.f32.mrf.mxu1  ;;  %v3906_v53 = vadd.f32 %v3905_v1, %v3904_v49 }
 0x394   :  { %v3921_v13 = vmul.f32 %v9354_v7, %v9354_v7  ;;  %v3894_v21 = vadd.f32 %v3893_v12, %v9354_v7  ;;  %v9374_v63 = vadd.f32 %v3878_v9, %v3240_v30  ;;  %v3936_v51 = vsel %vm1520_vm12, %v3920_v39, 0.0 }
 0x395   :  { %v3880_v14 = vpop.f32.mrf.mxu1  ;;  %v3937_v25 = vadd.f32 %v3936_v51, %v3935_v59 }
 0x396   :  { %v9364_v16 = vadd.f32 %v3880_v14, %v3242_v10  ;;  %v3926_v22 = vadd.f32 %v3925_v18, %v3921_v13  ;;  %v3922_v44 = vmul.f32 %v9374_v63, %v9374_v63  ;;  %v3907_v17 = vsel %vm1520_vm12, %v9374_v63, 0.0 }
 0x397   :  { %v3882_v58 = vpop.f32.mrf.mxu1  ;;  %v3908_v62 = vadd.f32 %v3907_v17, %v3906_v53 }
 0x398   :  { %v3896_v19 = vsel %vm3895_vm2, %v9364_v16, 0.0  ;;  %v3923_v15 = vmul.f32 %v9364_v16, %v9364_v16  ;;  %v9378_v40 = vadd.f32 %v3882_v58, %v3244_v36  ;;  %v3938_v60 = vsel %vm1520_vm12, %v3922_v44, 0.0 }
 0x399   :  { %v3897_v23 = vadd.f32 %v3896_v19, %v3894_v21  ;;  %v3939_v27 = vadd.f32 %v3938_v60, %v3937_v25 }
 0x39a   :  { %v3927_v26 = vsel %vm3895_vm2, %v3923_v15, 0.0  ;;  %v3924_v35 = vmul.f32 %v9378_v40, %v9378_v40  ;;  %v3909_v61 = vsel %vm45_vm1, %v9378_v40, 0.0 }
 0x39b   :  { %v3898_v28 = vrot.slane %v3897_v23, 4  ;;  %v3928_v29 = vadd.f32 %v3927_v26, %v3926_v22  ;;  %v3910_v50 = vadd.f32 %v3909_v61, %v3908_v62 }
 0x39c   :  { %v3940_v2 = vsel %vm45_vm1, %v3924_v35, 0.0 }
 0x39d   :  { %v3899_v33 = vadd.f32 %v3898_v28, %v3897_v23  ;;  %v3929_v34 = vrot.slane %v3928_v29, 4  ;;  %v3941_v5 = vadd.f32 %v3940_v2, %v3939_v27  ;;  %v3911_v6 = vrot.slane %v3910_v50, 4 }
 0x39f   :  { %v3900_v37 = vrot.slane %v3899_v33, 2  ;;  %v3930_v38 = vadd.f32 %v3929_v34, %v3928_v29  ;;  %v3942_v48 = vrot.slane %v3941_v5, 4  ;;  %v3912_v8 = vadd.f32 %v3911_v6, %v3910_v50 }
 0x3a1   :  { %v3901_v41 = vadd.f32 %v3900_v37, %v3899_v33  ;;  %v3931_v42 = vrot.slane %v3930_v38, 2  ;;  %v3943_v9 = vadd.f32 %v3942_v48, %v3941_v5  ;;  %v3913_v10 = vrot.slane %v3912_v8, 2 }
 0x3a3   :  { %v3902_v45 = vrot.slane %v3901_v41, 1  ;;  %v3932_v46 = vadd.f32 %v3931_v42, %v3930_v38  ;;  %v3944_v11 = vrot.slane %v3943_v9, 2  ;;  %v3914_v12 = vadd.f32 %v3913_v10, %v3912_v8 }
 0x3a5   :  { %v3903_v54 = vadd.f32 %v3902_v45, %v3901_v41  ;;  %v3933_v56 = vrot.slane %v3932_v46, 1  ;;  %v3945_v13 = vadd.f32 %v3944_v11, %v3943_v9  ;;  %v3915_v14 = vrot.slane %v3914_v12, 1 }
 0x3a7   :  { %v3934_v0 = vadd.f32 %v3933_v56, %v3932_v46  ;;  %3949 = vrot.lane.b32.xlu0 %v3903_v54, %s8471_s26  ;;  %v3946_v18 = vrot.slane %v3945_v13, 1  ;;  %v3916_v21 = vadd.f32 %v3915_v14, %v3914_v12 }
 0x3a9   :  { %3954 = vrot.lane.b32.xlu1 %v3934_v0, %s8471_s26  ;;  %v3947_v19 = vadd.f32 %v3946_v18, %v3945_v13 }
 0x3ab   :  { %3958 = vrot.lane.b32.xlu0 %v3903_v54, %s8470_s1 }
 0x3ad   :  { %3962 = vrot.lane.b32.xlu1 %v3934_v0, %s8470_s1 }
 0x3af   :  { %3966 = vrot.lane.b32.xlu0 %v3903_v54, %s8472_s27 }
 0x3b1   :  { %3970 = vrot.lane.b32.xlu1 %v3934_v0, %s8472_s27 }
 0x3b3   :  { %3974 = vrot.lane.b32.xlu0 %v3903_v54, %s8473_s28 }
 0x3b5   :  { %3978 = vrot.lane.b32.xlu1 %v3934_v0, %s8473_s28 }
 0x3b7   :  { %3982 = vrot.lane.b32.xlu0 %v3903_v54, %s8474_s29 }
 0x3b9   :  { %3986 = vrot.lane.b32.xlu1 %v3934_v0, %s8474_s29 }
 0x3bb   :  { %3990 = vrot.lane.b32.xlu0 %v3903_v54, %s8475_s30 }
 0x3bd   :  { %3994 = vrot.lane.b32.xlu1 %v3934_v0, %s8475_s30 }
 0x3bf   :  { %3998 = vrot.lane.b32.xlu0 %v3903_v54, %s8476_s8 }
 0x3c1   :  { %4002 = vrot.lane.b32.xlu1 %v3934_v0, %s8476_s8 }
 0x3c3   :  { %4009 = vrot.lane.b32.xlu0 %v3916_v21, %s8471_s26 }
 0x3c5   :  { %4014 = vrot.lane.b32.xlu1 %v3947_v19, %s8471_s26 }
 0x3c7   :  { %4018 = vrot.lane.b32.xlu0 %v3916_v21, %s8470_s1 }
 0x3c9   :  { %4022 = vrot.lane.b32.xlu1 %v3947_v19, %s8470_s1 }
 0x3cb   :  { %4026 = vrot.lane.b32.xlu0 %v3916_v21, %s8472_s27 }
 0x3cd   :  { %4030 = vrot.lane.b32.xlu1 %v3947_v19, %s8472_s27 }
 0x3cf   :  { %4034 = vrot.lane.b32.xlu0 %v3916_v21, %s8473_s28 }
 0x3d1   :  { %4038 = vrot.lane.b32.xlu1 %v3947_v19, %s8473_s28 }
 0x419   :  { %v3950_v15 = vpop.permute.xlu0 %3949 }
 0x41a   :  { %v3952_v20 = vadd.f32 %v3950_v15, %v3903_v54 }
 0x41b   :  { %v3955_v22 = vpop.permute.xlu1 %3954 }
 0x41c   :  { %v3957_v33 = vadd.f32 %v3955_v22, %v3934_v0  ;;  %v1988_v22 = vld [vmem:[%s10414_s4 + $0x3] sm:$0x1] }
 0x41d   :  { %v3959_v23 = vpop.permute.xlu0 %3958 }
 0x41e   :  { %v3961_v34 = vadd.f32 %v3959_v23, %v3952_v20  ;;  %v8315_v20 = vld [vmem:[%s10416_s3 + $0x60] ss:$8 sps:$4 sm:$0xff]  }
 0x41f   :  { %v3963_v24 = vpop.permute.xlu1 %3962 }
 0x420   :  { %v3965_v36 = vadd.f32 %v3963_v24, %v3957_v33  ;;  %v8318_v33 = vld [vmem:[%s10416_s3 + $0x130] ss:$8 sps:$4 sm:$0xff]  }
 0x421   :  { %v3967_v26 = vpop.permute.xlu0 %3966 }
 0x422   :  { %v3969_v37 = vadd.f32 %v3967_v26, %v3961_v34  ;;  %v8309_v26 = vld [vmem:[%s10416_s3 + $0x70] ss:$8 sps:$4 sm:$0xff]   ;;  %v8320_v34 = vld [vmem:[%s10416_s3 + $0x134] ss:$8 sps:$4 sm:$0xff]  }
 0x423   :  { %v3971_v47 = vpop.permute.xlu1 %3970 }
 0x424   :  { %v3973_v39 = vadd.f32 %v3971_v47, %v3965_v36  ;;  %v8311_v47 = vld [vmem:[%s10416_s3 + $0x74] ss:$8 sps:$4 sm:$0xff]   ;;  %v8321_v36 = vld [vmem:[%s10416_s3 + $0x50] ss:$8 sps:$4 sm:$0xff]  }
 0x425   :  { %v3975_v28 = vpop.permute.xlu0 %3974  ;;  %5937 = vmatprep.subr.bf16.mxu1 %v8311_v47 }
 0x426   :  { %v3977_v41 = vadd.f32 %v3975_v28, %v3969_v37  ;;  %v8312_v28 = vld [vmem:[%s10416_s3 + $0x140] ss:$8 sps:$4 sm:$0xff]   ;;  %5938 = vmatpush1.bf16.msra.mxu1 %v8309_v26  ;;  %v8326_v37 = vld [vmem:[%s10416_s3 + $0x124] ss:$8 sps:$4 sm:$0xff]   ;;  %v8405_v26 = vld [vmem:[%s10416_s3 + $0x214] ss:$8 sps:$4 sm:$0xff]  }
 0x427   :  { %v3979_v29 = vpop.permute.xlu1 %3978 }
 0x428   :  { %v3981_v43 = vadd.f32 %v3979_v29, %v3973_v39  ;;  %v8314_v29 = vld [vmem:[%s10416_s3 + $0x144] ss:$8 sps:$4 sm:$0xff]  }
 0x429   :  { %v3983_v30 = vpop.permute.xlu0 %3982  ;;  %5748 = vmatprep.subr.bf16.mxu0 %v8314_v29  ;;  %v8329_v39 = vld [vmem:[%s10416_s3 + $0x44] ss:$8 sps:$4 sm:$0xff]  }
 0x42a   :  { %v3985_v1 = vadd.f32 %v3983_v30, %v3977_v41  ;;  %v8317_v30 = vld [vmem:[%s10416_s3 + $0x64] ss:$8 sps:$4 sm:$0xff]   ;;  %5749 = vmatpush1.bf16.msra.mxu0 %v8312_v28  ;;  %v8332_v41 = vld [vmem:[%s10416_s3 + $0x114] ss:$8 sps:$4 sm:$0xff]  }
 0x42b   :  { %v3987_v58 = vpop.permute.xlu1 %3986  ;;  %5939 = vmatprep.subr.bf16.mxu1 %v8317_v30  ;;  %5750 = vmatprep.subr.bf16.mxu0 %v8320_v34 }
 0x42c   :  { %v3989_v45 = vadd.f32 %v3987_v58, %v3981_v43  ;;  %v8323_v58 = vld [vmem:[%s10416_s3 + $0x54] ss:$8 sps:$4 sm:$0xff]   ;;  %5940 = vmatpush1.bf16.msra.mxu1 %v8315_v20  ;;  %v8330_v43 = vld [vmem:[%s10416_s3 + $0x110] ss:$8 sps:$4 sm:$0xff]  }
 0x42d   :  { %v3991_v38 = vpop.permute.xlu0 %3990  ;;  %5941 = vmatprep.subr.bf16.mxu1 %v8323_v58 }
 0x42e   :  { %v3993_v46 = vadd.f32 %v3991_v38, %v3985_v1  ;;  %v8324_v38 = vld [vmem:[%s10416_s3 + $0x120] ss:$8 sps:$4 sm:$0xff]   ;;  %5751 = vmatpush1.bf16.msra.mxu0 %v8318_v33  ;;  %v8335_v1 = vld [vmem:[%s10416_s3 + $0x34] ss:$8 sps:$4 sm:$0xff]  }
 0x42f   :  { %v3995_v42 = vpop.permute.xlu1 %3994  ;;  %5752 = vmatprep.subr.bf16.mxu0 %v8326_v37 }
 0x430   :  { %v3997_v51 = vadd.f32 %v3995_v42, %v3989_v45  ;;  %v8327_v42 = vld [vmem:[%s10416_s3 + $0x40] ss:$8 sps:$4 sm:$0xff]   ;;  %5942 = vmatpush1.bf16.msra.mxu1 %v8321_v36  ;;  %v8333_v45 = vld [vmem:[%s10416_s3 + $0x30] ss:$8 sps:$4 sm:$0xff]  }
 0x431   :  { %v3999_v44 = vpop.permute.xlu0 %3998  ;;  %5943 = vmatprep.subr.bf16.mxu1 %v8329_v39 }
 0x432   :  { %v4001_v17 = vadd.f32 %v3999_v44, %v3993_v46  ;;  %5753 = vmatpush1.bf16.msra.mxu0 %v8324_v38  ;;  %v8338_v44 = vld [vmem:[%s10416_s3 + $0x104] ss:$8 sps:$4 sm:$0xff]   ;;  %v8336_v46 = vld [vmem:[%s10416_s3 + $0x100] ss:$8 sps:$4 sm:$0xff]  }
 0x433   :  { %v4003_v49 = vpop.permute.xlu1 %4002  ;;  %5754 = vmatprep.subr.bf16.mxu0 %v8332_v41 }
 0x434   :  { %v4005_v53 = vadd.f32 %v4003_v49, %v3997_v51  ;;  %v4006_v56 = vadd.f32 %v4001_v17, %v3916_v21  ;;  %v1987_v21 = vld [vmem:[%s10414_s4 + $0x2] sm:$0x1]  ;;  %5944 = vmatpush1.bf16.msra.mxu1 %v8327_v42  ;;  %v8341_v49 = vld [vmem:[%s10416_s3 + $0x24] ss:$8 sps:$4 sm:$0xff]   ;;  %v8344_v51 = vld [vmem:[%s10416_s3 + $0xf4] ss:$8 sps:$4 sm:$0xff]  }
 0x435   :  { %v4010_v35 = vpop.permute.xlu0 %4009  ;;  %5945 = vmatprep.subr.bf16.mxu1 %v8335_v1  ;;  %v8339_v17 = vld [vmem:[%s10416_s3 + $0x20] ss:$8 sps:$4 sm:$0xff]  }
 0x436   :  { %v4007_v60 = vadd.f32 %v4005_v53, %v3947_v19  ;;  %v4012_v25 = vadd.f32 %v4010_v35, %v4006_v56  ;;  %5755 = vmatpush1.bf16.msra.mxu0 %v8330_v43  ;;  %v8342_v35 = vld [vmem:[%s10416_s3 + $0xf0] ss:$8 sps:$4 sm:$0xff]   ;;  %v8347_v53 = vld [vmem:[%s10416_s3 + $0x14] ss:$8 sps:$4 sm:$0xff]  }
 0x437   :  { %v4015_v54 = vpop.permute.xlu1 %4014  ;;  %5756 = vmatprep.subr.bf16.mxu0 %v8338_v44  ;;  %v8345_v56 = vld [vmem:[%s10416_s3 + $0x10] ss:$8 sps:$4 sm:$0xff]  }
 0x438   :  { %v4017_v0 = vadd.f32 %v4015_v54, %v4007_v60  ;;  %5946 = vmatpush1.bf16.msra.mxu1 %v8333_v45  ;;  %v8350_v54 = vld [vmem:[%s10416_s3 + $0xe4] ss:$8 sps:$4 sm:$0xff]  }
 0x439   :  { %v4019_v59 = vpop.permute.xlu0 %4018  ;;  %5947 = vmatprep.subr.bf16.mxu1 %v8341_v49  ;;  %v8353_v60 = vld [vmem:[%s10416_s3 + $0x4] ss:$8 sps:$4 sm:$0xff]  }
 0x43a   :  { %v4021_v2 = vadd.f32 %v4019_v59, %v4012_v25  ;;  %5757 = vmatpush1.bf16.msra.mxu0 %v8336_v46  ;;  %v8348_v59 = vld [vmem:[%s10416_s3 + $0xe0] ss:$8 sps:$4 sm:$0xff]  }
 0x43b   :  { %v4023_v61 = vpop.permute.xlu1 %4022  ;;  %5758 = vmatprep.subr.bf16.mxu0 %v8344_v51  ;;  %v8351_v25 = vld [vmem:[%s10416_s3] ss:$8 sps:$4 sm:$0xff]  }
 0x43c   :  { %v4025_v50 = vadd.f32 %v4023_v61, %v4017_v0  ;;  %5948 = vmatpush1.bf16.msra.mxu1 %v8339_v17  ;;  %v8356_v61 = vld [vmem:[%s10416_s3 + $0xd4] ss:$8 sps:$4 sm:$0xff]   ;;  %v8359_v0 = vld [vmem:[%s10416_s3 + $0xc4] ss:$8 sps:$4 sm:$0xff]  }
 0x43d   :  { %v4027_v62 = vpop.permute.xlu0 %4026  ;;  %5949 = vmatprep.subr.bf16.mxu1 %v8347_v53 }
 0x43e   :  { %v4029_v5 = vadd.f32 %v4027_v62, %v4021_v2  ;;  %5759 = vmatpush1.bf16.msra.mxu0 %v8342_v35  ;;  %v8354_v62 = vld [vmem:[%s10416_s3 + $0xd0] ss:$8 sps:$4 sm:$0xff]   ;;  %v8362_v2 = vld [vmem:[%s10416_s3 + $0x194] ss:$8 sps:$4 sm:$0xff]  }
 0x43f   :  { %v4031_v27 = vpop.permute.xlu1 %4030  ;;  %5760 = vmatprep.subr.bf16.mxu0 %v8350_v54 }
 0x440   :  { %v4033_v48 = vadd.f32 %v4031_v27, %v4025_v50  ;;  %5950 = vmatpush1.bf16.msra.mxu1 %v8345_v56  ;;  %v8357_v27 = vld [vmem:[%s10416_s3 + $0xc0] ss:$8 sps:$4 sm:$0xff]   ;;  %v8360_v50 = vld [vmem:[%s10416_s3 + $0x190] ss:$8 sps:$4 sm:$0xff]  }
 0x441   :  { %v4035_v6 = vpop.permute.xlu0 %4034  ;;  %5951 = vmatprep.subr.bf16.mxu1 %v8353_v60 }
 0x442   :  { %v4037_v8 = vadd.f32 %v4035_v6, %v4029_v5  ;;  %5761 = vmatpush1.bf16.msra.mxu0 %v8348_v59  ;;  %v8365_v5 = vld [vmem:[%s10416_s3 + $0xb4] ss:$8 sps:$4 sm:$0xff]   ;;  %v8363_v6 = vld [vmem:[%s10416_s3 + $0xb0] ss:$8 sps:$4 sm:$0xff]  }
 0x443   :  { %v4039_v9 = vpop.permute.xlu1 %4038  ;;  %5762 = vmatprep.subr.bf16.mxu0 %v8356_v61 }
 0x444   :  { %v4043_v10 = vmul.f32 0.00295858, %v4037_v8  ;;  %v4041_v11 = vadd.f32 %v4039_v9, %v4033_v48  ;;  %5952 = vmatpush1.bf16.msra.mxu1 %v8351_v25  ;;  %v8368_v48 = vld [vmem:[%s10416_s3 + $0x184] ss:$8 sps:$4 sm:$0xff]   ;;  %v8366_v8 = vld [vmem:[%s10416_s3 + $0x180] ss:$8 sps:$4 sm:$0xff]  }
 0x445   :  { %5959 = vmatprep.subr.bf16.mxu1 %v8359_v0  ;;  %v8371_v9 = vld [vmem:[%s10416_s3 + $0xa4] ss:$8 sps:$4 sm:$0xff]  }
 0x446   :  { %v4045_v12 = vmul.f32 %v4043_v10, %v4043_v10  ;;  %v4044_v13 = vmul.f32 0.00295858, %v4041_v11  ;;  %5763 = vmatpush1.bf16.msra.mxu0 %v8354_v62  ;;  %v8369_v11 = vld [vmem:[%s10416_s3 + $0xa0] ss:$8 sps:$4 sm:$0xff]  }
 0x447   :  { %5770 = vmatprep.subr.bf16.mxu0 %v8362_v2 }
 0x448   :  { %v4046_v14 = vsub.f32 %v4044_v13, %v4045_v12  ;;  %5960 = vmatpush2.bf16.msra.mxu1 %v8357_v27  ;;  %v8372_v12 = vld [vmem:[%s10416_s3 + $0x170] ss:$8 sps:$4 sm:$0xff]   ;;  %v8377_v13 = vld [vmem:[%s10416_s3 + $0x94] ss:$8 sps:$4 sm:$0xff]  }
 0x449   :  { %5961 = vmatprep.subr.bf16.mxu1 %v8365_v5 }
 0x44a   :  { %v4047_v18 = vadd.f32 1e-05, %v4046_v14  ;;  %5771 = vmatpush2.bf16.msra.mxu0 %v8360_v50  ;;  %v8380_v14 = vld [vmem:[%s10416_s3 + $0x164] ss:$8 sps:$4 sm:$0xff]  }
 0x44b   :  { %5772 = vmatprep.subr.bf16.mxu0 %v8368_v48 }
 0x44c   :  { %8463 = vrsqrt.f32 %v4047_v18  ;;  %5962 = vmatpush2.bf16.msra.mxu1 %v8363_v6  ;;  %v8378_v18 = vld [vmem:[%s10416_s3 + $0x160] ss:$8 sps:$4 sm:$0xff]  }
 0x44d   :  { %5963 = vmatprep.subr.bf16.mxu1 %v8371_v9 }
 0x44e   :  { %5773 = vmatpush2.bf16.msra.mxu0 %v8366_v8 }
 0x450   :  { %5964 = vmatpush2.bf16.msra.mxu1 %v8369_v11 }
 0x451   :  { %5965 = vmatprep.subr.bf16.mxu1 %v8377_v13 }
 0x454   :  { %5966 = vmatpush2.bf16.msra.mxu1 %v8375_v3 }
 0x459   :  { %v8464_v19 = vpop.eup %8463 }
 0x45a   :  { %v9423_v15 = vmul.f32 %v8464_v19, %v1987_v21  ;;  %v8383_v21 = vld [vmem:[%s10416_s3 + $0x84] ss:$8 sps:$4 sm:$0xff]   ;;  %v8386_v19 = vld [vmem:[%s10416_s3 + $0x154] ss:$8 sps:$4 sm:$0xff]  }
 0x45b   :  { %5967 = vmatprep.subr.bf16.mxu1 %v8383_v21 }
 0x45c   :  { %4056 = vrot.lane.b32.xlu1 %v9423_v15, %s8475_s30  ;;  %4053 = vrot.lane.b32.xlu0 %v9423_v15, %s8476_s8  ;;  %v4050_v23 = vmul.f32 %v9423_v15, %v4043_v10  ;;  %v8374_v10 = vld [vmem:[%s10416_s3 + $0x174] ss:$8 sps:$4 sm:$0xff]  }
 0x45d   :  { %5774 = vmatprep.subr.bf16.mxu0 %v8374_v10 }
 0x45e   :  { %v9433_v24 = vsub.f32 %v1988_v22, %v4050_v23  ;;  %5775 = vmatpush2.bf16.msra.mxu0 %v8372_v12  ;;  %v8381_v22 = vld [vmem:[%s10416_s3 + $0x80] ss:$8 sps:$4 sm:$0xff]   ;;  %v8384_v23 = vld [vmem:[%s10416_s3 + $0x150] ss:$8 sps:$4 sm:$0xff]  }
 0x45f   :  { %5776 = vmatprep.subr.bf16.mxu0 %v8380_v14  ;;  %5968 = vmatpush2.bf16.msra.mxu1 %v8381_v22 }
 0x460   :  { %4059 = vrot.lane.b32.xlu0 %v9423_v15, %s8474_s29  ;;  %4082 = vrot.lane.b32.xlu1 %v9433_v24, %s8476_s8 }
 0x462   :  { %5777 = vmatpush2.bf16.msra.mxu0 %v8378_v18 }
 0x463   :  { %5778 = vmatprep.subr.bf16.mxu0 %v8386_v19 }
 0x464   :  { %4062 = vrot.lane.b32.xlu0 %v9423_v15, %s8473_s28  ;;  %4085 = vrot.lane.b32.xlu1 %v9433_v24, %s8475_s30 }
 0x466   :  { %5779 = vmatpush2.bf16.msra.mxu0 %v8384_v23 }
 0x467   :  { %6674 = vmatprep.subr.bf16.mxu0 %v8405_v26 }
 0x468   :  { %4065 = vrot.lane.b32.xlu0 %v9423_v15, %s8472_s27  ;;  %4088 = vrot.lane.b32.xlu1 %v9433_v24, %s8474_s29 }
 0x46c   :  { %4068 = vrot.lane.b32.xlu0 %v9423_v15, %s8470_s1  ;;  %4091 = vrot.lane.b32.xlu1 %v9433_v24, %s8473_s28 }
 0x470   :  { %4071 = vrot.lane.b32.xlu0 %v9423_v15, %s8471_s26  ;;  %4094 = vrot.lane.b32.xlu1 %v9433_v24, %s8472_s27 }
 0x474   :  { %4097 = vrot.lane.b32.xlu0 %v9433_v24, %s8470_s1  ;;  %4100 = vrot.lane.b32.xlu1 %v9433_v24, %s8471_s26 }
 0x4ce   :  { %v4057_v47 = vpop.permute.xlu1 %4056  ;;  %v4054_v28 = vpop.permute.xlu0 %4053 }
 0x4cf   :  { %v4074_v36 = vsel %vm1513_vm9, %v9423_v15, %v4054_v28 }
 0x4d0   :  { %v4075_v37 = vsel %vm1515_vm10, %v4074_v36, %v4057_v47 }
 0x4d2   :  { %v4060_v29 = vpop.permute.xlu0 %4059  ;;  %v4083_v20 = vpop.permute.xlu1 %4082 }
 0x4d3   :  { %v4076_v41 = vsel %vm1364_vm5, %v4075_v37, %v4060_v29  ;;  %v4103_v42 = vsel %vm1513_vm9, %v9433_v24, %v4083_v20 }
 0x4d6   :  { %v4063_v30 = vpop.permute.xlu0 %4062  ;;  %v4086_v33 = vpop.permute.xlu1 %4085 }
 0x4d7   :  { %v4077_v43 = vsel %vm1518_vm11, %v4076_v41, %v4063_v30  ;;  %v4104_v1 = vsel %vm1515_vm10, %v4103_v42, %v4086_v33 }
 0x4d8   :  { %v4117_v17 = vrot.slane %v4077_v43, %v9020_v52 }
 0x4da   :  { %v4066_v34 = vpop.permute.xlu0 %4065  ;;  %v4089_v58 = vpop.permute.xlu1 %4088  ;;  %v4119_v59 = vmul.f32 %v4117_v17, %v9372_v55  ;;  %v4121_v60 = vmul.f32 %v4117_v17, %v9370_v32  ;;  %v4123_v25 = vmul.f32 %v4117_v17, %v9374_v63  ;;  %v4125_v62 = vmul.f32 %v4117_v17, %v9378_v40 }
 0x4db   :  { %v4078_v44 = vsel %vm1520_vm12, %v4077_v43, %v4066_v34  ;;  %v4105_v45 = vsel %vm1364_vm5, %v4104_v1, %v4089_v58 }
 0x4de   :  { %v4069_v38 = vpop.permute.xlu0 %4068  ;;  %v4092_v39 = vpop.permute.xlu1 %4091 }
 0x4df   :  { %v4079_v46 = vsel %vm1522_vm13, %v4078_v44, %v4069_v38  ;;  %v4106_v15 = vsel %vm1518_vm11, %v4105_v45, %v4092_v39 }
 0x4e0   :  { %v4133_v24 = vrot.slane %v4106_v15, %v9020_v52 }
 0x4e2   :  { %v4072_v49 = vpop.permute.xlu0 %4071  ;;  %v4095_v51 = vpop.permute.xlu1 %4094  ;;  %v4135_v2 = vadd.f32 %v4133_v24, %v4119_v59  ;;  %v4137_v27 = vadd.f32 %v4133_v24, %v4121_v60  ;;  %v4139_v8 = vadd.f32 %v4133_v24, %v4123_v25  ;;  %v4141_v63 = vadd.f32 %v4133_v24, %v4125_v62 }
 0x4e3   :  { %v4080_v35 = vsel %vm1524_vm14, %v4079_v46, %v4072_v49  ;;  %v4107_v61 = vsel %vm1520_vm12, %v4106_v15, %v4095_v51 }
 0x4e4   :  { %v4113_v53 = vrot.slane %v4080_v35, %v9020_v52  ;;  %v4143_v12 = vmax.f32 %v4135_v2, 0.0  ;;  %v4145_v13 = vmax.f32 %v4137_v27, 0.0  ;;  %v4147_v21 = vmax.f32 %v4139_v8, 0.0 }
 0x4e6   :  { %v4098_v54 = vpop.permute.xlu0 %4097  ;;  %v4101_v56 = vpop.permute.xlu1 %4100  ;;  %v4118_v50 = vmul.f32 %v4113_v53, %v9352_v57  ;;  %v4120_v6 = vmul.f32 %v4113_v53, %v9350_v4  ;;  %v4122_v55 = vmul.f32 %v4113_v53, %v9354_v7  ;;  %v4124_v32 = vmul.f32 %v4113_v53, %v9364_v16 }
 0x4e7   :  { %v4108_v0 = vsel %vm1522_vm13, %v4107_v61, %v4098_v54  ;;  %v4149_v4 = vmax.f32 %v4141_v63, 0.0 }
 0x4e8   :  { %v4109_v5 = vsel %vm1524_vm14, %v4108_v0, %v4101_v56 }
 0x4e9   :  { %v4129_v48 = vrot.slane %v4109_v5, %v9020_v52 }
 0x4eb   :  { %v4134_v9 = vadd.f32 %v4129_v48, %v4118_v50  ;;  %v4136_v40 = vadd.f32 %v4129_v48, %v4120_v6  ;;  %v4138_v10 = vadd.f32 %v4129_v48, %v4122_v55  ;;  %v4140_v11 = vadd.f32 %v4129_v48, %v4124_v32 }
 0x4ed   :  { %v4142_v14 = vmax.f32 %v4134_v9, 0.0  ;;  %v4144_v57 = vmax.f32 %v4136_v40, 0.0  ;;  %v4146_v3 = vmax.f32 %v4138_v10, 0.0  ;;  %v4148_v18 = vmax.f32 %v4140_v11, 0.0 }
 0x4ef   :  { %v4158_v19 = vcombine.low %v4142_v14, %v4143_v12  ;;  %v4159_v7 = vcombine.high %v4142_v14, %v4143_v12  ;;  %v4208_v22 = vcombine.low %v4144_v57, %v4145_v13  ;;  %v4209_v16 = vcombine.high %v4144_v57, %v4145_v13 }
 0x4f0   :  { %v4258_v23 = vcombine.low %v4146_v3, %v4147_v21  ;;  %v4259_v26 = vcombine.high %v4146_v3, %v4147_v21  ;;  %v4308_v47 = vcombine.low %v4148_v18, %v4149_v4 }
 0x4f1   :  { %v4166_v28 = vrot.slane %v4158_v19, %v8592_v31  ;;  %v4173_v29 = vrot.slane %v4159_v7, %v8592_v31  ;;  %v4216_v20 = vrot.slane %v4208_v22, %v8592_v31  ;;  %v4223_v30 = vrot.slane %v4209_v16, %v8592_v31 }
 0x4f2   :  { %v4266_v33 = vrot.slane %v4258_v23, %v8592_v31  ;;  %v4273_v34 = vrot.slane %v4259_v26, %v8592_v31  ;;  %v9658_v38 = vrot.slane %v4308_v47, %v8592_v31 }
 0x4f3   :  { %v4174_v58 = vcombine.high %v4166_v28, %v4166_v28  ;;  %v4175_v36 = vcombine.high %v4173_v29, %v4173_v29  ;;  %v4182_v37 = vrot.slane %v4166_v28, %v8592_v31  ;;  %v4189_v39 = vrot.slane %v4173_v29, %v8592_v31 }
 0x4f4   :  { %v4224_v41 = vcombine.high %v4216_v20, %v4216_v20  ;;  %v4225_v42 = vcombine.high %v4223_v30, %v4223_v30  ;;  %v4239_v43 = vrot.slane %v4223_v30, %v8592_v31  ;;  %v4232_v44 = vrot.slane %v4216_v20, %v8592_v31 }
 0x4f5   :  { %v4196_v1 = vrot.slane %v4174_v58, %v8592_v31  ;;  %v4274_v45 = vcombine.high %v4266_v33, %v4266_v33  ;;  %v4275_v46 = vcombine.high %v4273_v34, %v4273_v34  ;;  %v4203_v15 = vrot.slane %v4175_v36, %v8592_v31 }
 0x4f6   :  { %v4246_v49 = vrot.slane %v4224_v41, %v8592_v31  ;;  %v4253_v51 = vrot.slane %v4225_v42, %v8592_v31  ;;  %v4282_v17 = vrot.slane %v4266_v33, %v8592_v31  ;;  %v4255_v35 = vcombine.high %v4239_v43, %v4239_v43 }
 0x4f7   :  { %v4289_v24 = vrot.slane %v4273_v34, %v8592_v31  ;;  %v4296_v53 = vrot.slane %v4274_v45, %v8592_v31  ;;  %v4303_v54 = vrot.slane %v4275_v46, %v8592_v31  ;;  %v4316_v60 = vcombine.high %v9658_v38, %v9658_v38 }
 0x4f8   :  { %v4257_v56 = vcombine.high %v4253_v51, %v4253_v51  ;;  %v4304_v59 = vcombine.high %v4282_v17, %v4282_v17  ;;  %v4331_v61 = vcombine.low %v4182_v37, %v4196_v1  ;;  %v4323_v2 = vrot.slane %v9658_v38, %v8592_v31 }
 0x4f9   :  { %v4305_v25 = vcombine.high %v4289_v24, %v4289_v24  ;;  %v4306_v62 = vcombine.high %v4296_v53, %v4296_v53  ;;  %v4307_v0 = vcombine.high %v4303_v54, %v4303_v54  ;;  %v7957_v27 = vcombine.high %v4182_v37, %v4196_v1 }
 0x4fa   :  { %v4333_v50 = vcombine.low %v4189_v39, %v4203_v15  ;;  %v4340_v5 = vrot.slane %v4331_v61, %v8592_v31  ;;  %v7958_v6 = vcombine.high %v4189_v39, %v4203_v15  ;;  %v4389_v55 = vcombine.low %v4232_v44, %v4246_v49 }
 0x4fb   :  { %v7959_v32 = vcombine.high %v4232_v44, %v4246_v49  ;;  %v4418_v48 = vrot.slane %v4239_v43, %v8592_v31  ;;  %v4453_v8 = vcombine.low %v4253_v51, %v4255_v35  ;;  %v4347_v63 = vrot.slane %v7957_v27, %v8592_v31 }
 0x4fc   :  { %v4354_v9 = vrot.slane %v4333_v50, %v8592_v31  ;;  %v4355_v40 = vcombine.low %v4340_v5, %v4340_v5  ;;  %v4371_v10 = vrot.slane %v4340_v5, %v8592_v31  ;;  %v4397_v11 = vrot.slane %v7958_v6, %v8592_v31 }
 0x4fd   :  { %v4404_v12 = vrot.slane %v4389_v55, %v8592_v31  ;;  %v4411_v13 = vrot.slane %v7959_v32, %v8592_v31  ;;  %v4454_v14 = vcombine.low %v4257_v56, %v4282_v17  ;;  %v4455_v21 = vcombine.low %v4296_v53, %v4304_v59 }
 0x4fe   :  { %v4356_v57 = vcombine.low %v4347_v63, %v4354_v9  ;;  %v4357_v3 = vcombine.high %v4347_v63, %v4354_v9  ;;  %v4364_v18 = vrot.slane %v4355_v40, %v8592_v31  ;;  %v4462_v26 = vrot.slane %v4453_v8, %v8592_v31 }
 0x4ff   :  { %v4419_v4 = vcombine.low %v4397_v11, %v4404_v12  ;;  %v4420_v19 = vcombine.high %v4397_v11, %v4404_v12  ;;  %v4421_v7 = vcombine.low %v4411_v13, %v4418_v48  ;;  %v4422_v22 = vcombine.high %v4411_v13, %v4418_v48 }
 0x500   :  { %v4378_v16 = vrot.slane %v4356_v57, %v8592_v31  ;;  %v4385_v23 = vrot.slane %v4357_v3, %v8592_v31  ;;  %v4469_v47 = vrot.slane %v4454_v14, %v8592_v31  ;;  %v4476_v58 = vrot.slane %v4455_v21, %v8592_v31 }
 0x501   :  { %v4429_v28 = vrot.slane %v4419_v4, %v8592_v31  ;;  %v4436_v29 = vrot.slane %v4420_v19, %v8592_v31  ;;  %v4443_v20 = vrot.slane %v4421_v7, %v8592_v31  ;;  %v4450_v30 = vrot.slane %v4422_v22, %v8592_v31 }
 0x502   :  { %v4386_v33 = vcombine.low %v4364_v18, %v4378_v16  ;;  %v4387_v34 = vcombine.low %v4371_v10, %v4385_v23  ;;  %v4477_v36 = vcombine.low %v4462_v26, %v4462_v26  ;;  %v4330_v37 = vrot.slane %v4316_v60, %v8592_v31  ;;  %v8421_v60 = vld [vmem:[#allocation4 + $0x20] ss:$8 sps:$4 sm:$0x11]  }
 0x503   :  { %v4451_v38 = vcombine.low %v4429_v28, %v4443_v20  ;;  %v4452_v39 = vcombine.low %v4436_v29, %v4450_v30  ;;  %v4510_v41 = vcombine.low %v4306_v62, %v4289_v24  ;;  %v4478_v42 = vcombine.low %v4469_v47, %v4476_v58 }
 0x504   :  { %v4479_v43 = vcombine.high %v4469_v47, %v4476_v58  ;;  %v4511_v1 = vcombine.low %v4303_v54, %v4305_v25  ;;  %4583 = vst [vmem:[#allocation4] sm:$0xfc] %v4386_v33  ;;  %4585 = vst.msk [vmem:[#allocation4 + $0x8] sm:$0xfc] %vm4584_vm7, %v4387_v34  ;;  %v4493_v44 = vrot.slane %v4462_v26, %v8592_v31 }
 0x505   :  { %v4512_v45 = vcombine.low %v4307_v0, %v4323_v2  ;;  %v4519_v46 = vrot.slane %v4510_v41, %v8592_v31  ;;  %4586 = vst [vmem:[#allocation4 + $0x10] sm:$0x7f] %v4451_v38  ;;  %4588 = vst.msk [vmem:[#allocation4 + $0x18] sm:$0x7f] %vm4587_vm8, %v4452_v39  ;;  %v4486_v15 = vrot.slane %v4477_v36, %v8592_v31 }
 0x506   :  { %v4500_v49 = vrot.slane %v4478_v42, %v8592_v31  ;;  %v4507_v51 = vrot.slane %v4479_v43, %v8592_v31  ;;  %v4526_v17 = vrot.slane %v4511_v1, %v8592_v31  ;;  %v4540_v24 = vrot.slane %v4330_v37, %v8592_v31 }
 0x507   :  { %v4533_v35 = vrot.slane %v4512_v45, %v8592_v31  ;;  %v6121_v6 = vrot.slane %v8421_v60, %v8592_v31 }
 0x508   :  { %v4508_v53 = vcombine.low %v4486_v15, %v4500_v49  ;;  %v4509_v54 = vcombine.low %v4493_v44, %v4507_v51  ;;  %v4541_v56 = vcombine.low %v4519_v46, %v4526_v17  ;;  %v4542_v59 = vcombine.high %v4519_v46, %v4526_v17 }
 0x509   :  { %v4543_v61 = vcombine.low %v4533_v35, %v4540_v24  ;;  %v4544_v25 = vcombine.high %v4533_v35, %v4540_v24  ;;  %v9718_v18 = vrot.slane %v6121_v6, %v8592_v31 }
 0x50a   :  { %v4551_v62 = vrot.slane %v4541_v56, %v8592_v31  ;;  %v4558_v0 = vrot.slane %v4542_v59, %v8592_v31  ;;  %4589 = vst [vmem:[#allocation4 + $0x30] sm:$0xfc] %v4508_v53  ;;  %4590 = vst.msk [vmem:[#allocation4 + $0x38] sm:$0xfc] %vm4584_vm7, %v4509_v54 }
 0x50b   :  { %v4565_v2 = vrot.slane %v4543_v61, %v8592_v31  ;;  %v4572_v27 = vrot.slane %v4544_v25, %v8592_v31  ;;  %v8387_v50 = vld [vmem:[#allocation4] ss:$8 sps:$4 sm:$0xff]   ;;  %v8389_v5 = vld [vmem:[#allocation4 + $0x4] ss:$8 sps:$4 sm:$0xff]  }
 0x50c   :  { %v4619_v48 = vrot.slane %v8387_v50, %v8592_v31  ;;  %v8390_v8 = vld [vmem:[#allocation4 + $0x10] ss:$8 sps:$4 sm:$0xff]   ;;  %v8392_v63 = vld [vmem:[#allocation4 + $0x14] ss:$8 sps:$4 sm:$0x77]   ;;  %v4626_v9 = vrot.slane %v8389_v5, %v8592_v31 }
 0x50d   :  { %v4573_v55 = vcombine.low %v4551_v62, %v4565_v2  ;;  %v4574_v32 = vcombine.low %v4558_v0, %v4572_v27  ;;  %v4669_v10 = vrot.slane %v8390_v8, %v8592_v31  ;;  %v4676_v11 = vrot.slane %v8392_v63, %v8592_v31  ;;  %v8395_v12 = vld [vmem:[#allocation4] ss:$8 sps:$4 sm:$0xee]   ;;  %v8397_v13 = vld [vmem:[#allocation4 + $0x4] ss:$8 sps:$4 sm:$0xff]  }
 0x50e   :  { %v4627_v40 = vcombine.high %v4619_v48, %v4619_v48  ;;  %v4628_v14 = vcombine.high %v4626_v9, %v4626_v9  ;;  %v4635_v57 = vrot.slane %v4619_v48, %v8592_v31  ;;  %v4642_v3 = vrot.slane %v4626_v9, %v8592_v31  ;;  %v8398_v0 = vld [vmem:[#allocation4 + $0x10] ss:$8 sps:$4 sm:$0xff]   ;;  %v8400_v2 = vld [vmem:[#allocation4 + $0x14] ss:$8 sps:$4 sm:$0xff]  }
 0x50f   :  { %4591 = vst [vmem:[#allocation4 + $0x40] sm:$0x7f] %v4573_v55  ;;  %4592 = vst.msk [vmem:[#allocation4 + $0x48] sm:$0x7f] %vm4587_vm8, %v4574_v32  ;;  %v4677_v4 = vcombine.high %v4669_v10, %v4669_v10  ;;  %v4678_v19 = vcombine.high %v4676_v11, %v4676_v11  ;;  %v4685_v7 = vrot.slane %v4669_v10, %v8592_v31 }
 0x510   :  { %v4649_v21 = vrot.slane %v4627_v40, %v8592_v31  ;;  %v4656_v16 = vrot.slane %v4628_v14, %v8592_v31  ;;  %v4692_v23 = vrot.slane %v4676_v11, %v8592_v31  ;;  %v5126_v26 = vrot.slane %v8395_v12, %v8592_v31 }
 0x511   :  { %v8393_v22 = vld [vmem:[#allocation4 + $0x30] ss:$8 sps:$4 sm:$0xff]   ;;  %v5133_v47 = vrot.slane %v8397_v13, %v8592_v31  ;;  %v4699_v28 = vrot.slane %v4677_v4, %v8592_v31  ;;  %v4706_v29 = vrot.slane %v4678_v19, %v8592_v31  ;;  %v5176_v14 = vrot.slane %v8398_v0, %v8592_v31 }
 0x512   :  { %v9729_v20 = vrot.slane %v8393_v22, %v8592_v31  ;;  %v4809_v30 = vcombine.low %v4635_v57, %v4649_v21  ;;  %v4708_v33 = vcombine.high %v4692_v23, %v4692_v23  ;;  %v7960_v34 = vcombine.high %v4635_v57, %v4649_v21  ;;  %v8401_v11 = vld [vmem:[#allocation4 + $0x30] ss:$8 sps:$4 sm:$0xee]  }
 0x513   :  { %v4811_v58 = vcombine.low %v4642_v3, %v4656_v16  ;;  %v7961_v36 = vcombine.high %v4642_v3, %v4656_v16  ;;  %v4875_v39 = vcombine.low %v4685_v7, %v4699_v28  ;;  %v7962_v41 = vcombine.high %v4685_v7, %v4699_v28 }
 0x514   :  { %v9733_v37 = vrot.slane %v9729_v20, %v8592_v31  ;;  %v4819_v38 = vrot.slane %v4809_v30, %v8592_v31  ;;  %v4826_v42 = vrot.slane %v7960_v34, %v8592_v31  ;;  %v4877_v44 = vcombine.low %v4692_v23, %v4706_v29 }
 0x515   :  { %v4833_v43 = vrot.slane %v4811_v58, %v8592_v31  ;;  %v4840_v1 = vrot.slane %v7961_v36, %v8592_v31  ;;  %v4885_v46 = vrot.slane %v4875_v39, %v8592_v31  ;;  %v4892_v15 = vrot.slane %v7962_v41, %v8592_v31  ;;  %v5106_v36 = vld [vmem:[#allocation4 + $0x30] sm:$0xfe] }
 0x516   :  { %v4878_v45 = vcombine.low %v4708_v33, %v9733_v37  ;;  %v5134_v49 = vcombine.high %v5126_v26, %v5126_v26  ;;  %v4841_v51 = vcombine.low %v4819_v38, %v4826_v42  ;;  %v4842_v17 = vcombine.high %v4819_v38, %v4826_v42  ;;  %v5107_v38 = vld [vmem:[#allocation4 + $0x38] sm:$0xfe] }
 0x517   :  { %v4843_v35 = vcombine.low %v4833_v43, %v4840_v1  ;;  %v4844_v24 = vcombine.high %v4833_v43, %v4840_v1  ;;  %v4899_v53 = vrot.slane %v4877_v44, %v8592_v31  ;;  %v4907_v56 = vcombine.low %v4885_v46, %v4892_v15 }
 0x518   :  { %v4906_v54 = vrot.slane %v4878_v45, %v8592_v31  ;;  %v4908_v59 = vcombine.high %v4885_v46, %v4892_v15  ;;  %v4858_v60 = vrot.slane %v4842_v17, %v8592_v31  ;;  %v4851_v25 = vrot.slane %v4841_v51, %v8592_v31 }
 0x519   :  { %v4872_v61 = vrot.slane %v4844_v24, %v8592_v31  ;;  %v4865_v62 = vrot.slane %v4843_v35, %v8592_v31  ;;  %v4917_v6 = vrot.slane %v4907_v56, %v8592_v31  ;;  %v5135_v48 = vcombine.high %v5133_v47, %v5133_v47 }
 0x51a   :  { %v4909_v27 = vcombine.low %v4899_v53, %v4906_v54  ;;  %v4910_v50 = vcombine.high %v4899_v53, %v4906_v54  ;;  %v4924_v5 = vrot.slane %v4908_v59, %v8592_v31  ;;  %v5142_v8 = vrot.slane %v5126_v26, %v8592_v31 }
 0x51b   :  { %v4874_v55 = vcombine.low %v4858_v60, %v4872_v61  ;;  %v4873_v32 = vcombine.low %v4851_v25, %v4865_v62  ;;  %v5149_v40 = vrot.slane %v5133_v47, %v8592_v31  ;;  %v5156_v10 = vrot.slane %v5134_v49, %v8592_v31 }
 0x51c   :  { %v4938_v63 = vrot.slane %v4910_v50, %v8592_v31  ;;  %v4931_v9 = vrot.slane %v4909_v27, %v8592_v31  ;;  %v5163_v12 = vrot.slane %v5135_v48, %v8592_v31  ;;  %v5164_v13 = vcombine.high %v5142_v8, %v5142_v8 }
 0x51d   :  { %v5183_v57 = vrot.slane %v8400_v2, %v8592_v31  ;;  %v5165_v4 = vcombine.high %v5149_v40, %v5149_v40  ;;  %v5166_v19 = vcombine.high %v5156_v10, %v5156_v10  ;;  %v5184_v22 = vcombine.high %v5176_v14, %v5176_v14 }
 0x51e   :  { %v4940_v3 = vcombine.low %v4924_v5, %v4938_v63  ;;  %v4939_v21 = vcombine.low %v4917_v6, %v4931_v9  ;;  %v5167_v7 = vcombine.high %v5163_v12, %v5163_v12  ;;  %v9759_v23 = vrot.slane %v5176_v14, %v8592_v31  ;;  %v8406_v63 = vld [vmem:[#allocation4 + $0x40] ss:$8 sps:$4 sm:$0xff]   ;;  %v8408_v9 = vld [vmem:[#allocation4 + $0x44] ss:$8 sps:$4 sm:$0xff]  }
 0x51f   :  { %v5185_v16 = vcombine.high %v5183_v57, %v5183_v57  ;;  %v9762_v28 = vrot.slane %v5183_v57, %v8592_v31  ;;  %v5226_v29 = vrot.slane %v8401_v11, %v8592_v31  ;;  %v9766_v30 = vrot.slane %v5184_v22, %v8592_v31 }
 0x520   :  { %v5073_v26 = vpack.c.bf16 %v4940_v3, %v4874_v55  ;;  %v5072_v47 = vpack.c.bf16 %v4939_v21, %v4873_v32  ;;  %v5214_v34 = vcombine.high %v9759_v23, %v9759_v23  ;;  %v5318_v58 = vcombine.low %v5156_v10, %v5164_v13  ;;  %v4600_v10 = vld [vmem:[#allocation4 + $0x38] sm:$0xff] }
 0x521   :  { %v9769_v33 = vrot.slane %v5185_v16, %v8592_v31  ;;  %v5215_v39 = vcombine.high %v9762_v28, %v9762_v28  ;;  %v5234_v41 = vcombine.high %v5226_v29, %v5226_v29  ;;  %v5319_v42 = vcombine.low %v5166_v19, %v5149_v40  ;;  %v4599_v40 = vld [vmem:[#allocation4 + $0x30] sm:$0xff] }
 0x522   :  { %8047 = vmatprep.mubr.msk.bf16.mxu1 %vm1520_vm12, %v5073_v26  ;;  %v5320_v43 = vcombine.low %v5163_v12, %v5165_v4  ;;  %v5216_v1 = vcombine.high %v9766_v30, %v9766_v30  ;;  %v5321_v45 = vcombine.low %v5167_v7, %v9759_v23  ;;  %v5328_v46 = vrot.slane %v5318_v58, %v8592_v31 }
 0x523   :  { %5970 = vmatmul.mubr.bf16.vlgmr.msra.gmra.mxu1 %v5072_v47  ;;  %v5217_v44 = vcombine.high %v9769_v33, %v9769_v33  ;;  %v5256_v15 = vrot.slane %v5234_v41, %v8592_v31  ;;  %v5335_v49 = vrot.slane %v5319_v42, %v8592_v31  ;;  %v5384_v17 = vcombine.low %v9766_v30, %v5214_v34  ;;  %v8409_v41 = vld [vmem:[#allocation4 + $0x40] ss:$8 sps:$4 sm:$0xff]  }
 0x524   :  { %v5342_v51 = vrot.slane %v5320_v43, %v8592_v31  ;;  %v5349_v35 = vrot.slane %v5321_v45, %v8592_v31  ;;  %v5385_v24 = vcombine.low %v5216_v1, %v9762_v28  ;;  %v5386_v53 = vcombine.low %v9769_v33, %v5215_v39 }
 0x525   :  { %v5219_v54 = vcombine.high %v5106_v36, %v5107_v38  ;;  %v5350_v56 = vcombine.low %v5328_v46, %v5335_v49  ;;  %v5351_v59 = vcombine.high %v5328_v46, %v5335_v49  ;;  %v5387_v60 = vcombine.low %v5217_v44, %v5256_v15  ;;  %v8403_v46 = vld [vmem:[%s10416_s3 + $0x210] ss:$8 sps:$4 sm:$0xff]  }
 0x526   :  { %v5394_v61 = vrot.slane %v5384_v17, %v8592_v31  ;;  %v5352_v25 = vcombine.low %v5342_v51, %v5349_v35  ;;  %v5353_v62 = vcombine.high %v5342_v51, %v5349_v35  ;;  %v5401_v0 = vrot.slane %v5385_v24, %v8592_v31 }
 0x527   :  { %v5408_v2 = vrot.slane %v5386_v53, %v8592_v31  ;;  %v5367_v27 = vrot.slane %v5351_v59, %v8592_v31  ;;  %v5415_v50 = vrot.slane %v5387_v60, %v8592_v31  ;;  %v5360_v5 = vrot.slane %v5350_v56, %v8592_v31 }
 0x528   :  { %v5233_v6 = vrot.slane %v5219_v54, %v8592_v31  ;;  %v5381_v55 = vrot.slane %v5353_v62, %v8592_v31  ;;  %v5416_v32 = vcombine.low %v5394_v61, %v5401_v0  ;;  %v5417_v48 = vcombine.high %v5394_v61, %v5401_v0  ;;  %v8414_v54 = vld [vmem:[%s10416_s3 + $0x204] ss:$8 sps:$4 sm:$0xff]  }
 0x529   :  { %v5374_v8 = vrot.slane %v5352_v25, %v8592_v31  ;;  %v5418_v11 = vcombine.low %v5408_v2, %v5415_v50  ;;  %v5419_v12 = vcombine.high %v5408_v2, %v5415_v50  ;;  %v5242_v14 = vrot.slane %v5226_v29, %v8592_v31  ;;  %v8411_v61 = vld [vmem:[#allocation4 + $0x44] ss:$8 sps:$4 sm:$0x77]  }
 0x52a   :  { %v5235_v13 = vcombine.high %v5233_v6, %v5233_v6  ;;  %v5383_v57 = vcombine.low %v5367_v27, %v5381_v55  ;;  %v5433_v3 = vrot.slane %v5417_v48, %v8592_v31  ;;  %v5426_v4 = vrot.slane %v5416_v32, %v8592_v31 }
 0x52b   :  { %v5382_v21 = vcombine.low %v5360_v5, %v5374_v8  ;;  %v5447_v19 = vrot.slane %v5419_v12, %v8592_v31  ;;  %v5440_v7 = vrot.slane %v5418_v11, %v8592_v31  ;;  %v5249_v22 = vrot.slane %v5233_v6, %v8592_v31  ;;  %v8412_v6 = vld [vmem:[%s10416_s3 + $0x200] ss:$8 sps:$4 sm:$0xff]  }
 0x52c   :  { %v5263_v16 = vrot.slane %v5235_v13, %v8592_v31  ;;  %v5276_v26 = vrot.slane %v8406_v63, %v8592_v31  ;;  %v5283_v47 = vrot.slane %v8408_v9, %v8592_v31  ;;  %v7963_v34 = vcombine.high %v5242_v14, %v5256_v15  ;;  %v8417_v63 = vld [vmem:[%s10416_s3 + $0x1f4] ss:$8 sps:$4 sm:$0xff]  }
 0x52d   :  { %v4711_v29 = vcombine.high %v4599_v40, %v4600_v10  ;;  %v5449_v58 = vcombine.low %v5433_v3, %v5447_v19  ;;  %v5448_v36 = vcombine.low %v5426_v4, %v5440_v7  ;;  %v4726_v59 = vcombine.high %v9729_v20, %v9729_v20  ;;  %v8415_v7 = vld [vmem:[%s10416_s3 + $0x1f0] ss:$8 sps:$4 sm:$0xff]  }
 0x52e   :  { %v5451_v38 = vcombine.low %v5249_v22, %v5263_v16  ;;  %v7964_v39 = vcombine.high %v5249_v22, %v5263_v16  ;;  %v5284_v42 = vcombine.high %v5276_v26, %v5276_v26  ;;  %v5285_v43 = vcombine.high %v5283_v47, %v5283_v47 }
 0x52f   :  { %v9808_v1 = vrot.slane %v5276_v26, %v8592_v31  ;;  %v9811_v44 = vrot.slane %v5283_v47, %v8592_v31  ;;  %v5582_v45 = vpack.c.bf16 %v5449_v58, %v5383_v57  ;;  %v5581_v15 = vpack.c.bf16 %v5448_v36, %v5382_v21 }
 0x530   :  { %v9817_v49 = vrot.slane %v7963_v34, %v8592_v31  ;;  %v9820_v51 = vrot.slane %v5451_v38, %v8592_v31  ;;  %v9823_v17 = vrot.slane %v5284_v42, %v8592_v31  ;;  %v9826_v35 = vrot.slane %v5285_v43, %v8592_v31  ;;  %v8426_v34 = vld [vmem:[%s10416_s3 + $0x1e4] ss:$8 sps:$4 sm:$0xff]  }
 0x531   :  { %v9829_v24 = vrot.slane %v7964_v39, %v8592_v31  ;;  %v4725_v53 = vrot.slane %v4711_v29, %v8592_v31  ;;  %8019 = vmatprep.mubr.msk.bf16.mxu0 %vm1520_vm12, %v5582_v45  ;;  %v4756_v60 = vcombine.high %v9733_v37, %v9733_v37  ;;  %v4768_v25 = vrot.slane %v8409_v41, %v8592_v31 }
 0x532   :  { %v5483_v56 = vcombine.high %v9817_v49, %v9820_v51  ;;  %5781 = vmatmul.mubr.bf16.vlgmr.msra.gmra.mxu0 %v5581_v15  ;;  %v5453_v62 = vcombine.low %v9808_v1, %v9823_v17  ;;  %v7965_v0 = vcombine.high %v9808_v1, %v9823_v17  ;;  %v5517_v2 = vcombine.low %v9811_v44, %v9826_v35 }
 0x533   :  { %v7966_v27 = vcombine.high %v9811_v44, %v9826_v35  ;;  %6675 = vmatpush1.bf16.msra.mxu0 %v8403_v46  ;;  %v4727_v37 = vcombine.high %v4725_v53, %v4725_v53  ;;  %v4741_v50 = vrot.slane %v4725_v53, %v8592_v31  ;;  %v4748_v5 = vrot.slane %v4726_v59, %v8592_v31 }
 0x534   :  { %v5499_v20 = vrot.slane %v5483_v56, %v8592_v31  ;;  %v9858_v55 = vrot.slane %v5453_v62, %v8592_v31  ;;  %v9861_v32 = vrot.slane %v7965_v0, %v8592_v31  ;;  %v9864_v48 = vrot.slane %v5517_v2, %v8592_v31  ;;  %6676 = vmatprep.subr.bf16.mxu0 %v8414_v54  ;;  %v8424_v54 = vld [vmem:[%s10416_s3 + $0x1e0] ss:$8 sps:$4 sm:$0xff]  }
 0x535   :  { %v9867_v8 = vrot.slane %v7966_v27, %v8592_v31  ;;  %v4755_v9 = vrot.slane %v4727_v37, %v8592_v31  ;;  %v4757_v40 = vcombine.high %v4741_v50, %v4741_v50  ;;  %v4758_v10 = vcombine.high %v4748_v5, %v4748_v5 }
 0x536   :  { %v4775_v11 = vrot.slane %v8411_v61, %v8592_v31  ;;  %v5485_v12 = vcombine.high %v9829_v24, %v9858_v55  ;;  %v5541_v13 = vcombine.high %v9861_v32, %v9864_v48  ;;  %v4776_v57 = vcombine.high %v4768_v25, %v4768_v25 }
 0x537   :  { %v5542_v14 = vcombine.high %v9867_v8, %v9867_v8  ;;  %v4759_v3 = vcombine.high %v4755_v9, %v4755_v9  ;;  %v4784_v4 = vrot.slane %v4768_v25, %v8592_v31  ;;  %6677 = vmatpush1.bf16.msra.mxu0 %v8412_v6  ;;  %v4941_v38 = vcombine.low %v4748_v5, %v4756_v60  ;;  %v8429_v60 = vld [vmem:[%s10416_s3 + $0x1d4] ss:$8 sps:$4 sm:$0xff]  }
 0x538   :  { %v4777_v21 = vcombine.high %v4775_v11, %v4775_v11  ;;  %v4791_v19 = vrot.slane %v4775_v11, %v8592_v31  ;;  %v5513_v22 = vrot.slane %v5485_v12, %v8592_v31  ;;  %v5556_v16 = vrot.slane %v5541_v13, %v8592_v31  ;;  %6678 = vmatprep.subr.bf16.mxu0 %v8417_v63  ;;  %v8418_v13 = vld [vmem:[#allocation4] ss:$8 sps:$4 sm:$0xcc]  }
 0x539   :  { %v5570_v26 = vrot.slane %v5542_v14, %v8592_v31  ;;  %v4798_v47 = vrot.slane %v4776_v57, %v8592_v31  ;;  %v4806_v58 = vcombine.high %v4784_v4, %v4784_v4  ;;  %v4942_v43 = vcombine.low %v4758_v10, %v4741_v50  ;;  %v8432_v14 = vld [vmem:[%s10416_s3 + $0x1c4] ss:$8 sps:$4 sm:$0xff]  }
 0x53a   :  { %v4805_v29 = vrot.slane %v4777_v21, %v8592_v31  ;;  %v4807_v36 = vcombine.high %v4791_v19, %v4791_v19  ;;  %v5515_v39 = vcombine.low %v5499_v20, %v5513_v22  ;;  %v4943_v45 = vcombine.low %v4755_v9, %v4757_v40  ;;  %v8420_v21 = vld [vmem:[#allocation4 + $0x4] ss:$8 sps:$4 sm:$0xff]  }
 0x53b   :  { %v5572_v41 = vcombine.low %v5556_v16, %v5570_v26  ;;  %v4808_v42 = vcombine.high %v4798_v47, %v4798_v47  ;;  %v4944_v46 = vcombine.low %v4759_v3, %v4784_v4  ;;  %v4951_v15 = vrot.slane %v4941_v38, %v8592_v31  ;;  %6679 = vmatpush1.bf16.msra.mxu0 %v8415_v7  ;;  %v8422_v4 = vld [vmem:[#allocation4 + $0x30] ss:$8 sps:$4 sm:$0xcc]  }
 0x53c   :  { %v5007_v53 = vcombine.low %v4798_v47, %v4806_v58  ;;  %v4958_v59 = vrot.slane %v4942_v43, %v8592_v31  ;;  %v5009_v25 = vcombine.low %v4805_v29, %v4807_v36  ;;  %6680 = vmatprep.subr.bf16.mxu0 %v8426_v34  ;;  %v4965_v62 = vrot.slane %v4943_v45, %v8592_v31  ;;  %v8430_v58 = vld [vmem:[%s10416_s3 + $0x1c0] ss:$8 sps:$4 sm:$0xff]  }
 0x53d   :  { %v5584_v56 = vpack.c.bf16 %v5572_v41, %v5515_v39  ;;  %v5008_v61 = vcombine.low %v4808_v42, %v4791_v19  ;;  %v4972_v0 = vrot.slane %v4944_v46, %v8592_v31  ;;  %v5482_v27 = vcombine.low %v9817_v49, %v9820_v51  ;;  %v8427_v49 = vld [vmem:[%s10416_s3 + $0x1d0] ss:$8 sps:$4 sm:$0xff]  }
 0x53e   :  { %v5016_v2 = vrot.slane %v5007_v53, %v8592_v31  ;;  %v4974_v20 = vcombine.high %v4951_v15, %v4958_v59  ;;  %v5030_v50 = vrot.slane %v5009_v25, %v8592_v31  ;;  %v4973_v5 = vcombine.low %v4951_v15, %v4958_v59  ;;  %v8435_v53 = vld [vmem:[%s10416_s3 + $0x1b4] ss:$8 sps:$4 sm:$0xff]  }
 0x53f   :  { %8020 = vmatprep.mubr.msk.bf16.mxu0 %vm1520_vm12, %v5584_v56  ;;  %v5023_v37 = vrot.slane %v5008_v61, %v8592_v31  ;;  %v4976_v6 = vcombine.high %v4965_v62, %v4972_v0  ;;  %v4975_v63 = vcombine.low %v4965_v62, %v4972_v0  ;;  %v5484_v9 = vcombine.low %v9829_v24, %v9858_v55  ;;  %v5996_v56 = vld [vmem:[#allocation4 + $0x30] sm:$0xfc]  ;;  %v5997_v59 = vld [vmem:[#allocation4 + $0x38] sm:$0xfc] }
 0x540   :  { %v5492_v40 = vrot.slane %v5482_v27, %v8592_v31  ;;  %6681 = vmatpush1.bf16.msra.mxu0 %v8424_v54  ;;  %v4990_v51 = vrot.slane %v4974_v20, %v8592_v31  ;;  %v5033_v11 = vcombine.high %v5030_v50, %v5030_v50  ;;  %v4983_v12 = vrot.slane %v4973_v5, %v8592_v31  ;;  %v8433_v62 = vld [vmem:[%s10416_s3 + $0x1b0] ss:$8 sps:$4 sm:$0xff]  }
 0x541   :  { %v5032_v10 = vcombine.high %v5016_v2, %v5023_v37  ;;  %6682 = vmatprep.subr.bf16.mxu0 %v8429_v60  ;;  %v5004_v24 = vrot.slane %v4976_v6, %v8592_v31  ;;  %v4997_v55 = vrot.slane %v4975_v63, %v8592_v31  ;;  %v5031_v57 = vcombine.low %v5016_v2, %v5023_v37  ;;  %v8438_v37 = vld [vmem:[%s10416_s3 + $0x1a4] ss:$8 sps:$4 sm:$0xff]  }
 0x542   :  { %v5054_v3 = vrot.slane %v5030_v50, %v8592_v31  ;;  %v5061_v7 = vrot.slane %v5033_v11, %v8592_v31  ;;  %v5506_v22 = vrot.slane %v5484_v9, %v8592_v31  ;;  %v5540_v16 = vcombine.low %v9861_v32, %v9864_v48  ;;  %v8436_v11 = vld [vmem:[%s10416_s3 + $0x1a0] ss:$8 sps:$4 sm:$0xff]  }
 0x543   :  { %v5047_v19 = vrot.slane %v5032_v10, %v8592_v31  ;;  %v5006_v26 = vcombine.low %v4990_v51, %v5004_v24  ;;  %v5005_v47 = vcombine.low %v4983_v12, %v4997_v55  ;;  %v5040_v34 = vrot.slane %v5031_v57, %v8592_v31  ;;  %v8441_v12 = vld [vmem:[%s10416_s3 + $0x264] ss:$8 sps:$4 sm:$0xff]  }
 0x544   :  { %v5563_v29 = vrot.slane %v9867_v8, %v8592_v31  ;;  %6683 = vmatpush1.bf16.msra.mxu0 %v8427_v49  ;;  %v5514_v38 = vcombine.low %v5492_v40, %v5506_v22  ;;  %v5549_v39 = vrot.slane %v5540_v16, %v8592_v31  ;;  %v6022_v41 = vrot.slane %v8418_v13, %v8592_v31  ;;  %v8439_v22 = vld [vmem:[%s10416_s3 + $0x260] ss:$8 sps:$4 sm:$0xff]  }
 0x545   :  { %v5063_v36 = vcombine.low %v5047_v19, %v5061_v7  ;;  %6684 = vmatprep.subr.bf16.mxu0 %v8432_v14  ;;  %v5062_v32 = vcombine.low %v5040_v34, %v5054_v3  ;;  %v6029_v48 = vrot.slane %v8420_v21, %v8592_v31  ;;  %v6137_v42 = vrot.slane %v8422_v4, %v8592_v31  ;;  %v8444_v34 = vld [vmem:[%s10416_s3 + $0x254] ss:$8 sps:$4 sm:$0xff]  }
 0x546   :  { %v6247_v8 = vcombine.low %v9759_v23, %v9766_v30  ;;  %v5571_v45 = vcombine.low %v5549_v39, %v5563_v29  ;;  %v6030_v46 = vcombine.high %v6022_v41, %v6022_v41  ;;  %v6038_v15 = vrot.slane %v6022_v41, %v8592_v31 }
 0x547   :  { %v5075_v43 = vpack.c.bf16 %v5063_v36, %v5006_v26  ;;  %v5074_v54 = vpack.c.bf16 %v5062_v32, %v5005_v47  ;;  %v6031_v61 = vcombine.high %v6029_v48, %v6029_v48  ;;  %v6045_v25 = vrot.slane %v6029_v48, %v8592_v31  ;;  %v8442_v32 = vld [vmem:[%s10416_s3 + $0x250] ss:$8 sps:$4 sm:$0xff]  }
 0x548   :  { %v6153_v60 = vrot.slane %v6137_v42, %v8592_v31  ;;  %6685 = vmatpush1.bf16.msra.mxu0 %v8430_v58  ;;  %v5583_v0 = vpack.c.bf16 %v5571_v45, %v5514_v38  ;;  %v6052_v2 = vrot.slane %v6030_v46, %v8592_v31  ;;  %v9952_v27 = vrot.slane %v6247_v8, %v8592_v31  ;;  %v8447_v46 = vld [vmem:[%s10416_s3 + $0x244] ss:$8 sps:$4 sm:$0xff]  }
 0x549   :  { %8048 = vmatprep.mubr.msk.bf16.mxu1 %vm1520_vm12, %v5075_v43  ;;  %v8051_v20 = vcombine.high %v9759_v23, %v9766_v30  ;;  %v6059_v50 = vrot.slane %v6031_v61, %v8592_v31  ;;  %v6311_v6 = vcombine.low %v9762_v28, %v9769_v33  ;;  %v8052_v63 = vcombine.high %v9762_v28, %v9769_v33  ;;  %v8454_v28 = vld [vmem:[#allocation4 + $0x50] ss:$8 sps:$4 sm:$0x11]  }
 0x54a   :  { %5980 = vmatmul.mubr.bf16.gmra.mxu1 %v5074_v54  ;;  %v6175_v5 = vcombine.high %v6153_v60, %v6153_v60  ;;  %5791 = vmatmul.mubr.bf16.gmra.mxu0 %v5583_v0  ;;  %v8049_v9 = vcombine.high %v6038_v15, %v6052_v2  ;;  %v6130_v23 = vcombine.high %v5996_v56, %v5997_v59  ;;  %v8445_v2 = vld [vmem:[%s10416_s3 + $0x240] ss:$8 sps:$4 sm:$0xff]  }
 0x54b   :  { %v9965_v40 = vrot.slane %v8051_v20, %v8592_v31  ;;  %6686 = vmatprep.subr.bf16.mxu0 %v8435_v53  ;;  %v6245_v30 = vcombine.low %v6045_v25, %v6059_v50  ;;  %v8050_v49 = vcombine.high %v6045_v25, %v6059_v50  ;;  %v9969_v10 = vrot.slane %v6311_v6, %v8592_v31 }
 0x54c   :  { %v6313_v51 = vcombine.low %v9718_v18, %v6175_v5  ;;  %6687 = vmatpush1.bf16.msra.mxu0 %v8433_v62  ;;  %v9975_v33 = vrot.slane %v8049_v9, %v8592_v31  ;;  %v6144_v13 = vrot.slane %v6130_v23, %v8592_v31  ;;  %v6145_v18 = vcombine.high %v6137_v42, %v6137_v42 }
 0x54d   :  { %6688 = vmatprep.subr.bf16.mxu0 %v8438_v37  ;;  %v9982_v14 = vrot.slane %v6245_v30, %v8592_v31  ;;  %v9985_v24 = vrot.slane %v8050_v49, %v8592_v31  ;;  %v9991_v57 = vrot.slane %v8052_v63, %v8592_v31  ;;  %v6343_v3 = vcombine.high %v9965_v40, %v9969_v10 }
 0x54e   :  { %v9988_v55 = vrot.slane %v6313_v51, %v8592_v31  ;;  %v6146_v21 = vcombine.high %v6144_v13, %v6144_v13  ;;  %v6160_v4 = vrot.slane %v6144_v13, %v8592_v31  ;;  %v6167_v16 = vrot.slane %v6145_v18, %v8592_v31 }
 0x54f   :  { %v6277_v19 = vcombine.high %v9975_v33, %v9982_v14  ;;  %v6279_v7 = vcombine.high %v9985_v24, %v9952_v27  ;;  %v6236_v26 = vrot.slane %v8454_v28, %v8592_v31  ;;  %v6359_v36 = vrot.slane %v6343_v3, %v8592_v31  ;;  %v8448_v28 = vld [vmem:[%s10416_s3 + $0x230] ss:$8 sps:$4 sm:$0xff]   ;;  %v8451_v3 = vld [vmem:[%s10416_s3 + $0x220] ss:$8 sps:$4 sm:$0xff]  }
 0x550   :  { %6689 = vmatpush1.bf16.msra.mxu0 %v8436_v11  ;;  %v6345_v47 = vcombine.high %v9991_v57, %v9988_v55  ;;  %v6174_v39 = vrot.slane %v6146_v21, %v8592_v31  ;;  %v6176_v41 = vcombine.high %v6160_v4, %v6160_v4  ;;  %v6177_v48 = vcombine.high %v6167_v16, %v6167_v16 }
 0x551   :  { %6696 = vmatprep.subr.bf16.mxu0 %v8441_v12  ;;  %v6293_v29 = vrot.slane %v6277_v19, %v8592_v31  ;;  %v6307_v58 = vrot.slane %v6279_v7, %v8592_v31  ;;  %v6225_v42 = vcombine.high %v9808_v1, %v9808_v1  ;;  %v6243_v8 = vrot.slane %v6236_v26, %v8592_v31 }
 0x552   :  { %v6373_v38 = vrot.slane %v6345_v47, %v8592_v31  ;;  %v6178_v15 = vcombine.high %v6174_v39, %v6174_v39  ;;  %v6226_v53 = vcombine.high %v9811_v44, %v9811_v44  ;;  %v6227_v54 = vcombine.high %v9823_v17, %v9823_v17 }
 0x553   :  { %v6309_v43 = vcombine.low %v6293_v29, %v6307_v58  ;;  %v6228_v56 = vcombine.high %v9826_v35, %v9826_v35  ;;  %v6376_v59 = vcombine.low %v6177_v48, %v6160_v4  ;;  %v6377_v61 = vcombine.low %v6174_v39, %v6176_v41 }
 0x554   :  { %6697 = vmatpush2.bf16.msra.mxu0 %v8439_v22  ;;  %v6375_v45 = vcombine.low %v6359_v36, %v6373_v38  ;;  %v6344_v25 = vcombine.low %v9991_v57, %v9988_v55  ;;  %v6378_v62 = vcombine.low %v6178_v15, %v9808_v1  ;;  %v6379_v0 = vcombine.low %v9823_v17, %v6225_v42  ;;  %v8450_v1 = vld [vmem:[%s10416_s3 + $0x234] ss:$8 sps:$4 sm:$0xff]  }
 0x555   :  { %6698 = vmatprep.subr.bf16.mxu0 %v8444_v34  ;;  %v6386_v20 = vrot.slane %v6376_v59, %v8592_v31  ;;  %v6393_v37 = vrot.slane %v6377_v61, %v8592_v31  ;;  %v6442_v50 = vcombine.low %v6227_v54, %v9811_v44  ;;  %v6443_v5 = vcombine.low %v9826_v35, %v6226_v53 }
 0x556   :  { %v6508_v60 = vpack.c.bf16 %v6375_v45, %v6309_v43  ;;  %v6400_v17 = vrot.slane %v6378_v62, %v8592_v31  ;;  %v6407_v6 = vrot.slane %v6379_v0, %v8592_v31  ;;  %v6444_v63 = vcombine.low %v6228_v56, %v6243_v8 }
 0x557   :  { %v6342_v9 = vcombine.low %v9965_v40, %v9969_v10  ;;  %v6409_v23 = vcombine.high %v6386_v20, %v6393_v37  ;;  %v6451_v44 = vrot.slane %v6442_v50, %v8592_v31  ;;  %v6458_v35 = vrot.slane %v6443_v5, %v8592_v31  ;;  %v8453_v10 = vld [vmem:[%s10416_s3 + $0x224] ss:$8 sps:$4 sm:$0xff]  }
 0x558   :  { %6699 = vmatpush2.bf16.msra.mxu0 %v8442_v32  ;;  %8105 = vmatprep.mubr.msk.bf16.mxu0 %vm1520_vm12, %v6508_v60  ;;  %v6276_v30 = vcombine.low %v9975_v33, %v9982_v14  ;;  %v6278_v49 = vcombine.low %v9985_v24, %v9952_v27  ;;  %v6411_v51 = vcombine.high %v6400_v17, %v6407_v6 }
 0x559   :  { %6700 = vmatprep.subr.bf16.mxu0 %v8447_v46  ;;  %v6465_v11 = vrot.slane %v6444_v63, %v8592_v31  ;;  %v6467_v40 = vcombine.high %v6451_v44, %v6458_v35  ;;  %v6366_v12 = vrot.slane %v6344_v25, %v8592_v31  ;;  %v6425_v13 = vrot.slane %v6409_v23, %v8592_v31 }
 0x55a   :  { %v6439_v27 = vrot.slane %v6411_v51, %v8592_v31  ;;  %v6286_v14 = vrot.slane %v6276_v30, %v8592_v31  ;;  %v6300_v24 = vrot.slane %v6278_v49, %v8592_v31  ;;  %v6352_v55 = vrot.slane %v6342_v9, %v8592_v31 }
 0x55b   :  { %v6468_v33 = vcombine.high %v6465_v11, %v6465_v11  ;;  %v6482_v18 = vrot.slane %v6467_v40, %v8592_v31  ;;  %v6408_v4 = vcombine.low %v6386_v20, %v6393_v37  ;;  %v6410_v19 = vcombine.low %v6400_v17, %v6407_v6 }
 0x55c   :  { %6701 = vmatpush2.bf16.msra.mxu0 %v8445_v2  ;;  %v6374_v21 = vcombine.low %v6352_v55, %v6366_v12  ;;  %v6466_v7 = vcombine.low %v6451_v44, %v6458_v35  ;;  %v6441_v22 = vcombine.low %v6425_v13, %v6439_v27  ;;  %v6308_v26 = vcombine.low %v6286_v14, %v6300_v24 }
 0x55d   :  { %6702 = vmatprep.subr.bf16.mxu0 %v8450_v1  ;;  %v6496_v57 = vrot.slane %v6468_v33, %v8592_v31  ;;  %v6418_v34 = vrot.slane %v6408_v4, %v8592_v31  ;;  %v6432_v29 = vrot.slane %v6410_v19, %v8592_v31  ;;  %v6489_v38 = vrot.slane %v6465_v11, %v8592_v31 }
 0x55e   :  { %v6507_v47 = vpack.c.bf16 %v6374_v21, %v6308_v26  ;;  %v6475_v58 = vrot.slane %v6466_v7, %v8592_v31 }
 0x55f   :  { %v6498_v16 = vcombine.low %v6482_v18, %v6496_v57  ;;  %v6440_v39 = vcombine.low %v6418_v34, %v6432_v29 }
 0x560   :  { %6703 = vmatpush2.bf16.msra.mxu0 %v8448_v28  ;;  %v6497_v41 = vcombine.low %v6475_v58, %v6489_v38 }
 0x561   :  { %6704 = vmatprep.subr.bf16.mxu0 %v8453_v10  ;;  %v6510_v36 = vpack.c.bf16 %v6498_v16, %v6441_v22 }
 0x562   :  { %v6509_v32 = vpack.c.bf16 %v6497_v41, %v6440_v39 }
 0x564   :  { %6705 = vmatpush2.bf16.msra.mxu0 %v8451_v3 }
 0x567   :  { %6707 = vmatmul.mubr.bf16.vlgmr.msra.gmra.mxu0 %v6507_v47 }
 0x568   :  { %8106 = vmatprep.mubr.msk.bf16.mxu0 %vm1520_vm12, %v6510_v36 }
 0x56f   :  { %6717 = vmatmul.mubr.bf16.gmra.mxu0 %v6509_v32 }
 0x5e3   :  { %v5971_v45 = vpop.f32.mrf.mxu1 }
 0x5e5   :  { %v5973_v15 = vpop.f32.mrf.mxu1 }
 0x5e7   :  { %v5975_v54 = vpop.f32.mrf.mxu1 }
 0x5e9   :  { %v5977_v59 = vpop.f32.mrf.mxu1 }
 0x5f2   :  { %v5782_v48 = vpop.f32.mrf.mxu0 }
 0x5f3   :  { %v5972_v20 = vadd.f32 %v5971_v45, %v5782_v48 }
 0x5f4   :  { %v5784_v42 = vpop.f32.mrf.mxu0 }
 0x5f5   :  { %v5974_v57 = vadd.f32 %v5973_v15, %v5784_v42 }
 0x5f6   :  { %v5786_v8 = vpop.f32.mrf.mxu0 }
 0x5f7   :  { %v5976_v0 = vadd.f32 %v5975_v54, %v5786_v8 }
 0x5f8   :  { %v5788_v43 = vpop.f32.mrf.mxu0 }
 0x5f9   :  { %v5978_v18 = vadd.f32 %v5977_v59, %v5788_v43 }
 0x60a   :  { %v5792_v46 = vpop.f32.mrf.mxu0  ;;  %v5981_v60 = vpop.f32.mrf.mxu1 }
 0x60b   :  { %v5982_v1 = vadd.f32 %v5981_v60, %v5792_v46 }
 0x60c   :  { %v5794_v53 = vpop.f32.mrf.mxu0  ;;  %v5983_v37 = vpop.f32.mrf.mxu1 }
 0x60d   :  { %v5984_v3 = vadd.f32 %v5983_v37, %v5794_v53 }
 0x60e   :  { %v5796_v56 = vpop.f32.mrf.mxu0  ;;  %v5985_v9 = vpop.f32.mrf.mxu1 }
 0x60f   :  { %v5986_v35 = vadd.f32 %v5985_v9, %v5796_v56 }
 0x610   :  { %v5798_v61 = vpop.f32.mrf.mxu0  ;;  %v5987_v4 = vpop.f32.mrf.mxu1 }
 0x611   :  { %v5988_v16 = vadd.f32 %v5987_v4, %v5798_v61 }
 0x627   :  { %v6708_v25 = vpop.f32.mrf.mxu0 }
 0x628   :  { %v10080_v17 = vadd.f32 %v6708_v25, %v5972_v20 }
 0x629   :  { %v6710_v62 = vpop.f32.mrf.mxu0 }
 0x62a   :  { %v6759_v30 = vmul.f32 %v10080_v17, %v10080_v17  ;;  %v10102_v26 = vadd.f32 %v6710_v62, %v5974_v57 }
 0x62b   :  { %v6712_v2 = vpop.f32.mrf.mxu0 }
 0x62c   :  { %v10078_v50 = vadd.f32 %v6712_v2, %v5976_v0  ;;  %v6760_v41 = vmul.f32 %v10102_v26, %v10102_v26  ;;  %v6745_v43 = vsel %vm1524_vm14, %v10102_v26, 0.0 }
 0x62d   :  { %v6714_v5 = vpop.f32.mrf.mxu0 }
 0x62e   :  { %v6761_v23 = vmul.f32 %v10078_v50, %v10078_v50  ;;  %v6735_v49 = vadd.f32 %v10078_v50, %v10080_v17  ;;  %v10100_v21 = vadd.f32 %v6714_v5, %v5978_v18  ;;  %v6777_v59 = vsel %vm1524_vm14, %v6760_v41, 0.0 }
 0x62f   :  { %v6718_v6 = vpop.f32.mrf.mxu0 }
 0x630   :  { %v10082_v63 = vadd.f32 %v6718_v6, %v5982_v1  ;;  %v6767_v40 = vadd.f32 %v6761_v23, %v6759_v30  ;;  %v6762_v58 = vmul.f32 %v10100_v21, %v10100_v21  ;;  %v6746_v32 = vsel %vm1524_vm14, %v10100_v21, 0.0 }
 0x631   :  { %v6720_v44 = vpop.f32.mrf.mxu0  ;;  %v6747_v53 = vadd.f32 %v6746_v32, %v6745_v43 }
 0x632   :  { %v6763_v51 = vmul.f32 %v10082_v63, %v10082_v63  ;;  %v6736_v10 = vadd.f32 %v6735_v49, %v10082_v63  ;;  %v10104_v47 = vadd.f32 %v6720_v44, %v5984_v3  ;;  %v6778_v45 = vsel %vm1524_vm14, %v6762_v58, 0.0 }
 0x633   :  { %v6722_v11 = vpop.f32.mrf.mxu0  ;;  %v6779_v60 = vadd.f32 %v6778_v45, %v6777_v59 }
 0x634   :  { %v10092_v28 = vadd.f32 %v6722_v11, %v5986_v35  ;;  %v6768_v13 = vadd.f32 %v6767_v40, %v6763_v51  ;;  %v6764_v48 = vmul.f32 %v10104_v47, %v10104_v47  ;;  %v6748_v46 = vsel %vm1524_vm14, %v10104_v47, 0.0 }
 0x635   :  { %v6724_v22 = vpop.f32.mrf.mxu0  ;;  %v6749_v62 = vadd.f32 %v6748_v46, %v6747_v53 }
 0x636   :  { %v6737_v12 = vsel %vm1355_vm4, %v10092_v28, 0.0  ;;  %v6765_v33 = vmul.f32 %v10092_v28, %v10092_v28  ;;  %v10108_v36 = vadd.f32 %v6724_v22, %v5988_v16  ;;  %v6780_v61 = vsel %vm1524_vm14, %v6764_v48, 0.0 }
 0x637   :  { %v6738_v27 = vadd.f32 %v6737_v12, %v6736_v10  ;;  %v6781_v20 = vadd.f32 %v6780_v61, %v6779_v60 }
 0x638   :  { %v6769_v14 = vsel %vm1355_vm4, %v6765_v33, 0.0  ;;  %vm6750_vm4 = vcmask 914432   ;;  %v6766_v15 = vmul.f32 %v10108_v36, %v10108_v36 }
 0x639   :  { %v6739_v24 = vrot.slane %v6738_v27, 4  ;;  %v6770_v55 = vadd.f32 %v6769_v14, %v6768_v13  ;;  %v6751_v25 = vsel %vm6750_vm4, %v10108_v36, 0.0 }
 0x63a   :  { %v6782_v2 = vsel %vm6750_vm4, %v6766_v15, 0.0  ;;  %v6752_v37 = vadd.f32 %v6751_v25, %v6749_v62 }
 0x63b   :  { %v6740_v19 = vadd.f32 %v6739_v24, %v6738_v27  ;;  %v6771_v7 = vrot.slane %v6770_v55, 4  ;;  %v6783_v5 = vadd.f32 %v6782_v2, %v6781_v20 }
 0x63c   :  { %v6753_v1 = vrot.slane %v6752_v37, 4 }
 0x63d   :  { %v6741_v34 = vrot.slane %v6740_v19, 2  ;;  %v6772_v29 = vadd.f32 %v6771_v7, %v6770_v55  ;;  %v6784_v6 = vrot.slane %v6783_v5, 4 }
 0x63e   :  { %v6754_v9 = vadd.f32 %v6753_v1, %v6752_v37 }
 0x63f   :  { %v6742_v38 = vadd.f32 %v6741_v34, %v6740_v19  ;;  %v6773_v39 = vrot.slane %v6772_v29, 2  ;;  %v6785_v23 = vadd.f32 %v6784_v6, %v6783_v5 }
 0x640   :  { %v6755_v44 = vrot.slane %v6754_v9, 2 }
 0x641   :  { %v6743_v42 = vrot.slane %v6742_v38, 1  ;;  %v6774_v8 = vadd.f32 %v6773_v39, %v6772_v29  ;;  %v6786_v35 = vrot.slane %v6785_v23, 2 }
 0x642   :  { %v6756_v30 = vadd.f32 %v6755_v44, %v6754_v9 }
 0x643   :  { %v6744_v54 = vadd.f32 %v6743_v42, %v6742_v38  ;;  %v6775_v56 = vrot.slane %v6774_v8, 1  ;;  %v6787_v49 = vadd.f32 %v6786_v35, %v6785_v23 }
 0x644   :  { %v6757_v51 = vrot.slane %v6756_v30, 1 }
 0x645   :  { %v6776_v0 = vadd.f32 %v6775_v56, %v6774_v8  ;;  %6791 = vrot.lane.b32.xlu0 %v6744_v54, %s8471_s26  ;;  %v6788_v11 = vrot.slane %v6787_v49, 1 }
 0x646   :  { %v6758_v40 = vadd.f32 %v6757_v51, %v6756_v30 }
 0x647   :  { %6796 = vrot.lane.b32.xlu1 %v6776_v0, %s8471_s26  ;;  %v6789_v10 = vadd.f32 %v6788_v11, %v6787_v49 }
 0x649   :  { %6800 = vrot.lane.b32.xlu0 %v6744_v54, %s8470_s1 }
 0x64b   :  { %6804 = vrot.lane.b32.xlu1 %v6776_v0, %s8470_s1 }
 0x64d   :  { %6808 = vrot.lane.b32.xlu0 %v6744_v54, %s8472_s27 }
 0x64f   :  { %6812 = vrot.lane.b32.xlu1 %v6776_v0, %s8472_s27 }
 0x651   :  { %6816 = vrot.lane.b32.xlu0 %v6744_v54, %s8473_s28 }
 0x653   :  { %6820 = vrot.lane.b32.xlu1 %v6776_v0, %s8473_s28 }
 0x655   :  { %6824 = vrot.lane.b32.xlu0 %v6744_v54, %s8474_s29 }
 0x657   :  { %6828 = vrot.lane.b32.xlu1 %v6776_v0, %s8474_s29 }
 0x659   :  { %6832 = vrot.lane.b32.xlu0 %v6744_v54, %s8475_s30 }
 0x65b   :  { %6836 = vrot.lane.b32.xlu1 %v6776_v0, %s8475_s30 }
 0x65d   :  { %6840 = vrot.lane.b32.xlu0 %v6744_v54, %s8476_s8 }
 0x65f   :  { %6844 = vrot.lane.b32.xlu1 %v6776_v0, %s8476_s8 }
 0x661   :  { %6851 = vrot.lane.b32.xlu0 %v6758_v40, %s8471_s26 }
 0x663   :  { %6856 = vrot.lane.b32.xlu1 %v6789_v10, %s8471_s26 }
 0x665   :  { %6860 = vrot.lane.b32.xlu0 %v6758_v40, %s8470_s1 }
 0x667   :  { %6864 = vrot.lane.b32.xlu1 %v6789_v10, %s8470_s1 }
 0x669   :  { %6868 = vrot.lane.b32.xlu0 %v6758_v40, %s8472_s27 }
 0x66b   :  { %6872 = vrot.lane.b32.xlu1 %v6789_v10, %s8472_s27 }
 0x66d   :  { %6876 = vrot.lane.b32.xlu0 %v6758_v40, %s8473_s28 }
 0x66f   :  { %6880 = vrot.lane.b32.xlu1 %v6789_v10, %s8473_s28 }
 0x671   :  { %6884 = vrot.lane.b32.xlu0 %v6758_v40, %s8474_s29 }
 0x673   :  { %6888 = vrot.lane.b32.xlu1 %v6789_v10, %s8474_s29 }
 0x675   :  { %6892 = vrot.lane.b32.xlu0 %v6758_v40, %s8475_s30 }
 0x677   :  { %6896 = vrot.lane.b32.xlu1 %v6789_v10, %s8475_s30 }
 0x6b7   :  { %v6792_v12 = vpop.permute.xlu0 %6791 }
 0x6b8   :  { %v6794_v4 = vadd.f32 %v6792_v12, %v6744_v54 }
 0x6b9   :  { %v6797_v33 = vpop.permute.xlu1 %6796 }
 0x6ba   :  { %v6799_v7 = vadd.f32 %v6797_v33, %v6776_v0 }
 0x6bb   :  { %v6801_v13 = vpop.permute.xlu0 %6800 }
 0x6bc   :  { %v6803_v22 = vadd.f32 %v6801_v13, %v6794_v4 }
 0x6bd   :  { %v6805_v27 = vpop.permute.xlu1 %6804 }
 0x6be   :  { %v6807_v34 = vadd.f32 %v6805_v27, %v6799_v7 }
 0x6bf   :  { %v6809_v18 = vpop.permute.xlu0 %6808 }
 0x6c0   :  { %v6811_v29 = vadd.f32 %v6809_v18, %v6803_v22 }
 0x6c1   :  { %v6813_v14 = vpop.permute.xlu1 %6812 }
 0x6c2   :  { %v6815_v38 = vadd.f32 %v6813_v14, %v6807_v34  ;;  %v4593_v14 = vld [vmem:[%s10414_s4 + $0x4] sm:$0x1]  ;;  %v8455_v34 = vld [vmem:[%s10417_s5 + $0x10] ss:$8 sps:$4 sm:$0xff]  }
 0x6c3   :  { %v6817_v24 = vpop.permute.xlu0 %6816 }
 0x6c4   :  { %v6819_v39 = vadd.f32 %v6817_v24, %v6811_v29 }
 0x6c5   :  { %v6821_v55 = vpop.permute.xlu1 %6820 }
 0x6c6   :  { %v6823_v32 = vadd.f32 %v6821_v55, %v6815_v38  ;;  %v8457_v38 = vld [vmem:[%s10417_s5 + $0x14] ss:$8 sps:$4 sm:$0x77]  }
 0x6c7   :  { %v6825_v57 = vpop.permute.xlu0 %6824 }
 0x6c8   :  { %v6827_v48 = vadd.f32 %v6825_v57, %v6819_v39  ;;  %v4594_v57 = vld [vmem:[%s10414_s4 + $0x5] sm:$0x1] }
 0x6c9   :  { %v6829_v3 = vpop.permute.xlu1 %6828 }
 0x6ca   :  { %v6831_v8 = vadd.f32 %v6829_v3, %v6823_v32 }
 0x6cb   :  { %v6833_v19 = vpop.permute.xlu0 %6832 }
 0x6cc   :  { %v6835_v43 = vadd.f32 %v6833_v19, %v6827_v48 }
 0x6cd   :  { %v6837_v16 = vpop.permute.xlu1 %6836 }
 0x6ce   :  { %v6839_v46 = vadd.f32 %v6837_v16, %v6831_v8  ;;  %v8460_v8 = vld [vmem:[%s10417_s5 + $0x4] ss:$8 sps:$4 sm:$0xff]  }
 0x6cf   :  { %v6841_v58 = vpop.permute.xlu0 %6840 }
 0x6d0   :  { %v6843_v15 = vadd.f32 %v6841_v58, %v6835_v43 }
 0x6d1   :  { %v6845_v41 = vpop.permute.xlu1 %6844 }
 0x6d2   :  { %v6847_v54 = vadd.f32 %v6845_v41, %v6839_v46  ;;  %v6848_v59 = vadd.f32 %v6843_v15, %v6758_v40  ;;  %v7310_v41 = vrot.slane %v8455_v34, %v8592_v31 }
 0x6d3   :  { %v6852_v42 = vpop.permute.xlu0 %6851 }
 0x6d4   :  { %v6849_v25 = vadd.f32 %v6847_v54, %v6789_v10  ;;  %v6854_v62 = vadd.f32 %v6852_v42, %v6848_v59  ;;  %v8458_v42 = vld [vmem:[%s10417_s5] ss:$8 sps:$4 sm:$0xff]   ;;  %v7318_v15 = vcombine.high %v7310_v41, %v7310_v41 }
 0x6d5   :  { %v6857_v45 = vpop.permute.xlu1 %6856  ;;  %v7260_v59 = vrot.slane %v8458_v42, %v8592_v31 }
 0x6d6   :  { %v6859_v2 = vadd.f32 %v6857_v45, %v6849_v25  ;;  %v7317_v45 = vrot.slane %v8457_v38, %v8592_v31 }
 0x6d7   :  { %v6861_v53 = vpop.permute.xlu0 %6860 }
 0x6d8   :  { %v6863_v20 = vadd.f32 %v6861_v53, %v6854_v62  ;;  %v7319_v62 = vcombine.high %v7317_v45, %v7317_v45 }
 0x6d9   :  { %v6865_v56 = vpop.permute.xlu1 %6864 }
 0x6da   :  { %v6867_v5 = vadd.f32 %v6865_v56, %v6859_v2  ;;  %v10198_v2 = vrot.slane %v7317_v45, %v8592_v31 }
 0x6db   :  { %v6869_v61 = vpop.permute.xlu0 %6868 }
 0x6dc   :  { %v6871_v1 = vadd.f32 %v6869_v61, %v6863_v20  ;;  %v7267_v61 = vrot.slane %v8460_v8, %v8592_v31  ;;  %v10201_v20 = vrot.slane %v7318_v15, %v8592_v31 }
 0x6dd   :  { %v6873_v60 = vpop.permute.xlu1 %6872 }
 0x6de   :  { %v6875_v9 = vadd.f32 %v6873_v60, %v6867_v5 }
 0x6df   :  { %v6877_v0 = vpop.permute.xlu0 %6876 }
 0x6e0   :  { %v6879_v23 = vadd.f32 %v6877_v0, %v6871_v1  ;;  %v10195_v0 = vrot.slane %v7310_v41, %v8592_v31 }
 0x6e1   :  { %v6881_v37 = vpop.permute.xlu1 %6880 }
 0x6e2   :  { %v6883_v35 = vadd.f32 %v6881_v37, %v6875_v9  ;;  %v7269_v9 = vcombine.high %v7267_v61, %v7267_v61 }
 0x6e3   :  { %v6885_v6 = vpop.permute.xlu0 %6884 }
 0x6e4   :  { %v6887_v30 = vadd.f32 %v6885_v6, %v6879_v23  ;;  %v7268_v6 = vcombine.high %v7260_v59, %v7260_v59 }
 0x6e5   :  { %v6889_v44 = vpop.permute.xlu1 %6888 }
 0x6e6   :  { %v6891_v51 = vadd.f32 %v6889_v44, %v6883_v35 }
 0x6e7   :  { %v6893_v49 = vpop.permute.xlu0 %6892 }
 0x6e8   :  { %v6895_v11 = vadd.f32 %v6893_v49, %v6887_v30 }
 0x6e9   :  { %v6897_v40 = vpop.permute.xlu1 %6896 }
 0x6ea   :  { %v6901_v12 = vmul.f32 0.0022222223, %v6895_v11  ;;  %v6899_v10 = vadd.f32 %v6897_v40, %v6891_v51  ;;  %v10210_v51 = vrot.slane %v7319_v62, %v8592_v31  ;;  %v10214_v11 = vcombine.high %v10195_v0, %v10195_v0 }
 0x6ec   :  { %v6903_v33 = vmul.f32 %v6901_v12, %v6901_v12  ;;  %v6902_v13 = vmul.f32 0.0022222223, %v6899_v10  ;;  %v10223_v10 = vcombine.high %v10201_v20, %v10201_v20 }
 0x6ee   :  { %v6904_v27 = vsub.f32 %v6902_v13, %v6903_v33  ;;  %v10226_v33 = vrot.slane %v7260_v59, %v8592_v31 }
 0x6f0   :  { %v6905_v18 = vadd.f32 1e-05, %v6904_v27 }
 0x6f2   :  { %8465 = vrsqrt.f32 %v6905_v18 }
 0x6ff   :  { %v8466_v24 = vpop.eup %8465 }
 0x700   :  { %v6907_v55 = vmul.f32 %v8466_v24, %v4593_v14  ;;  %v10230_v14 = vrot.slane %v7267_v61, %v8592_v31  ;;  %v10233_v24 = vrot.slane %v7268_v6, %v8592_v31 }
 0x702   :  { %6914 = vrot.lane.b32.xlu1 %v6907_v55, %s8475_s30  ;;  %6911 = vrot.lane.b32.xlu0 %v6907_v55, %s8476_s8  ;;  %v6908_v3 = vmul.f32 %v6907_v55, %v6901_v12  ;;  %v10219_v12 = vcombine.high %v10198_v2, %v10198_v2 }
 0x704   :  { %v6909_v4 = vsub.f32 %v4594_v57, %v6908_v3 }
 0x706   :  { %6917 = vrot.lane.b32.xlu0 %v6907_v55, %s8474_s29  ;;  %6940 = vrot.lane.b32.xlu1 %v6909_v4, %s8476_s8 }
 0x70a   :  { %6920 = vrot.lane.b32.xlu0 %v6907_v55, %s8473_s28  ;;  %6943 = vrot.lane.b32.xlu1 %v6909_v4, %s8475_s30 }
 0x70e   :  { %6923 = vrot.lane.b32.xlu0 %v6907_v55, %s8472_s27  ;;  %6946 = vrot.lane.b32.xlu1 %v6909_v4, %s8474_s29 }
 0x712   :  { %6926 = vrot.lane.b32.xlu0 %v6907_v55, %s8470_s1  ;;  %6949 = vrot.lane.b32.xlu1 %v6909_v4, %s8473_s28 }
 0x716   :  { %6929 = vrot.lane.b32.xlu0 %v6907_v55, %s8471_s26  ;;  %6952 = vrot.lane.b32.xlu1 %v6909_v4, %s8472_s27 }
 0x71a   :  { %6955 = vrot.lane.b32.xlu0 %v6909_v4, %s8470_s1  ;;  %6958 = vrot.lane.b32.xlu1 %v6909_v4, %s8471_s26 }
 0x774   :  { %v6915_v19 = vpop.permute.xlu1 %6914  ;;  %v6912_v7 = vpop.permute.xlu0 %6911 }
 0x775   :  { %v6932_v39 = vsel %vm1513_vm9, %v6907_v55, %v6912_v7  ;;  %v10236_v55 = vrot.slane %v7269_v9, %v8592_v31 }
 0x776   :  { %v6933_v43 = vsel %vm1515_vm10, %v6932_v39, %v6915_v19 }
 0x778   :  { %v6918_v22 = vpop.permute.xlu0 %6917  ;;  %v6941_v16 = vpop.permute.xlu1 %6940 }
 0x779   :  { %v6934_v46 = vsel %vm1364_vm5, %v6933_v43, %v6918_v22  ;;  %v6961_v37 = vsel %vm1513_vm9, %v6909_v4, %v6941_v16  ;;  %vm7702_vm9 = vcmask 915456  }
 0x77c   :  { %v6921_v29 = vpop.permute.xlu0 %6920  ;;  %v6944_v58 = vpop.permute.xlu1 %6943 }
 0x77d   :  { %v6935_v53 = vsel %vm1518_vm11, %v6934_v46, %v6921_v29  ;;  %v6962_v23 = vsel %vm1515_vm10, %v6961_v37, %v6944_v58  ;;  %vm7744_vm10 = vcmask 1041409  }
 0x780   :  { %v6924_v32 = vpop.permute.xlu0 %6923  ;;  %v6947_v48 = vpop.permute.xlu1 %6946 }
 0x781   :  { %v6936_v25 = vsel %vm1520_vm12, %v6935_v53, %v6924_v32  ;;  %v6963_v30 = vsel %vm1364_vm5, %v6962_v23, %v6947_v48  ;;  %v10260_v53 = vcombine.high %v10233_v24, %v10233_v24  ;;  %vm7700_vm5 = vcmask 1046528  }
 0x784   :  { %v6927_v54 = vpop.permute.xlu0 %6926  ;;  %v6950_v56 = vpop.permute.xlu1 %6949 }
 0x785   :  { %v6937_v60 = vsel %vm1522_vm13, %v6936_v25, %v6927_v54  ;;  %v6964_v40 = vsel %vm1518_vm11, %v6963_v30, %v6950_v56  ;;  %v10264_v54 = vcombine.high %v10236_v55, %v10236_v55  ;;  %vm7747_vm11 = vcmask 1024  }
 0x786   :  { %v6975_v44 = vrot.slane %v6937_v60, %v9020_v52 }
 0x788   :  { %v6930_v5 = vpop.permute.xlu0 %6929  ;;  %v6953_v1 = vpop.permute.xlu1 %6952  ;;  %v6977_v57 = vmul.f32 %v6975_v44, %v10102_v26  ;;  %v6979_v3 = vmul.f32 %v6975_v44, %v10100_v21  ;;  %v6981_v4 = vmul.f32 %v6975_v44, %v10104_v47  ;;  %v6983_v7 = vmul.f32 %v6975_v44, %v10108_v36 }
 0x789   :  { %v6938_v35 = vsel %vm1524_vm14, %v6937_v60, %v6930_v5  ;;  %v6965_v13 = vsel %vm1520_vm12, %v6964_v40, %v6953_v1 }
 0x78a   :  { %v6971_v49 = vrot.slane %v6938_v35, %v9020_v52 }
 0x78c   :  { %v6956_v27 = vpop.permute.xlu0 %6955  ;;  %v6959_v18 = vpop.permute.xlu1 %6958  ;;  %v6976_v22 = vmul.f32 %v6971_v49, %v10080_v17  ;;  %v6978_v29 = vmul.f32 %v6971_v49, %v10078_v50  ;;  %v6980_v58 = vmul.f32 %v6971_v49, %v10082_v63  ;;  %v6982_v26 = vmul.f32 %v6971_v49, %v10092_v28 }
 0x78d   :  { %v6966_v19 = vsel %vm1522_vm13, %v6965_v13, %v6956_v27  ;;  %v10252_v28 = vcombine.high %v10226_v33, %v10226_v33 }
 0x78e   :  { %v6991_v16 = vrot.slane %v6966_v19, %v9020_v52  ;;  %v6967_v34 = vsel %vm1524_vm14, %v6966_v19, %v6959_v18 }
 0x78f   :  { %v6987_v21 = vrot.slane %v6967_v34, %v9020_v52  ;;  %v10256_v52 = vcombine.high %v10230_v14, %v10230_v14 }
 0x790   :  { %v6993_v38 = vadd.f32 %v6991_v16, %v6977_v57  ;;  %v6995_v47 = vadd.f32 %v6991_v16, %v6979_v3  ;;  %v6997_v39 = vadd.f32 %v6991_v16, %v6981_v4  ;;  %v6999_v41 = vadd.f32 %v6991_v16, %v6983_v7 }
 0x791   :  { %v6992_v32 = vadd.f32 %v6987_v21, %v6976_v22  ;;  %v6994_v36 = vadd.f32 %v6987_v21, %v6978_v29  ;;  %v6996_v48 = vadd.f32 %v6987_v21, %v6980_v58  ;;  %v6998_v17 = vadd.f32 %v6987_v21, %v6982_v26 }
 0x792   :  { %v7001_v42 = vmax.f32 %v6993_v38, 0.0  ;;  %v7003_v8 = vmax.f32 %v6995_v47, 0.0  ;;  %v7005_v43 = vmax.f32 %v6997_v39, 0.0  ;;  %v7007_v45 = vmax.f32 %v6999_v41, 0.0 }
 0x793   :  { %v7000_v46 = vmax.f32 %v6992_v32, 0.0  ;;  %v7002_v50 = vmax.f32 %v6994_v36, 0.0  ;;  %v7004_v15 = vmax.f32 %v6996_v48, 0.0  ;;  %v7006_v63 = vmax.f32 %v6998_v17, 0.0 }
 0x795   :  { %v7016_v56 = vcombine.low %v7000_v46, %v7001_v42  ;;  %v7017_v59 = vcombine.high %v7000_v46, %v7001_v42  ;;  %v7066_v61 = vcombine.low %v7002_v50, %v7003_v8  ;;  %v7067_v25 = vcombine.high %v7002_v50, %v7003_v8 }
 0x796   :  { %v7116_v60 = vcombine.low %v7004_v15, %v7005_v43  ;;  %v7117_v62 = vcombine.high %v7004_v15, %v7005_v43  ;;  %v7166_v37 = vcombine.low %v7006_v63, %v7007_v45  ;;  %v7167_v5 = vcombine.high %v7006_v63, %v7007_v45 }
 0x797   :  { %v10267_v1 = vrot.slane %v7016_v56, %v8592_v31  ;;  %v10270_v6 = vrot.slane %v7017_v59, %v8592_v31  ;;  %v10273_v9 = vrot.slane %v7066_v61, %v8592_v31  ;;  %v7081_v23 = vrot.slane %v7067_v25, %v8592_v31 }
 0x798   :  { %v7124_v44 = vrot.slane %v7116_v60, %v8592_v31  ;;  %v7131_v35 = vrot.slane %v7117_v62, %v8592_v31  ;;  %v7174_v30 = vrot.slane %v7166_v37, %v8592_v31  ;;  %v7181_v49 = vrot.slane %v7167_v5, %v8592_v31 }
 0x799   :  { %v7032_v40 = vcombine.high %v10267_v1, %v10267_v1  ;;  %v7033_v13 = vcombine.high %v10270_v6, %v10270_v6  ;;  %v10286_v27 = vrot.slane %v10267_v1, %v8592_v31  ;;  %v10290_v18 = vrot.slane %v10270_v6, %v8592_v31 }
 0x79a   :  { %v7082_v57 = vcombine.high %v10273_v9, %v10273_v9  ;;  %v7083_v3 = vcombine.high %v7081_v23, %v7081_v23  ;;  %v10296_v4 = vrot.slane %v10273_v9, %v8592_v31  ;;  %v10299_v19 = vrot.slane %v7081_v23, %v8592_v31 }
 0x79b   :  { %v7132_v7 = vcombine.high %v7124_v44, %v7124_v44  ;;  %v7133_v22 = vcombine.high %v7131_v35, %v7131_v35  ;;  %v7140_v16 = vrot.slane %v7124_v44, %v8592_v31  ;;  %v7147_v34 = vrot.slane %v7131_v35, %v8592_v31 }
 0x79c   :  { %v10304_v29 = vrot.slane %v7083_v3, %v8592_v31  ;;  %v7182_v58 = vcombine.high %v7174_v30, %v7174_v30  ;;  %v7183_v26 = vcombine.high %v7181_v49, %v7181_v49  ;;  %v7190_v21 = vrot.slane %v7174_v30, %v8592_v31 }
 0x79d   :  { %v7161_v38 = vrot.slane %v7133_v22, %v8592_v31  ;;  %v7197_v47 = vrot.slane %v7181_v49, %v8592_v31  ;;  %v7154_v39 = vrot.slane %v7132_v7, %v8592_v31  ;;  %v7162_v41 = vcombine.high %v7140_v16, %v7140_v16 }
 0x79e   :  { %v7204_v32 = vrot.slane %v7182_v58, %v8592_v31  ;;  %v7211_v36 = vrot.slane %v7183_v26, %v8592_v31  ;;  %v7212_v48 = vcombine.high %v7190_v21, %v7190_v21  ;;  %v7390_v17 = vmul.f32 %v10201_v20, %v7190_v21 }
 0x79f   :  { %v7165_v42 = vcombine.high %v7161_v38, %v7161_v38  ;;  %v7394_v8 = vmul.f32 %v10210_v51, %v7197_v47  ;;  %v7115_v43 = vcombine.high %v10304_v29, %v10304_v29  ;;  %v7163_v45 = vcombine.high %v7147_v34, %v7147_v34 }
 0x7a0   :  { %v7213_v46 = vcombine.high %v7204_v32, %v7204_v32  ;;  %v7391_v50 = vmul.f32 %v10214_v11, %v7204_v32  ;;  %v7392_v15 = vmul.f32 %v10223_v10, %v7212_v48  ;;  %v7395_v63 = vmul.f32 %v10219_v12, %v7211_v36 }
 0x7a1   :  { %v7389_v56 = vmul.f32 %v10195_v0, %v7165_v42  ;;  %v7164_v59 = vcombine.high %v7154_v39, %v7154_v39  ;;  %v7381_v61 = vmul.f32 %v10226_v33, %v7115_v43  ;;  %v7382_v25 = vmul.f32 %v10233_v24, %v7140_v16 }
 0x7a2   :  { %v7393_v60 = vmul.f32 %v10198_v2, %v7213_v46  ;;  %v7624_v62 = vcombine.low %v7391_v50, %v7392_v15  ;;  %v7653_v37 = vrot.slane %v7395_v63, %v8592_v31  ;;  %v7383_v5 = vmul.f32 %v10252_v28, %v7154_v39 }
 0x7a3   :  { %v7623_v9 = vcombine.low %v7389_v56, %v7390_v17  ;;  %v7384_v23 = vmul.f32 %v10260_v53, %v7162_v41  ;;  %v7385_v44 = vmul.f32 %v10230_v14, %v7164_v59  ;;  %v7386_v35 = vmul.f32 %v10236_v55, %v7147_v34 }
 0x7a4   :  { %v7625_v30 = vcombine.low %v7393_v60, %v7394_v8  ;;  %v7639_v49 = vrot.slane %v7624_v62, %v8592_v31  ;;  %v7387_v3 = vmul.f32 %v10256_v52, %v7161_v38  ;;  %v7388_v7 = vmul.f32 %v10264_v54, %v7163_v45 }
 0x7a5   :  { %v7632_v22 = vrot.slane %v7623_v9, %v8592_v31  ;;  %v7557_v16 = vcombine.low %v7381_v61, %v7382_v25  ;;  %v7558_v58 = vcombine.low %v7383_v5, %v7384_v23  ;;  %v7559_v26 = vcombine.low %v7385_v44, %v7386_v35 }
 0x7a6   :  { %v7646_v21 = vrot.slane %v7625_v30, %v8592_v31  ;;  %v7560_v47 = vcombine.low %v7387_v3, %v7388_v7  ;;  %v7104_v39 = vrot.slane %v7082_v57, %v8592_v31  ;;  %v7112_v34 = vcombine.high %v10296_v4, %v10296_v4 }
 0x7a7   :  { %v7654_v41 = vcombine.low %v7632_v22, %v7639_v49  ;;  %v7655_v32 = vcombine.high %v7632_v22, %v7639_v49  ;;  %v7567_v36 = vrot.slane %v7557_v16, %v8592_v31  ;;  %v7574_v38 = vrot.slane %v7558_v58, %v8592_v31 }
 0x7a8   :  { %v7656_v48 = vcombine.low %v7646_v21, %v7653_v37  ;;  %v7657_v17 = vcombine.high %v7646_v21, %v7653_v37  ;;  %v7581_v42 = vrot.slane %v7559_v26, %v8592_v31  ;;  %v7588_v8 = vrot.slane %v7560_v47, %v8592_v31 }
 0x7a9   :  { %v7664_v43 = vrot.slane %v7654_v41, %v8592_v31  ;;  %v7671_v45 = vrot.slane %v7655_v32, %v8592_v31  ;;  %v7589_v57 = vcombine.low %v7567_v36, %v7574_v38  ;;  %v7590_v46 = vcombine.high %v7567_v36, %v7574_v38 }
 0x7aa   :  { %v7678_v50 = vrot.slane %v7656_v48, %v8592_v31  ;;  %v7685_v15 = vrot.slane %v7657_v17, %v8592_v31  ;;  %v7591_v63 = vcombine.low %v7581_v42, %v7588_v8  ;;  %v7592_v56 = vcombine.high %v7581_v42, %v7588_v8 }
 0x7ab   :  { %v7599_v59 = vrot.slane %v7589_v57, %v8592_v31  ;;  %v7606_v61 = vrot.slane %v7590_v46, %v8592_v31  ;;  %v7113_v25 = vcombine.high %v10299_v19, %v10299_v19  ;;  %v7114_v60 = vcombine.high %v7104_v39, %v7104_v39 }
 0x7ac   :  { %v7686_v62 = vcombine.low %v7664_v43, %v7678_v50  ;;  %v7687_v37 = vcombine.low %v7671_v45, %v7685_v15  ;;  %v7613_v5 = vrot.slane %v7591_v63, %v8592_v31  ;;  %v7620_v9 = vrot.slane %v7592_v56, %v8592_v31 }
 0x7ad   :  { %v7374_v23 = vmul.f32 %v10195_v0, %v10296_v4  ;;  %v7375_v44 = vmul.f32 %v10201_v20, %v7104_v39  ;;  %v7376_v35 = vmul.f32 %v10214_v11, %v7112_v34  ;;  %v7377_v30 = vmul.f32 %v10223_v10, %v7114_v60 }
 0x7ae   :  { %v7711_v49 = vsel %vm7700_vm5, %v7686_v62, 0.0  ;;  %v7712_v3 = vsel %vm7702_vm9, %v7687_v37, 0.0  ;;  %v7621_v7 = vcombine.low %v7599_v59, %v7613_v5  ;;  %v7622_v22 = vcombine.low %v7606_v61, %v7620_v9 }
 0x7af   :  { %v7713_v16 = vadd.f32 %v7712_v3, %v7711_v49  ;;  %v7378_v58 = vmul.f32 %v10198_v2, %v10299_v19  ;;  %v7379_v26 = vmul.f32 %v10210_v51, %v10304_v29  ;;  %v7380_v0 = vmul.f32 %v10219_v12, %v7113_v25 }
 0x7b0   :  { %v7707_v20 = vsel %vm1524_vm14, %v7622_v22, 0.0  ;;  %v7492_v11 = vcombine.low %v7374_v23, %v7375_v44  ;;  %v7493_v4 = vcombine.low %v7376_v35, %v7377_v30  ;;  %v7054_v10 = vrot.slane %v7032_v40, %v8592_v31 }
 0x7b1   :  { %7714 = vadd.xlane.f32.xlu0 %v7713_v16  ;;  %v7708_v21 = vadd.f32 %v7707_v20, %v7621_v7  ;;  %v7494_v47 = vcombine.low %v7378_v58, %v7379_v26  ;;  %v7522_v39 = vrot.slane %v7380_v0, %v8592_v31  ;;  %v7061_v2 = vrot.slane %v7033_v13, %v8592_v31 }
 0x7b2   :  { %v7501_v51 = vrot.slane %v7492_v11, %v8592_v31  ;;  %v7508_v12 = vrot.slane %v7493_v4, %v8592_v31  ;;  %v7062_v19 = vcombine.high %v10286_v27, %v10286_v27  ;;  %v7063_v1 = vcombine.high %v10290_v18, %v10290_v18 }
 0x7b3   :  { %7709 = vadd.xlane.f32.xlu1 %v7708_v21  ;;  %v7515_v40 = vrot.slane %v7494_v47, %v8592_v31  ;;  %v7064_v29 = vcombine.high %v7054_v10, %v7054_v10  ;;  %v7065_v34 = vcombine.high %v7061_v2, %v7061_v2  ;;  %v7366_v41 = vmul.f32 %v10226_v33, %v10286_v27 }
 0x7b4   :  { %v7523_v6 = vcombine.low %v7501_v51, %v7508_v12  ;;  %v7524_v13 = vcombine.high %v7501_v51, %v7508_v12  ;;  %v7367_v32 = vmul.f32 %v10233_v24, %v7054_v10  ;;  %v7368_v36 = vmul.f32 %v10252_v28, %v7062_v19 }
 0x7b5   :  { %v7525_v38 = vcombine.low %v7515_v40, %v7522_v39  ;;  %v7526_v48 = vcombine.high %v7515_v40, %v7522_v39  ;;  %v7369_v17 = vmul.f32 %v10260_v53, %v7064_v29  ;;  %v7370_v42 = vmul.f32 %v10230_v14, %v10290_v18 }
 0x7b6   :  { %v7533_v8 = vrot.slane %v7523_v6, %v8592_v31  ;;  %v7540_v43 = vrot.slane %v7524_v13, %v8592_v31  ;;  %v7371_v45 = vmul.f32 %v10236_v55, %v7061_v2  ;;  %v7372_v33 = vmul.f32 %v10256_v52, %v7063_v1 }
 0x7b7   :  { %v7547_v27 = vrot.slane %v7525_v38, %v8592_v31  ;;  %v7554_v24 = vrot.slane %v7526_v48, %v8592_v31  ;;  %v7373_v28 = vmul.f32 %v10264_v54, %v7065_v34  ;;  %v7426_v57 = vcombine.low %v7366_v41, %v7367_v32 }
 0x7b8   :  { %v7427_v46 = vcombine.low %v7368_v36, %v7369_v17  ;;  %v7428_v53 = vcombine.low %v7370_v42, %v7371_v45  ;;  %v12_v60 = vstv %s10418_s6 }
 0x7b9   :  { %v7555_v50 = vcombine.low %v7533_v8, %v7547_v27  ;;  %v7556_v15 = vcombine.low %v7540_v43, %v7554_v24  ;;  %v7429_v14 = vcombine.low %v7372_v33, %v7373_v28  ;;  %v7436_v18 = vrot.slane %v7426_v57, %v8592_v31  ;;  %13 = vst [vmem:[#allocation5] sm:$0x1] %v12_v60 }
 0x7ba   :  { %v7443_v63 = vrot.slane %v7427_v46, %v8592_v31  ;;  %v7450_v56 = vrot.slane %v7428_v53, %v8592_v31 }
 0x7bb   :  { %v7701_v55 = vsel %vm7700_vm5, %v7555_v50, 0.0  ;;  %v7703_v52 = vsel %vm7702_vm9, %v7556_v15, 0.0  ;;  %v7457_v59 = vrot.slane %v7429_v14, %v8592_v31 }
 0x7bc   :  { %v7704_v61 = vadd.f32 %v7703_v52, %v7701_v55  ;;  %v7458_v54 = vcombine.low %v7436_v18, %v7443_v63  ;;  %v7459_v25 = vcombine.high %v7436_v18, %v7443_v63 }
 0x7bd   :  { %v7460_v62 = vcombine.low %v7450_v56, %v7457_v59  ;;  %v7461_v37 = vcombine.high %v7450_v56, %v7457_v59 }
 0x7be   :  { %7705 = vadd.xlane.f32.xlu0 %v7704_v61  ;;  %v7468_v5 = vrot.slane %v7458_v54, %v8592_v31  ;;  %v7475_v9 = vrot.slane %v7459_v25, %v8592_v31 }
 0x7bf   :  { %v7482_v23 = vrot.slane %v7460_v62, %v8592_v31  ;;  %v7489_v44 = vrot.slane %v7461_v37, %v8592_v31 }
 0x7c0   :  { %v8107_v19 = vld [vmem:[#allocation5] ss:$0 sm:$0xff] }
 0x7c1   :  { %v7490_v35 = vcombine.low %v7468_v5, %v7482_v23  ;;  %v7491_v30 = vcombine.low %v7475_v9, %v7489_v44 }
 0x7c3   :  { %v7696_v49 = vsel %vm1524_vm14, %v7491_v30, 0.0 }
 0x7c4   :  { %v7697_v3 = vadd.f32 %v7696_v49, %v7490_v35 }
 0x7c6   :  { %7698 = vadd.xlane.f32.xlu0 %v7697_v3 }
 0x83a   :  { %v7715_v7 = vpop.xlane.xlu0 %7714 }
 0x83b   :  { %v7724_v22 = vsel %vm7700_vm5, %v7715_v7, 0.0 }
 0x83c   :  { %v7710_v16 = vpop.xlane.xlu1 %7709 }
 0x83d   :  { %v7725_v58 = vadd.f32 %v7724_v22, %v7710_v16 }
 0x83f   :  { %v7726_v26 = vrot.slane %v7725_v58, 4 }
 0x841   :  { %v7727_v0 = vadd.f32 %v7726_v26, %v7725_v58 }
 0x843   :  { %v7728_v11 = vrot.slane %v7727_v0, 2 }
 0x845   :  { %v7729_v4 = vadd.f32 %v7728_v11, %v7727_v0 }
 0x847   :  { %v7706_v20 = vpop.xlane.xlu0 %7705  ;;  %v7730_v47 = vrot.slane %v7729_v4, 1 }
 0x848   :  { %v7716_v10 = vsel %vm7700_vm5, %v7706_v20, 0.0 }
 0x849   :  { %v7731_v51 = vadd.f32 %v7730_v47, %v7729_v4 }
 0x84b   :  { %v7740_v40 = vadd.f32 %v8107_v19, %v7731_v51 }
 0x84d   :  { %v7743_v41 = vrot.slane %v7740_v40, 7 }
 0x84f   :  { %v7699_v21 = vpop.xlane.xlu0 %7698 }
 0x850   :  { %v7717_v31 = vadd.f32 %v7716_v10, %v7699_v21 }
 0x852   :  { %v7718_v39 = vrot.slane %v7717_v31, 4 }
 0x854   :  { %v7719_v2 = vadd.f32 %v7718_v39, %v7717_v31 }
 0x856   :  { %v7720_v12 = vrot.slane %v7719_v2, 2 }
 0x858   :  { %v7721_v1 = vadd.f32 %v7720_v12, %v7719_v2 }
 0x85a   :  { %v7722_v29 = vrot.slane %v7721_v1, 1 }
 0x85c   :  { %v7723_v34 = vadd.f32 %v7722_v29, %v7721_v1 }
 0x85e   :  { %v7739_v6 = vadd.f32 %v8107_v19, %v7723_v34 }
 0x860   :  { %v7745_v13 = vsel %vm7744_vm10, %v7743_v41, %v7739_v6 }
 0x861   :  { %7748 = vst.msk [vmem:[%s10419_s7] sm:$0x3] %vm7747_vm11, %v7745_v13 }

</bundles_post_ra>
